<compile_context>
chip_gen: v7x
topology: tpu7x:2x2x1
jax: 0.10.0
libtpu: 0.0.40
codegen_flags: <defaults>
</compile_context>

<pallas_src>
import functools

import jax
import jax.numpy as jnp
from jax.experimental import pallas as pl
from jax.experimental.pallas import tpu as pltpu


def graph_gru_kernel(msg_ref, nf_ref, conn_ref, wblk_ref, wnf_ref, bias_ref,
                     diag_ref, sumb_ref, out_ref, *, depth, n, hidden, bb):
    H = hidden
    nH = n * H
    R = bb * n

    # ---------------- hoisted, loop-invariant work -------------------------
    # Message state in the lane-dense compute layout:
    #   msg[b*n + i, j*H + h] == message[b, i, j, h]
    msg = msg_ref[...].reshape(R, nH)

    # Node features pre-broadcast over the first node index (wrapper-built):
    #   nf2d[b*n + i, j*V + v] == nodeFeature[b, j, v]
    nf2d = nf_ref[...].reshape(R, -1)

    # Fused node-feature projection for all three gates (single MXU pass):
    #   base3[:, 0:nH]    -> nf[j] @ W_z[:V] + b_z   (already broadcast over i)
    #   base3[:, nH:2nH]  -> nf[j] @ W_r      + b_u
    #   base3[:, 2nH:3nH] -> nf[j] @ W_h[:V]  + b_h
    base3 = jnp.dot(nf2d, wnf_ref[...],
                    preferred_element_type=jnp.float32) + bias_ref[...]
    base_z = base3[:, 0 * nH:1 * nH]
    base_r = base3[:, 1 * nH:2 * nH]
    base_h = base3[:, 2 * nH:3 * nH]

    # Connectivity mask already expanded to the compute layout in the wrapper
    # (rows with mask <= 0 are zeroed each iteration, matching torch `*= 0`).
    connected = conn_ref[...].reshape(R, nH)

    # Hoisted weight loads (block-diagonal kron(I_n, W) forms, wrapper-built).
    wzh_blk = wblk_ref[:, 0 * nH:1 * nH]   # kron(I_n, W_zh)
    ur_blk = wblk_ref[:, 1 * nH:2 * nH]    # kron(I_n, U_r)
    whh_blk = wblk_ref[:, 2 * nH:3 * nH]   # kron(I_n, W_hh)
    allsum = wblk_ref[:, 3 * nH:4 * nH]    # kron(ones(n,n), I_H): lane-group sum

    diag_mask = diag_ref[...]              # (R, nH): 1 where lane-group == row%n
    sum_bcast = sumb_ref[...]              # (R, R):  1 where same graph block

    # ------------- statically unrolled message-passing iterations ----------
    # depth == 3 here; for large depth switch to lax.fori_loop(..., unroll=2-4)
    # to bound vreg live ranges.
    for _ in range(depth):
        # msg_sum[b, j] broadcast over i, entirely on the MXU (no relayouts):
        #   a[b*n+i, j*H+h]    = sum_y msg[b, i, y, h]   (lane-group sum)
        #   s_bc[b*n+i, j*H+h] = sum_y msg[b, j, y, h]   (node-index swap)
        a = jnp.dot(msg, allsum, preferred_element_type=jnp.float32)
        s_bc = jnp.dot(sum_bcast, a * diag_mask,
                       preferred_element_type=jnp.float32)
        mns = s_bc - msg                               # message_neighbor_sum

        z = jax.nn.sigmoid(
            base_z + jnp.dot(mns, wzh_blk, preferred_element_type=jnp.float32))
        r = jax.nn.sigmoid(
            base_r + jnp.dot(msg, ur_blk, preferred_element_type=jnp.float32))

        # sum of r*msg over the first node index, broadcast back over it.
        sg_bc = jnp.dot(sum_bcast, r * msg,
                        preferred_element_type=jnp.float32)
        msg_h = jnp.tanh(
            base_h + jnp.dot(sg_bc, whh_blk,
                             preferred_element_type=jnp.float32))

        msg = ((1.0 - z) * mns + z * msg_h) * connected

    out_ref[...] = msg.reshape(bb, n, nH)


def graph_gru_forward(message, node_feature, mask, params, depth,
                      graphs_per_block=None):
    """message: (B, n, n, H), node_feature: (B, n, V), mask: (B, n, n)."""
    B, n, _, H = message.shape
    V = node_feature.shape[-1]
    nH = n * H
    nV = n * V
    bb = B if graphs_per_block is None else graphs_per_block
    assert B % bb == 0, "batch must divide evenly into graph blocks"
    R = bb * n
    f32 = jnp.float32
    eye_n = jnp.eye(n, dtype=f32)

    # ---- lane-dense I/O layouts (last dim n*H = 256, a multiple of 128) ----
    msg_io = message.reshape(B, n, nH)
    nf_rep = jnp.broadcast_to(node_feature.reshape(B, 1, nV), (B, n, nV))
    conn = jnp.repeat((mask > 0.0).astype(f32), H, axis=-1)          # (B, n, nH)

    # ---- wrapper-built fused / block-diagonal weights ----------------------
    wzh_blk = jnp.kron(eye_n, params["wz_h"])                        # (nH, nH)
    ur_blk = jnp.kron(eye_n, params["ur"])
    whh_blk = jnp.kron(eye_n, params["wh_h"])
    allsum = jnp.kron(jnp.ones((n, n), f32), jnp.eye(H, dtype=f32))
    w_blk = jnp.concatenate([wzh_blk, ur_blk, whh_blk, allsum], axis=1)  # (nH, 4nH)

    wnf_blk = jnp.concatenate([jnp.kron(eye_n, params["wz_v"]),
                               jnp.kron(eye_n, params["wr"]),
                               jnp.kron(eye_n, params["wh_v"])], axis=1)  # (nV, 3nH)
    bias_row = jnp.concatenate([jnp.tile(params["bz"], (1, n)),
                                jnp.tile(params["bu"], (1, n)),
                                jnp.tile(params["bh"], (1, n))], axis=1)  # (1, 3nH)

    # Constant selector masks driving the in-kernel sum / broadcast matmuls.
    ridx = jnp.arange(R)
    diag_mask = (jnp.arange(nH)[None, :] // H
                 == (ridx % n)[:, None]).astype(f32)                 # (R, nH)
    sum_bcast = ((ridx[:, None] // n)
                 == (ridx[None, :] // n)).astype(f32)                # (R, R)

    kernel = functools.partial(graph_gru_kernel, depth=depth, n=n,
                               hidden=H, bb=bb)

    nblocks = B // bb
    mm = 2 * R * nH * nH
    flops = int(nblocks * (2 * R * nV * 3 * nH
                           + depth * (4 * mm + 2 * (2 * R * R * nH)
                                      + 12 * R * nH)))
    transcendentals = int(nblocks * depth * 3 * R * nH)
    bytes_accessed = int(4 * (2 * B * n * nH + B * n * nV + B * n * nH
                              + nH * 4 * nH + nV * 3 * nH + 3 * nH
                              + R * nH + R * R))

    out = pl.pallas_call(
        kernel,
        out_shape=jax.ShapeDtypeStruct((B, n, nH), f32),
        grid_spec=pltpu.PrefetchScalarGridSpec(
            num_scalar_prefetch=0,
            grid=(nblocks,),
            in_specs=[
                pl.BlockSpec((bb, n, nH), lambda g: (g, 0, 0)),   # message
                pl.BlockSpec((bb, n, nV), lambda g: (g, 0, 0)),   # nf (broadcast)
                pl.BlockSpec((bb, n, nH), lambda g: (g, 0, 0)),   # connectivity
                pl.BlockSpec((nH, 4 * nH), lambda g: (0, 0)),     # weight slab
                pl.BlockSpec((nV, 3 * nH), lambda g: (0, 0)),     # nf weights
                pl.BlockSpec((1, 3 * nH), lambda g: (0, 0)),      # fused biases
                pl.BlockSpec((R, nH), lambda g: (0, 0)),          # diag mask
                pl.BlockSpec((R, R), lambda g: (0, 0)),           # sum/bcast mask
            ],
            out_specs=pl.BlockSpec((bb, n, nH), lambda g: (g, 0, 0)),
        ),
        compiler_params=pltpu.CompilerParams(
            dimension_semantics=("parallel",),
            vmem_limit_bytes=32 * 1024 * 1024),
        cost_estimate=pl.CostEstimate(
            flops=flops, transcendentals=transcendentals,
            bytes_accessed=bytes_accessed),
    )(msg_io, nf_rep, conn, w_blk, wnf_blk, bias_row, diag_mask, sum_bcast)

    return out.reshape(B, n, n, H)


def graph_gru_reference(message, nf, mask, p, depth):
    """Pure-JAX single-graph reference mirroring the PyTorch forward."""
    conn = (mask > 0.0).astype(jnp.float32)[:, :, None]
    msg = message
    for _ in range(depth):
        msg_sum = msg.sum(axis=1)
        mns = msg_sum[None, :, :] - msg
        z = jax.nn.sigmoid(nf @ p["wz_v"] + p["bz"]
                           + jnp.einsum("ijh,hk->ijk", mns, p["wz_h"]))
        r = jax.nn.sigmoid(nf @ p["wr"]
                           + jnp.einsum("ijh,hk->ijk", msg, p["ur"]) + p["bu"])
        sum_gated = (r * msg).sum(axis=0)
        msg_h = jnp.tanh(nf @ p["wh_v"] + sum_gated @ p["wh_h"] + p["bh"])
        msg = (1.0 - z) * mns + z * msg_h[None, :, :]
        msg = msg * conn
    return msg


def init_params(key, vocab, hidden):
    ks = jax.random.split(key, 9)
    s = 0.1
    return {
        # W_z : Linear(vocab+hidden -> hidden), split into vocab / hidden parts
        "wz_v": s * jax.random.normal(ks[0], (vocab, hidden), jnp.float32),
        "wz_h": s * jax.random.normal(ks[1], (hidden, hidden), jnp.float32),
        "bz":   s * jax.random.normal(ks[2], (1, hidden), jnp.float32),
        # W_r : Linear(vocab -> hidden, bias=False)
        "wr":   s * jax.random.normal(ks[3], (vocab, hidden), jnp.float32),
        # U_r : Linear(hidden -> hidden)
        "ur":   s * jax.random.normal(ks[4], (hidden, hidden), jnp.float32),
        "bu":   s * jax.random.normal(ks[5], (1, hidden), jnp.float32),
        # W_h : Linear(vocab+hidden -> hidden), split
        "wh_v": s * jax.random.normal(ks[6], (vocab, hidden), jnp.float32),
        "wh_h": s * jax.random.normal(ks[7], (hidden, hidden), jnp.float32),
        "bh":   s * jax.random.normal(ks[8], (1, hidden), jnp.float32),
    }


if __name__ == "__main__":
    B, n, vocab, hidden, depth = 2, 8, 16, 32, 3

    key = jax.random.PRNGKey(0)
    k_msg, k_nf, k_mask, k_par = jax.random.split(key, 4)

    message = jax.random.normal(k_msg, (B, n, n, hidden), jnp.float32)
    node_feature = jax.random.normal(k_nf, (B, n, vocab), jnp.float32)
    mask = (jax.random.uniform(k_mask, (B, n, n)) > 0.4).astype(jnp.float32)
    params = init_params(k_par, vocab, hidden)

    out = graph_gru_forward(message, node_feature, mask, params, depth)
    out = jax.block_until_ready(out)

    ref = jax.vmap(
        lambda m, f, mk: graph_gru_reference(m, f, mk, params, depth)
    )(message, node_feature, mask)

    assert out.shape == (B, n, n, hidden)
    assert jnp.allclose(out, ref, rtol=1e-4, atol=1e-5), "mismatch vs reference"

    print("KERNEL_OK")
</pallas_src>

<mosaic_0001>
module attributes {stable_mosaic.version = 11 : i64} {
  func.func @graph_gru_kernel(%arg0: i32, %arg1: memref<2x8x256xf32, #tpu.memory_space<vmem>>, %arg2: memref<2x8x128xf32, #tpu.memory_space<vmem>>, %arg3: memref<2x8x256xf32, #tpu.memory_space<vmem>>, %arg4: memref<256x1024xf32, #tpu.memory_space<vmem>>, %arg5: memref<128x768xf32, #tpu.memory_space<vmem>>, %arg6: memref<1x768xf32, #tpu.memory_space<vmem>>, %arg7: memref<16x256xf32, #tpu.memory_space<vmem>>, %arg8: memref<16x16xf32, #tpu.memory_space<vmem>>, %arg9: memref<2x8x256xf32, #tpu.memory_space<vmem>>) attributes {dimension_semantics = [#tpu.dimension_semantics<parallel>], iteration_bounds = array<i64: 1>, scalar_prefetch = 0 : i64, scratch_operands = 0 : i64, tpu.core_type = #tpu.core_type<tc>, window_params = [{transform_indices = @transform_0, window_bounds = array<i64: 2, 8, 256>}, {transform_indices = @transform_1, window_bounds = array<i64: 2, 8, 128>}, {transform_indices = @transform_2, window_bounds = array<i64: 2, 8, 256>}, {pipeline_mode = #tpu.pipeline_mode<synchronous>, transform_indices = @transform_3, window_bounds = array<i64: 256, 1024>}, {pipeline_mode = #tpu.pipeline_mode<synchronous>, transform_indices = @transform_4, window_bounds = array<i64: 128, 768>}, {pipeline_mode = #tpu.pipeline_mode<synchronous>, transform_indices = @transform_5, window_bounds = array<i64: 1, 768>}, {pipeline_mode = #tpu.pipeline_mode<synchronous>, transform_indices = @transform_6, window_bounds = array<i64: 16, 256>}, {pipeline_mode = #tpu.pipeline_mode<synchronous>, transform_indices = @transform_7, window_bounds = array<i64: 16, 16>}, {transform_indices = @transform_8, window_bounds = array<i64: 2, 8, 256>}]} {
    %c0 = arith.constant 0 : index
    %c0_0 = arith.constant 0 : index
    %c0_1 = arith.constant 0 : index
    %0 = vector.load %arg1[%c0, %c0_0, %c0_1] : memref<2x8x256xf32, #tpu.memory_space<vmem>>, vector<2x8x256xf32>
    %1 = vector.shape_cast %0 : vector<2x8x256xf32> to vector<16x256xf32>
    %c0_2 = arith.constant 0 : index
    %c0_3 = arith.constant 0 : index
    %c0_4 = arith.constant 0 : index
    %2 = vector.load %arg2[%c0_2, %c0_3, %c0_4] : memref<2x8x128xf32, #tpu.memory_space<vmem>>, vector<2x8x128xf32>
    %3 = vector.shape_cast %2 : vector<2x8x128xf32> to vector<16x128xf32>
    %c0_5 = arith.constant 0 : index
    %c0_6 = arith.constant 0 : index
    %4 = vector.load %arg5[%c0_5, %c0_6] : memref<128x768xf32, #tpu.memory_space<vmem>>, vector<128x768xf32>
    %cst = arith.constant dense<0.000000e+00> : vector<16x768xf32>
    %5 = tpu.matmul %3, %4, %cst {dimension_numbers = #tpu.dot_dimension_numbers<[1], [0], [0], [1], [0, 0, 1, 1], [], []>} : vector<16x128xf32>, vector<128x768xf32>, vector<16x768xf32> -> vector<16x768xf32>
    %c0_7 = arith.constant 0 : index
    %c0_8 = arith.constant 0 : index
    %6 = vector.load %arg6[%c0_7, %c0_8] : memref<1x768xf32, #tpu.memory_space<vmem>>, vector<1x768xf32>
    %7 = vector.broadcast %6 : vector<1x768xf32> to vector<16x768xf32>
    %8 = arith.addf %5, %7 : vector<16x768xf32>
    %9 = vector.extract_strided_slice %8 {offsets = [0, 0], sizes = [16, 256], strides = [1, 1]} : vector<16x768xf32> to vector<16x256xf32>
    %10 = vector.extract_strided_slice %8 {offsets = [0, 256], sizes = [16, 256], strides = [1, 1]} : vector<16x768xf32> to vector<16x256xf32>
    %11 = vector.extract_strided_slice %8 {offsets = [0, 512], sizes = [16, 256], strides = [1, 1]} : vector<16x768xf32> to vector<16x256xf32>
    %c0_9 = arith.constant 0 : index
    %c0_10 = arith.constant 0 : index
    %c0_11 = arith.constant 0 : index
    %12 = vector.load %arg3[%c0_9, %c0_10, %c0_11] : memref<2x8x256xf32, #tpu.memory_space<vmem>>, vector<2x8x256xf32>
    %13 = vector.shape_cast %12 : vector<2x8x256xf32> to vector<16x256xf32>
    %c0_12 = arith.constant 0 : index
    %c0_13 = arith.constant 0 : index
    %14 = vector.load %arg4[%c0_12, %c0_13] : memref<256x1024xf32, #tpu.memory_space<vmem>>, vector<256x256xf32>
    %c0_14 = arith.constant 0 : index
    %c256 = arith.constant 256 : index
    %15 = vector.load %arg4[%c0_14, %c256] : memref<256x1024xf32, #tpu.memory_space<vmem>>, vector<256x256xf32>
    %c0_15 = arith.constant 0 : index
    %c512 = arith.constant 512 : index
    %16 = vector.load %arg4[%c0_15, %c512] : memref<256x1024xf32, #tpu.memory_space<vmem>>, vector<256x256xf32>
    %c0_16 = arith.constant 0 : index
    %c768 = arith.constant 768 : index
    %17 = vector.load %arg4[%c0_16, %c768] : memref<256x1024xf32, #tpu.memory_space<vmem>>, vector<256x256xf32>
    %c0_17 = arith.constant 0 : index
    %c0_18 = arith.constant 0 : index
    %18 = vector.load %arg7[%c0_17, %c0_18] : memref<16x256xf32, #tpu.memory_space<vmem>>, vector<16x256xf32>
    %c0_19 = arith.constant 0 : index
    %c0_20 = arith.constant 0 : index
    %19 = vector.load %arg8[%c0_19, %c0_20] : memref<16x16xf32, #tpu.memory_space<vmem>>, vector<16x16xf32>
    %cst_21 = arith.constant dense<0.000000e+00> : vector<16x256xf32>
    %20 = tpu.matmul %1, %17, %cst_21 {dimension_numbers = #tpu.dot_dimension_numbers<[1], [0], [0], [1], [0, 0, 1, 1], [], []>} : vector<16x256xf32>, vector<256x256xf32>, vector<16x256xf32> -> vector<16x256xf32>
    %21 = arith.mulf %20, %18 : vector<16x256xf32>
    %cst_22 = arith.constant dense<0.000000e+00> : vector<16x256xf32>
    %22 = tpu.matmul %19, %21, %cst_22 {dimension_numbers = #tpu.dot_dimension_numbers<[1], [0], [0], [1], [0, 0, 1, 1], [], []>} : vector<16x16xf32>, vector<16x256xf32>, vector<16x256xf32> -> vector<16x256xf32>
    %23 = arith.subf %22, %1 : vector<16x256xf32>
    %cst_23 = arith.constant dense<0.000000e+00> : vector<16x256xf32>
    %24 = tpu.matmul %23, %14, %cst_23 {dimension_numbers = #tpu.dot_dimension_numbers<[1], [0], [0], [1], [0, 0, 1, 1], [], []>} : vector<16x256xf32>, vector<256x256xf32>, vector<16x256xf32> -> vector<16x256xf32>
    %25 = arith.addf %9, %24 : vector<16x256xf32>
    %26 = arith.negf %25 : vector<16x256xf32>
    %27 = math.exp %26 : vector<16x256xf32>
    %cst_24 = arith.constant 1.000000e+00 : f32
    %28 = vector.broadcast %cst_24 : f32 to vector<16x256xf32>
    %29 = arith.addf %28, %27 : vector<16x256xf32>
    %30 = arith.divf %28, %29 : vector<16x256xf32>
    %cst_25 = arith.constant dense<0.000000e+00> : vector<16x256xf32>
    %31 = tpu.matmul %1, %15, %cst_25 {dimension_numbers = #tpu.dot_dimension_numbers<[1], [0], [0], [1], [0, 0, 1, 1], [], []>} : vector<16x256xf32>, vector<256x256xf32>, vector<16x256xf32> -> vector<16x256xf32>
    %32 = arith.addf %10, %31 : vector<16x256xf32>
    %33 = arith.negf %32 : vector<16x256xf32>
    %34 = math.exp %33 : vector<16x256xf32>
    %cst_26 = arith.constant 1.000000e+00 : f32
    %35 = vector.broadcast %cst_26 : f32 to vector<16x256xf32>
    %36 = arith.addf %35, %34 : vector<16x256xf32>
    %37 = arith.divf %35, %36 : vector<16x256xf32>
    %38 = arith.mulf %37, %1 : vector<16x256xf32>
    %cst_27 = arith.constant dense<0.000000e+00> : vector<16x256xf32>
    %39 = tpu.matmul %19, %38, %cst_27 {dimension_numbers = #tpu.dot_dimension_numbers<[1], [0], [0], [1], [0, 0, 1, 1], [], []>} : vector<16x16xf32>, vector<16x256xf32>, vector<16x256xf32> -> vector<16x256xf32>
    %cst_28 = arith.constant dense<0.000000e+00> : vector<16x256xf32>
    %40 = tpu.matmul %39, %16, %cst_28 {dimension_numbers = #tpu.dot_dimension_numbers<[1], [0], [0], [1], [0, 0, 1, 1], [], []>} : vector<16x256xf32>, vector<256x256xf32>, vector<16x256xf32> -> vector<16x256xf32>
    %41 = arith.addf %11, %40 : vector<16x256xf32>
    %42 = math.tanh %41 : vector<16x256xf32>
    %cst_29 = arith.constant 1.000000e+00 : f32
    %43 = vector.broadcast %cst_29 : f32 to vector<16x256xf32>
    %44 = arith.subf %43, %30 : vector<16x256xf32>
    %45 = arith.mulf %44, %23 : vector<16x256xf32>
    %46 = arith.mulf %30, %42 : vector<16x256xf32>
    %47 = arith.addf %45, %46 : vector<16x256xf32>
    %48 = arith.mulf %47, %13 : vector<16x256xf32>
    %cst_30 = arith.constant dense<0.000000e+00> : vector<16x256xf32>
    %49 = tpu.matmul %48, %17, %cst_30 {dimension_numbers = #tpu.dot_dimension_numbers<[1], [0], [0], [1], [0, 0, 1, 1], [], []>} : vector<16x256xf32>, vector<256x256xf32>, vector<16x256xf32> -> vector<16x256xf32>
    %50 = arith.mulf %49, %18 : vector<16x256xf32>
    %cst_31 = arith.constant dense<0.000000e+00> : vector<16x256xf32>
    %51 = tpu.matmul %19, %50, %cst_31 {dimension_numbers = #tpu.dot_dimension_numbers<[1], [0], [0], [1], [0, 0, 1, 1], [], []>} : vector<16x16xf32>, vector<16x256xf32>, vector<16x256xf32> -> vector<16x256xf32>
    %52 = arith.subf %51, %48 : vector<16x256xf32>
    %cst_32 = arith.constant dense<0.000000e+00> : vector<16x256xf32>
    %53 = tpu.matmul %52, %14, %cst_32 {dimension_numbers = #tpu.dot_dimension_numbers<[1], [0], [0], [1], [0, 0, 1, 1], [], []>} : vector<16x256xf32>, vector<256x256xf32>, vector<16x256xf32> -> vector<16x256xf32>
    %54 = arith.addf %9, %53 : vector<16x256xf32>
    %55 = arith.negf %54 : vector<16x256xf32>
    %56 = math.exp %55 : vector<16x256xf32>
    %cst_33 = arith.constant 1.000000e+00 : f32
    %57 = vector.broadcast %cst_33 : f32 to vector<16x256xf32>
    %58 = arith.addf %57, %56 : vector<16x256xf32>
    %59 = arith.divf %57, %58 : vector<16x256xf32>
    %cst_34 = arith.constant dense<0.000000e+00> : vector<16x256xf32>
    %60 = tpu.matmul %48, %15, %cst_34 {dimension_numbers = #tpu.dot_dimension_numbers<[1], [0], [0], [1], [0, 0, 1, 1], [], []>} : vector<16x256xf32>, vector<256x256xf32>, vector<16x256xf32> -> vector<16x256xf32>
    %61 = arith.addf %10, %60 : vector<16x256xf32>
    %62 = arith.negf %61 : vector<16x256xf32>
    %63 = math.exp %62 : vector<16x256xf32>
    %cst_35 = arith.constant 1.000000e+00 : f32
    %64 = vector.broadcast %cst_35 : f32 to vector<16x256xf32>
    %65 = arith.addf %64, %63 : vector<16x256xf32>
    %66 = arith.divf %64, %65 : vector<16x256xf32>
    %67 = arith.mulf %66, %48 : vector<16x256xf32>
    %cst_36 = arith.constant dense<0.000000e+00> : vector<16x256xf32>
    %68 = tpu.matmul %19, %67, %cst_36 {dimension_numbers = #tpu.dot_dimension_numbers<[1], [0], [0], [1], [0, 0, 1, 1], [], []>} : vector<16x16xf32>, vector<16x256xf32>, vector<16x256xf32> -> vector<16x256xf32>
    %cst_37 = arith.constant dense<0.000000e+00> : vector<16x256xf32>
    %69 = tpu.matmul %68, %16, %cst_37 {dimension_numbers = #tpu.dot_dimension_numbers<[1], [0], [0], [1], [0, 0, 1, 1], [], []>} : vector<16x256xf32>, vector<256x256xf32>, vector<16x256xf32> -> vector<16x256xf32>
    %70 = arith.addf %11, %69 : vector<16x256xf32>
    %71 = math.tanh %70 : vector<16x256xf32>
    %cst_38 = arith.constant 1.000000e+00 : f32
    %72 = vector.broadcast %cst_38 : f32 to vector<16x256xf32>
    %73 = arith.subf %72, %59 : vector<16x256xf32>
    %74 = arith.mulf %73, %52 : vector<16x256xf32>
    %75 = arith.mulf %59, %71 : vector<16x256xf32>
    %76 = arith.addf %74, %75 : vector<16x256xf32>
    %77 = arith.mulf %76, %13 : vector<16x256xf32>
    %cst_39 = arith.constant dense<0.000000e+00> : vector<16x256xf32>
    %78 = tpu.matmul %77, %17, %cst_39 {dimension_numbers = #tpu.dot_dimension_numbers<[1], [0], [0], [1], [0, 0, 1, 1], [], []>} : vector<16x256xf32>, vector<256x256xf32>, vector<16x256xf32> -> vector<16x256xf32>
    %79 = arith.mulf %78, %18 : vector<16x256xf32>
    %cst_40 = arith.constant dense<0.000000e+00> : vector<16x256xf32>
    %80 = tpu.matmul %19, %79, %cst_40 {dimension_numbers = #tpu.dot_dimension_numbers<[1], [0], [0], [1], [0, 0, 1, 1], [], []>} : vector<16x16xf32>, vector<16x256xf32>, vector<16x256xf32> -> vector<16x256xf32>
    %81 = arith.subf %80, %77 : vector<16x256xf32>
    %cst_41 = arith.constant dense<0.000000e+00> : vector<16x256xf32>
    %82 = tpu.matmul %81, %14, %cst_41 {dimension_numbers = #tpu.dot_dimension_numbers<[1], [0], [0], [1], [0, 0, 1, 1], [], []>} : vector<16x256xf32>, vector<256x256xf32>, vector<16x256xf32> -> vector<16x256xf32>
    %83 = arith.addf %9, %82 : vector<16x256xf32>
    %84 = arith.negf %83 : vector<16x256xf32>
    %85 = math.exp %84 : vector<16x256xf32>
    %cst_42 = arith.constant 1.000000e+00 : f32
    %86 = vector.broadcast %cst_42 : f32 to vector<16x256xf32>
    %87 = arith.addf %86, %85 : vector<16x256xf32>
    %88 = arith.divf %86, %87 : vector<16x256xf32>
    %cst_43 = arith.constant dense<0.000000e+00> : vector<16x256xf32>
    %89 = tpu.matmul %77, %15, %cst_43 {dimension_numbers = #tpu.dot_dimension_numbers<[1], [0], [0], [1], [0, 0, 1, 1], [], []>} : vector<16x256xf32>, vector<256x256xf32>, vector<16x256xf32> -> vector<16x256xf32>
    %90 = arith.addf %10, %89 : vector<16x256xf32>
    %91 = arith.negf %90 : vector<16x256xf32>
    %92 = math.exp %91 : vector<16x256xf32>
    %cst_44 = arith.constant 1.000000e+00 : f32
    %93 = vector.broadcast %cst_44 : f32 to vector<16x256xf32>
    %94 = arith.addf %93, %92 : vector<16x256xf32>
    %95 = arith.divf %93, %94 : vector<16x256xf32>
    %96 = arith.mulf %95, %77 : vector<16x256xf32>
    %cst_45 = arith.constant dense<0.000000e+00> : vector<16x256xf32>
    %97 = tpu.matmul %19, %96, %cst_45 {dimension_numbers = #tpu.dot_dimension_numbers<[1], [0], [0], [1], [0, 0, 1, 1], [], []>} : vector<16x16xf32>, vector<16x256xf32>, vector<16x256xf32> -> vector<16x256xf32>
    %cst_46 = arith.constant dense<0.000000e+00> : vector<16x256xf32>
    %98 = tpu.matmul %97, %16, %cst_46 {dimension_numbers = #tpu.dot_dimension_numbers<[1], [0], [0], [1], [0, 0, 1, 1], [], []>} : vector<16x256xf32>, vector<256x256xf32>, vector<16x256xf32> -> vector<16x256xf32>
    %99 = arith.addf %11, %98 : vector<16x256xf32>
    %100 = math.tanh %99 : vector<16x256xf32>
    %cst_47 = arith.constant 1.000000e+00 : f32
    %101 = vector.broadcast %cst_47 : f32 to vector<16x256xf32>
    %102 = arith.subf %101, %88 : vector<16x256xf32>
    %103 = arith.mulf %102, %81 : vector<16x256xf32>
    %104 = arith.mulf %88, %100 : vector<16x256xf32>
    %105 = arith.addf %103, %104 : vector<16x256xf32>
    %106 = arith.mulf %105, %13 : vector<16x256xf32>
    %107 = vector.shape_cast %106 : vector<16x256xf32> to vector<2x8x256xf32>
    %c0_48 = arith.constant 0 : index
    %c0_49 = arith.constant 0 : index
    %c0_50 = arith.constant 0 : index
    %108 = vector.load %arg9[%c0_48, %c0_49, %c0_50] : memref<2x8x256xf32, #tpu.memory_space<vmem>>, vector<2x8x256xf32>
    tpu.vector_store %arg9[%c0_48, %c0_49, %c0_50], %107 {strides = array<i32>} : memref<2x8x256xf32, #tpu.memory_space<vmem>>, vector<2x8x256xf32>,
    return
  }
  func.func @transform_0(%arg0: i32) -> (i32, i32, i32) {
    %c0_i32 = arith.constant 0 : i32
    %c0_i32_0 = arith.constant 0 : i32
    %c0_i32_1 = arith.constant 0 : i32
    return %arg0, %c0_i32, %c0_i32_0 : i32, i32, i32
  }
  func.func @transform_1(%arg0: i32) -> (i32, i32, i32) {
    %c0_i32 = arith.constant 0 : i32
    %c0_i32_0 = arith.constant 0 : i32
    %c0_i32_1 = arith.constant 0 : i32
    return %arg0, %c0_i32, %c0_i32_0 : i32, i32, i32
  }
  func.func @transform_2(%arg0: i32) -> (i32, i32, i32) {
    %c0_i32 = arith.constant 0 : i32
    %c0_i32_0 = arith.constant 0 : i32
    %c0_i32_1 = arith.constant 0 : i32
    return %arg0, %c0_i32, %c0_i32_0 : i32, i32, i32
  }
  func.func @transform_3(%arg0: i32) -> (i32, i32) {
    %c0_i32 = arith.constant 0 : i32
    %c0_i32_0 = arith.constant 0 : i32
    %c0_i32_1 = arith.constant 0 : i32
    return %c0_i32, %c0_i32_0 : i32, i32
  }
  func.func @transform_4(%arg0: i32) -> (i32, i32) {
    %c0_i32 = arith.constant 0 : i32
    %c0_i32_0 = arith.constant 0 : i32
    %c0_i32_1 = arith.constant 0 : i32
    return %c0_i32, %c0_i32_0 : i32, i32
  }
  func.func @transform_5(%arg0: i32) -> (i32, i32) {
    %c0_i32 = arith.constant 0 : i32
    %c0_i32_0 = arith.constant 0 : i32
    %c0_i32_1 = arith.constant 0 : i32
    return %c0_i32, %c0_i32_0 : i32, i32
  }
  func.func @transform_6(%arg0: i32) -> (i32, i32) {
    %c0_i32 = arith.constant 0 : i32
    %c0_i32_0 = arith.constant 0 : i32
    %c0_i32_1 = arith.constant 0 : i32
    return %c0_i32, %c0_i32_0 : i32, i32
  }
  func.func @transform_7(%arg0: i32) -> (i32, i32) {
    %c0_i32 = arith.constant 0 : i32
    %c0_i32_0 = arith.constant 0 : i32
    %c0_i32_1 = arith.constant 0 : i32
    return %c0_i32, %c0_i32_0 : i32, i32
  }
  func.func @transform_8(%arg0: i32) -> (i32, i32, i32) {
    %c0_i32 = arith.constant 0 : i32
    %c0_i32_0 = arith.constant 0 : i32
    %c0_i32_1 = arith.constant 0 : i32
    return %arg0, %c0_i32, %c0_i32_0 : i32, i32, i32
  }
}

</mosaic_0001>

<bundles_post_ra>
// kernel: tpu_custom_call.1
= control target key start
LH: loop header
LB: loop body
LE: loop exit
PB: predicated region body
PF: predicated region fallthrough
CT: control target
= control target key end

     0   :  { %13 = vsyncpa [#allocation3], 0  ;;  %s4817_s0 = inlined_call_operand.hbm [shape: f32[2,8,256], index: 0, kind: input, shape index: {}]   ;;  %s4818_s1 = inlined_call_operand.hbm [shape: f32[2,8,128], index: 1, kind: input, shape index: {}]   ;;  %s4819_s2 = inlined_call_operand.hbm [shape: f32[2,8,256], index: 2, kind: input, shape index: {}]   ;;  %s4820_s3 = inlined_call_operand.hbm [shape: f32[256,1024], index: 3, kind: input, shape index: {}]   ;;  %s4821_s4 = inlined_call_operand.hbm [shape: f32[128,768], index: 4, kind: input, shape index: {}]   ;;  %s4822_s5 = inlined_call_operand.vmem [shape: f32[1,768], index: 5, kind: input, shape index: {}]   ;;  %s4823_s6 = inlined_call_operand.hbm [shape: f32[16,256], index: 6, kind: input, shape index: {}]   ;;  %s4824_s7 = inlined_call_operand.vmem [shape: f32[16,16], index: 7, kind: input, shape index: {}]   ;;  %s4825_s8 = inlined_call_operand.hbm [shape: f32[2,8,256], index: 8, kind: output, shape index: {}]  }
   0x1   :  { %14 = vsyncpa [#allocation6], 0 }
   0x2   :  { %15 = vsyncpa [#allocation9], 0 }
   0x3   :  { %16 = vsyncpa [#allocation12], 0 }
   0x4   :  { %17 = vsyncpa [#allocation4], 0  ;;  %s3683_s27 = smov [#allocation5]   ;;  %s3519_s9 = scalar_lea.hbm %s4818_s1, 256 }
   0x5   :  { %s35_s28 = sshll.u32 %s3683_s27, 4  ;;  %p3520_p0 = scmp.ne.s32.totalorder %s4818_s1, %s3519_s9  ;;  %s36_s28 = int_to_ptr.vmem [resolvable:$true] %s35_s28 }
   0x6   :  { %p3523_p1 = scmp.lt.u32.totalorder %s3519_s9, %s4818_s1 }
   0x8   :  { %p3525_p2 = pnand %p3523_p1, %p3520_p0 }
   0xa   :  { %3528 = shalt.err (!%p3525_p2)
}
   0xb   :  { %s3529_s14 = scalar_lea.vmem %s36_s28, 256  ;;  %p3534_p4 = scmp.lt.s32.totalorder %s36_s28, %s36_s28 }
   0xc   :  { %p3530_p3 = scmp.ne.s32.totalorder %s36_s28, %s3529_s14  ;;  %p3535_p5 = scmp.lt.s32.totalorder %s3529_s14, %s3529_s14 }
   0xe   :  { %p3536_p6 = por %p3535_p5, %p3534_p4 }
  0x10   :  { %p3537_p7 = pnand %p3536_p6, %p3530_p3 }
  0x12   :  { %3540 = shalt.err (!%p3537_p7)
}
  0x13   :  { %s3684_s15 = smov 128   ;;  %s3685_s16 = smov 8  }
  0x14   :  { %41 = dma.hbm_to_vmem [thread:$0]  %s4818_s1, 256, %s36_s28, [#allocation6], %s3684_s15, %s3684_s15, %s3685_s16  }
  0x15   :  { %s3686_s19 = smov [#allocation8]   ;;  %s3541_s23 = scalar_lea.hbm %s4820_s3, 32768 }
  0x16   :  { %s59_s20 = sshll.u32 %s3686_s19, 4  ;;  %p3542_p8 = scmp.ne.s32.totalorder %s4820_s3, %s3541_s23  ;;  %s60_s20 = int_to_ptr.vmem [resolvable:$true] %s59_s20 }
  0x17   :  { %p3545_p9 = scmp.lt.u32.totalorder %s3541_s23, %s4820_s3 }
  0x19   :  { %p3547_p10 = pnand %p3545_p9, %p3542_p8 }
  0x1b   :  { %3550 = shalt.err (!%p3547_p10)
}
  0x1c   :  { %s3551_s29 = scalar_lea.vmem %s60_s20, 32768  ;;  %p3556_p12 = scmp.lt.s32.totalorder %s60_s20, %s60_s20 }
  0x1d   :  { %p3552_p11 = scmp.ne.s32.totalorder %s60_s20, %s3551_s29  ;;  %p3557_p13 = scmp.lt.s32.totalorder %s3551_s29, %s3551_s29 }
  0x1f   :  { %p3558_p0 = por %p3557_p13, %p3556_p12 }
  0x21   :  { %p3559_p1 = pnand %p3558_p0, %p3552_p11 }
  0x23   :  { %3562 = shalt.err (!%p3559_p1)
}
  0x24   :  { %s3687_s1 = smov 1024   ;;  %s3688_s28 = smov 64  }
  0x25   :  { %65 = dma.hbm_to_vmem [thread:$0]  %s4820_s3, 32768, %s60_s20, [#allocation9], %s3687_s1, %s3687_s1, %s3688_s28  }
  0x26   :  { %s3689_s10 = smov [#allocation2]   ;;  %s3563_s14 = scalar_lea.hbm %s4817_s0, 512 }
  0x27   :  { %s23_s11 = sshll.u32 %s3689_s10, 4  ;;  %p3564_p2 = scmp.ne.s32.totalorder %s4817_s0, %s3563_s14  ;;  %s24_s11 = int_to_ptr.vmem [resolvable:$true] %s23_s11 }
  0x28   :  { %p3567_p3 = scmp.lt.u32.totalorder %s3563_s14, %s4817_s0 }
  0x2a   :  { %p3569_p4 = pnand %p3567_p3, %p3564_p2 }
  0x2c   :  { %3572 = shalt.err (!%p3569_p4)
}
  0x2d   :  { %s3573_s19 = scalar_lea.vmem %s24_s11, 512  ;;  %p3578_p6 = scmp.lt.s32.totalorder %s24_s11, %s24_s11 }
  0x2e   :  { %p3574_p5 = scmp.ne.s32.totalorder %s24_s11, %s3573_s19  ;;  %p3579_p7 = scmp.lt.s32.totalorder %s3573_s19, %s3573_s19 }
  0x30   :  { %p3580_p8 = por %p3579_p7, %p3578_p6 }
  0x32   :  { %p3581_p9 = pnand %p3580_p8, %p3574_p5 }
  0x34   :  { %3584 = shalt.err (!%p3581_p9)
}
  0x35   :  { %s3690_s3 = smov 256   ;;  %s3691_s20 = smov 16  }
  0x36   :  { %29 = dma.hbm_to_vmem [thread:$0]  %s4817_s0, 512, %s24_s11, [#allocation3], %s3690_s3, %s3690_s3, %s3691_s20  }
  0x37   :  { %s3692_s23 = smov [#allocation7]   ;;  %s3693_s25 = smov [#allocation10]  }
  0x38   :  { %s47_s24 = sshll.u32 %s3692_s23, 4  ;;  %s71_s26 = sshll.u32 %s3693_s25, 4  ;;  %s48_s24 = int_to_ptr.vmem [resolvable:$true] %s47_s24  ;;  %s72_s26 = int_to_ptr.vmem [resolvable:$true] %s71_s26 }
  0x39   :  { %s3585_s1 = scalar_lea.hbm %s4819_s2, 512 }
  0x3a   :  { %p3586_p10 = scmp.ne.s32.totalorder %s4819_s2, %s3585_s1  ;;  %p3589_p11 = scmp.lt.u32.totalorder %s3585_s1, %s4819_s2 }
  0x3c   :  { %p3591_p12 = pnand %p3589_p11, %p3586_p10 }
  0x3e   :  { %3594 = shalt.err (!%p3591_p12)
}
  0x3f   :  { %s3595_s0 = scalar_lea.vmem %s48_s24, 512  ;;  %p3600_p0 = scmp.lt.s32.totalorder %s48_s24, %s48_s24 }
  0x40   :  { %p3596_p13 = scmp.ne.s32.totalorder %s48_s24, %s3595_s0  ;;  %p3601_p1 = scmp.lt.s32.totalorder %s3595_s0, %s3595_s0 }
  0x42   :  { %p3602_p2 = por %p3601_p1, %p3600_p0 }
  0x44   :  { %p3603_p3 = pnand %p3602_p2, %p3596_p13 }
  0x46   :  { %3606 = shalt.err (!%p3603_p3)
}
  0x47   :  { %53 = dma.hbm_to_vmem [thread:$0]  %s4819_s2, 512, %s48_s24, [#allocation6], %s3690_s3, %s3690_s3, %s3691_s20  }
  0x48   :  { %s3607_s15 = scalar_lea.hbm %s4821_s4, 12288 }
  0x49   :  { %p3608_p4 = scmp.ne.s32.totalorder %s4821_s4, %s3607_s15  ;;  %p3611_p5 = scmp.lt.u32.totalorder %s3607_s15, %s4821_s4 }
  0x4b   :  { %p3613_p6 = pnand %p3611_p5, %p3608_p4 }
  0x4d   :  { %3616 = shalt.err (!%p3613_p6)
}
  0x4e   :  { %s3617_s21 = scalar_lea.vmem %s72_s26, 12288  ;;  %p3622_p8 = scmp.lt.s32.totalorder %s72_s26, %s72_s26 }
  0x4f   :  { %p3618_p7 = scmp.ne.s32.totalorder %s72_s26, %s3617_s21  ;;  %p3623_p9 = scmp.lt.s32.totalorder %s3617_s21, %s3617_s21 }
  0x51   :  { %p3624_p10 = por %p3623_p9, %p3622_p8 }
  0x53   :  { %p3625_p11 = pnand %p3624_p10, %p3618_p7 }
  0x55   :  { %3628 = shalt.err (!%p3625_p11)
}
  0x56   :  { %s3694_s2 = smov 768   ;;  %s3695_s22 = smov 48  }
  0x57   :  { %77 = dma.hbm_to_vmem [thread:$0]  %s4821_s4, 12288, %s72_s26, [#allocation9], %s3694_s2, %s3694_s2, %s3695_s22  }
  0x58   :  { %s3696_s25 = smov [#allocation11]   ;;  %s3629_s28 = scalar_lea.hbm %s4823_s6, 512 }
  0x59   :  { %s85_s27 = sshll.u32 %s3696_s25, 4  ;;  %p3630_p12 = scmp.ne.s32.totalorder %s4823_s6, %s3629_s28  ;;  %s86_s27 = int_to_ptr.vmem [resolvable:$true] %s85_s27 }
  0x5a   :  { %p3633_p13 = scmp.lt.u32.totalorder %s3629_s28, %s4823_s6 }
  0x5c   :  { %p3635_p0 = pnand %p3633_p13, %p3630_p12 }
  0x5e   :  { %3638 = shalt.err (!%p3635_p0)
}
  0x5f   :  { %s3639_s11 = scalar_lea.vmem %s86_s27, 512  ;;  %p3644_p2 = scmp.lt.s32.totalorder %s86_s27, %s86_s27 }
  0x60   :  { %p3640_p1 = scmp.ne.s32.totalorder %s86_s27, %s3639_s11  ;;  %p3645_p3 = scmp.lt.s32.totalorder %s3639_s11, %s3639_s11 }
  0x62   :  { %p3646_p4 = por %p3645_p3, %p3644_p2 }
  0x64   :  { %p3647_p5 = pnand %p3646_p4, %p3640_p1 }
  0x66   :  { %3650 = shalt.err (!%p3647_p5)
}
  0x67   :  { %91 = dma.hbm_to_vmem [thread:$0]  %s4823_s6, 512, %s86_s27, [#allocation12], %s3690_s3, %s3690_s3, %s3691_s20  }
  0x68   :  { %3673 = dma.done.wait [#allocation3], 512  }
  0x69   :  { %3674 = vsyncadd [#allocation3], 4294966784 }
  0x6a   :  { %3675 = dma.done.wait [#allocation6], 768  }
  0x6b   :  { %3676 = vsyncadd [#allocation6], 4294966528 }
  0x6c   :  { %3677 = dma.done.wait [#allocation9], 45056  }
  0x6d   :  { %3678 = vsyncadd [#allocation9], 4294922240 }
  0x6e   :  { %3679 = dma.done.wait [#allocation12], 512  }
  0x6f   :  { %3680 = vsyncadd [#allocation12], 4294966784  ;;  %v4826_v0 = vmov 0.0   ;;  %v119_v1 = vld [vmem:[#allocation10 + $0x8] sm:$0xff]  ;;  %v125_v2 = vld [vmem:[#allocation10 + $0x38] sm:$0xff]  ;;  %vm824_vm0 = vcmask 130048  }
  0x70   :  { %310 = vmatprep.mubr.f32.mxu1 %v4826_v0  ;;  %464 = vmatprep.mubr.f32.mxu0 %v4826_v0  ;;  %v118_v3 = vld [vmem:[#allocation10] sm:$0xff]  ;;  %v2484_v4 = vpack.c.bf16 %v125_v2, %v119_v1  ;;  %v124_v5 = vld [vmem:[#allocation10 + $0x30] sm:$0xff]  ;;  %v131_v6 = vld [vmem:[#allocation10 + $0x68] sm:$0xff] }
  0x71   :  { %v137_v7 = vld [vmem:[#allocation10 + $0x98] sm:$0xff]  ;;  %v2486_v8 = vpack.c.bf16 %v124_v5, %v118_v3  ;;  %v130_v10 = vld [vmem:[#allocation10 + $0x60] sm:$0xff]  ;;  %v136_v11 = vld [vmem:[#allocation10 + $0x90] sm:$0xff] }
  0x72   :  { %v2488_v9 = vpack.c.bf16 %v137_v7, %v131_v6  ;;  %v143_v12 = vld [vmem:[#allocation10 + $0xc8] sm:$0xff]  ;;  %2485 = vmatprep.subr.bf16.mxu1 %v2484_v4  ;;  %v149_v13 = vld [vmem:[#allocation10 + $0xf8] sm:$0xff]  ;;  %v2490_v14 = vpack.c.bf16 %v136_v11, %v130_v10  ;;  %v142_v16 = vld [vmem:[#allocation10 + $0xc0] sm:$0xff] }
  0x73   :  { %2487 = vmatpush1.bf16.msra.mxu1 %v2486_v8  ;;  %v2492_v15 = vpack.c.bf16 %v149_v13, %v143_v12  ;;  %v148_v17 = vld [vmem:[#allocation10 + $0xf0] sm:$0xff]  ;;  %v155_v18 = vld [vmem:[#allocation10 + $0x128] sm:$0xff]  ;;  %v161_v19 = vld [vmem:[#allocation10 + $0x158] sm:$0xff] }
  0x74   :  { %2489 = vmatprep.subr.bf16.mxu1 %v2488_v9  ;;  %v2494_v20 = vpack.c.bf16 %v148_v17, %v142_v16  ;;  %v2496_v21 = vpack.c.bf16 %v161_v19, %v155_v18  ;;  %v154_v22 = vld [vmem:[#allocation10 + $0x120] sm:$0xff]  ;;  %v160_v23 = vld [vmem:[#allocation10 + $0x150] sm:$0xff]  ;;  %v167_v24 = vld [vmem:[#allocation10 + $0x188] sm:$0xff] }
  0x75   :  { %v173_v25 = vld [vmem:[#allocation10 + $0x1b8] sm:$0xff]  ;;  %v2498_v26 = vpack.c.bf16 %v160_v23, %v154_v22  ;;  %v166_v28 = vld [vmem:[#allocation10 + $0x180] sm:$0xff]  ;;  %v172_v29 = vld [vmem:[#allocation10 + $0x1b0] sm:$0xff] }
  0x76   :  { %v2500_v27 = vpack.c.bf16 %v173_v25, %v167_v24  ;;  %v179_v30 = vld [vmem:[#allocation10 + $0x1e8] sm:$0xff]  ;;  %v185_v31 = vld [vmem:[#allocation10 + $0x218] sm:$0xff]  ;;  %v2502_v32 = vpack.c.bf16 %v172_v29, %v166_v28  ;;  %v178_v34 = vld [vmem:[#allocation10 + $0x1e0] sm:$0xff] }
  0x77   :  { %2491 = vmatpush1.bf16.msra.mxu1 %v2490_v14  ;;  %v2504_v33 = vpack.c.bf16 %v185_v31, %v179_v30  ;;  %v184_v35 = vld [vmem:[#allocation10 + $0x210] sm:$0xff]  ;;  %v191_v36 = vld [vmem:[#allocation10 + $0x248] sm:$0xff]  ;;  %v197_v37 = vld [vmem:[#allocation10 + $0x278] sm:$0xff] }
  0x78   :  { %2493 = vmatprep.subr.bf16.mxu1 %v2492_v15  ;;  %v2506_v38 = vpack.c.bf16 %v184_v35, %v178_v34  ;;  %v2508_v39 = vpack.c.bf16 %v197_v37, %v191_v36  ;;  %v190_v40 = vld [vmem:[#allocation10 + $0x240] sm:$0xff]  ;;  %v196_v41 = vld [vmem:[#allocation10 + $0x270] sm:$0xff]  ;;  %v203_v42 = vld [vmem:[#allocation10 + $0x2a8] sm:$0xff] }
  0x79   :  { %v209_v43 = vld [vmem:[#allocation10 + $0x2d8] sm:$0xff]  ;;  %v2510_v44 = vpack.c.bf16 %v196_v41, %v190_v40  ;;  %v202_v46 = vld [vmem:[#allocation10 + $0x2a0] sm:$0xff]  ;;  %v208_v47 = vld [vmem:[#allocation10 + $0x2d0] sm:$0xff] }
  0x7a   :  { %v2512_v45 = vpack.c.bf16 %v209_v43, %v203_v42  ;;  %v121_v48 = vld [vmem:[#allocation10 + $0x18] sm:$0xff]  ;;  %v127_v49 = vld [vmem:[#allocation10 + $0x48] sm:$0xff]  ;;  %v2514_v50 = vpack.c.bf16 %v208_v47, %v202_v46  ;;  %v120_v52 = vld [vmem:[#allocation10 + $0x10] sm:$0xff] }
  0x7b   :  { %2495 = vmatpush1.bf16.msra.mxu1 %v2494_v20  ;;  %v2516_v51 = vpack.c.bf16 %v127_v49, %v121_v48  ;;  %v126_v53 = vld [vmem:[#allocation10 + $0x40] sm:$0xff]  ;;  %v133_v54 = vld [vmem:[#allocation10 + $0x78] sm:$0xff]  ;;  %v139_v55 = vld [vmem:[#allocation10 + $0xa8] sm:$0xff] }
  0x7c   :  { %2497 = vmatprep.subr.bf16.mxu1 %v2496_v21  ;;  %v3827_v56 = vld [vmem:[#allocation5] sm:$0xff]  ;;  %v2518_v57 = vpack.c.bf16 %v126_v53, %v120_v52  ;;  %v2520_v58 = vpack.c.bf16 %v139_v55, %v133_v54  ;;  %v138_v60 = vld [vmem:[#allocation10 + $0xa0] sm:$0xff]  ;;  %v145_v61 = vld [vmem:[#allocation10 + $0xd8] sm:$0xff] }
  0x7d   :  { %v132_v59 = vld [vmem:[#allocation10 + $0x70] sm:$0xff]  ;;  %v151_v62 = vld [vmem:[#allocation10 + $0x108] sm:$0xff]  ;;  %v3831_v1 = vld [vmem:[#allocation5 + $0x8] sm:$0xff] }
  0x7e   :  { %v2522_v63 = vpack.c.bf16 %v138_v60, %v132_v59  ;;  %v2524_v2 = vpack.c.bf16 %v151_v62, %v145_v61  ;;  %v144_v3 = vld [vmem:[#allocation10 + $0xd0] sm:$0xff]  ;;  %v150_v4 = vld [vmem:[#allocation10 + $0x100] sm:$0xff]  ;;  %v157_v5 = vld [vmem:[#allocation10 + $0x138] sm:$0xff] }
  0x7f   :  { %2499 = vmatpush1.bf16.msra.mxu1 %v2498_v26  ;;  %v163_v6 = vld [vmem:[#allocation10 + $0x168] sm:$0xff]  ;;  %v2526_v7 = vpack.c.bf16 %v150_v4, %v144_v3  ;;  %v156_v9 = vld [vmem:[#allocation10 + $0x130] sm:$0xff]  ;;  %v162_v10 = vld [vmem:[#allocation10 + $0x160] sm:$0xff] }
  0x80   :  { %2501 = vmatprep.subr.bf16.mxu1 %v2500_v27  ;;  %v2528_v8 = vpack.c.bf16 %v163_v6, %v157_v5  ;;  %v169_v11 = vld [vmem:[#allocation10 + $0x198] sm:$0xff]  ;;  %v175_v12 = vld [vmem:[#allocation10 + $0x1c8] sm:$0xff]  ;;  %v2530_v13 = vpack.c.bf16 %v162_v10, %v156_v9  ;;  %v168_v15 = vld [vmem:[#allocation10 + $0x190] sm:$0xff] }
  0x81   :  { %v2532_v14 = vpack.c.bf16 %v175_v12, %v169_v11  ;;  %v174_v16 = vld [vmem:[#allocation10 + $0x1c0] sm:$0xff]  ;;  %v181_v17 = vld [vmem:[#allocation10 + $0x1f8] sm:$0xff]  ;;  %v187_v18 = vld [vmem:[#allocation10 + $0x228] sm:$0xff] }
  0x82   :  { %v2534_v19 = vpack.c.bf16 %v174_v16, %v168_v15  ;;  %v2536_v20 = vpack.c.bf16 %v187_v18, %v181_v17  ;;  %v180_v21 = vld [vmem:[#allocation10 + $0x1f0] sm:$0xff]  ;;  %v186_v22 = vld [vmem:[#allocation10 + $0x220] sm:$0xff]  ;;  %v193_v23 = vld [vmem:[#allocation10 + $0x258] sm:$0xff] }
  0x83   :  { %2503 = vmatpush1.bf16.msra.mxu1 %v2502_v32  ;;  %v199_v24 = vld [vmem:[#allocation10 + $0x288] sm:$0xff]  ;;  %v2538_v25 = vpack.c.bf16 %v186_v22, %v180_v21  ;;  %v192_v27 = vld [vmem:[#allocation10 + $0x250] sm:$0xff]  ;;  %v198_v28 = vld [vmem:[#allocation10 + $0x280] sm:$0xff] }
  0x84   :  { %2505 = vmatprep.subr.bf16.mxu1 %v2504_v33  ;;  %v2540_v26 = vpack.c.bf16 %v199_v24, %v193_v23  ;;  %v205_v29 = vld [vmem:[#allocation10 + $0x2b8] sm:$0xff]  ;;  %v211_v30 = vld [vmem:[#allocation10 + $0x2e8] sm:$0xff]  ;;  %v2542_v31 = vpack.c.bf16 %v198_v28, %v192_v27  ;;  %v204_v33 = vld [vmem:[#allocation10 + $0x2b0] sm:$0xff] }
  0x85   :  { %v2544_v32 = vpack.c.bf16 %v211_v30, %v205_v29  ;;  %v210_v34 = vld [vmem:[#allocation10 + $0x2e0] sm:$0xff]  ;;  %v674_v35 = vld [vmem:[#allocation8 + $0x38] sm:$0xff]  ;;  %v675_v40 = vld [vmem:[#allocation8 + $0x70] sm:$0xff] }
  0x86   :  { %v676_v36 = vld [vmem:[#allocation8 + $0x78] sm:$0xff]  ;;  %v2546_v37 = vpack.c.bf16 %v210_v34, %v204_v33  ;;  %v679_v46 = vld [vmem:[#allocation8 + $0xf0] sm:$0xff] }
  0x87   :  { %2507 = vmatpush1.bf16.msra.mxu1 %v2506_v38  ;;  %v3835_v38 = vpack.c.bf16 %v676_v36, %v674_v35  ;;  %v678_v41 = vld [vmem:[#allocation8 + $0xb8] sm:$0xff]  ;;  %v683_v52 = vld [vmem:[#allocation8 + $0x170] sm:$0xff] }
  0x88   :  { %2509 = vmatprep.subr.bf16.mxu1 %v2508_v39  ;;  %v673_v39 = vld [vmem:[#allocation8 + $0x30] sm:$0xff]  ;;  %v680_v42 = vld [vmem:[#allocation8 + $0xf8] sm:$0xff] }
  0x89   :  { %v3837_v43 = vpack.c.bf16 %v675_v40, %v673_v39  ;;  %v682_v47 = vld [vmem:[#allocation8 + $0x138] sm:$0xff]  ;;  %v685_v59 = vld [vmem:[#allocation8 + $0x1b0] sm:$0xff] }
  0x8a   :  { %v684_v48 = vld [vmem:[#allocation8 + $0x178] sm:$0xff]  ;;  %v687_v60 = vld [vmem:[#allocation8 + $0x1f0] sm:$0xff] }
  0x8b   :  { %2511 = vmatpush1.bf16.msra.mxu1 %v2510_v44  ;;  %v3840_v44 = vpack.c.bf16 %v680_v42, %v678_v41  ;;  %v3850_v53 = vld [vmem:[#allocation2 + $0x8] sm:$0xff]  ;;  %v689_v3 = vld [vmem:[#allocation8 + $0x230] sm:$0xff] }
  0x8c   :  { %2513 = vmatprep.subr.bf16.mxu1 %v2512_v45  ;;  %v677_v45 = vld [vmem:[#allocation8 + $0xb0] sm:$0xff]  ;;  %v686_v54 = vld [vmem:[#allocation8 + $0x1b8] sm:$0xff] }
  0x8d   :  { %v3844_v49 = vpack.c.bf16 %v679_v46, %v677_v45  ;;  %v688_v55 = vld [vmem:[#allocation8 + $0x1f8] sm:$0xff]  ;;  %v691_v4 = vld [vmem:[#allocation8 + $0x270] sm:$0xff] }
  0x8e   :  { %v690_v61 = vld [vmem:[#allocation8 + $0x238] sm:$0xff]  ;;  %v693_v9 = vld [vmem:[#allocation8 + $0x2b0] sm:$0xff] }
  0x8f   :  { %2515 = vmatpush1.bf16.msra.mxu1 %v2514_v50  ;;  %v3848_v50 = vpack.c.bf16 %v684_v48, %v682_v47  ;;  %v692_v62 = vld [vmem:[#allocation8 + $0x278] sm:$0xff]  ;;  %v695_v10 = vld [vmem:[#allocation8 + $0x2f0] sm:$0xff] }
  0x90   :  { %2517 = vmatprep.subr.bf16.mxu1 %v2516_v51  ;;  %v681_v51 = vld [vmem:[#allocation8 + $0x130] sm:$0xff]  ;;  %v694_v5 = vld [vmem:[#allocation8 + $0x2b8] sm:$0xff] }
  0x91   :  { %v696_v6 = vld [vmem:[#allocation8 + $0x2f8] sm:$0xff]  ;;  %v697_v15 = vld [vmem:[#allocation8 + $0x330] sm:$0xff] }
  0x92   :  { %311 = vmatmul.mubr.f32.vlgmr.msra.gmra.mrb[0].mxu1 %v3827_v56  ;;  %v698_v11 = vld [vmem:[#allocation8 + $0x338] sm:$0xff]  ;;  %v699_v16 = vld [vmem:[#allocation8 + $0x370] sm:$0xff] }
  0x93   :  { %2519 = vmatpush1.bf16.msra.mxu1 %v2518_v57  ;;  %316 = vmatprep.mubr.f32.mxu1 %v4826_v0  ;;  %v3854_v57 = vpack.c.bf16 %v683_v52, %v681_v51  ;;  %v700_v12 = vld [vmem:[#allocation8 + $0x378] sm:$0xff]  ;;  %v701_v21 = vld [vmem:[#allocation8 + $0x3b0] sm:$0xff] }
  0x94   :  { %2521 = vmatprep.subr.bf16.mxu1 %v2520_v58  ;;  %v3858_v58 = vpack.c.bf16 %v688_v55, %v686_v54  ;;  %v702_v17 = vld [vmem:[#allocation8 + $0x3b8] sm:$0xff]  ;;  %v703_v22 = vld [vmem:[#allocation8 + $0x3f0] sm:$0xff] }
  0x95   :  { %v704_v18 = vld [vmem:[#allocation8 + $0x3f8] sm:$0xff]  ;;  %v705_v27 = vld [vmem:[#allocation8 + $0x430] sm:$0xff] }
  0x96   :  { %317 = vmatmul.mubr.f32.gmra.mrb[2].mxu1 %v3831_v1  ;;  %v706_v23 = vld [vmem:[#allocation8 + $0x438] sm:$0xff]  ;;  %v707_v28 = vld [vmem:[#allocation8 + $0x470] sm:$0xff] }
  0x97   :  { %2523 = vmatpush1.bf16.msra.mxu1 %v2522_v63  ;;  %387 = vmatprep.mubr.f32.mxu1 %v4826_v0  ;;  %v3861_v63 = vpack.c.bf16 %v687_v60, %v685_v59  ;;  %v708_v24 = vld [vmem:[#allocation8 + $0x478] sm:$0xff]  ;;  %v709_v33 = vld [vmem:[#allocation8 + $0x4b0] sm:$0xff] }
  0x98   :  { %2525 = vmatprep.subr.bf16.mxu1 %v2524_v2  ;;  %v3864_v2 = vpack.c.bf16 %v692_v62, %v690_v61  ;;  %v710_v29 = vld [vmem:[#allocation8 + $0x4b8] sm:$0xff]  ;;  %v711_v34 = vld [vmem:[#allocation8 + $0x4f0] sm:$0xff] }
  0x99   :  { %v712_v30 = vld [vmem:[#allocation8 + $0x4f8] sm:$0xff]  ;;  %v713_v40 = vld [vmem:[#allocation8 + $0x530] sm:$0xff] }
  0x9a   :  { %v714_v35 = vld [vmem:[#allocation8 + $0x538] sm:$0xff]  ;;  %v715_v41 = vld [vmem:[#allocation8 + $0x570] sm:$0xff] }
  0x9b   :  { %2527 = vmatpush1.bf16.msra.mxu1 %v2526_v7  ;;  %v3867_v7 = vpack.c.bf16 %v691_v4, %v689_v3  ;;  %v716_v36 = vld [vmem:[#allocation8 + $0x578] sm:$0xff]  ;;  %v3903_v46 = vpack.c.bf16 %v715_v41, %v713_v40  ;;  %v717_v48 = vld [vmem:[#allocation8 + $0x5b0] sm:$0xff] }
  0x9c   :  { %2529 = vmatprep.subr.bf16.mxu1 %v2528_v8  ;;  %v3870_v8 = vpack.c.bf16 %v696_v6, %v694_v5  ;;  %v3900_v39 = vpack.c.bf16 %v716_v36, %v714_v35  ;;  %v718_v42 = vld [vmem:[#allocation8 + $0x5b8] sm:$0xff]  ;;  %v719_v51 = vld [vmem:[#allocation8 + $0x5f0] sm:$0xff] }
  0x9d   :  { %v720_v45 = vld [vmem:[#allocation8 + $0x5f8] sm:$0xff]  ;;  %5052 = vst [vmem:[#allocation25_spill] sm:$0xff] %v3903_v46  ;;  %v3909_v55 = vpack.c.bf16 %v719_v51, %v717_v48  ;;  %v721_v60 = vld [vmem:[#allocation8 + $0x630] sm:$0xff] }
  0x9e   :  { %5051 = vst [vmem:[#allocation24_spill] sm:$0xff] %v3900_v39  ;;  %v3906_v47 = vpack.c.bf16 %v720_v45, %v718_v42  ;;  %v722_v52 = vld [vmem:[#allocation8 + $0x638] sm:$0xff]  ;;  %v723_v61 = vld [vmem:[#allocation8 + $0x670] sm:$0xff]  ;;  %v3944_v45 = vld [vmem:[#allocation2 + $0x18] sm:$0xff] }
  0x9f   :  { %2531 = vmatpush1.bf16.msra.mxu1 %v2530_v13  ;;  %v3873_v13 = vpack.c.bf16 %v695_v10, %v693_v9  ;;  %v724_v54 = vld [vmem:[#allocation8 + $0x678] sm:$0xff]  ;;  %5054 = vst [vmem:[#allocation27_spill] sm:$0xff] %v3909_v55  ;;  %v3915_v4 = vpack.c.bf16 %v723_v61, %v721_v60  ;;  %v725_v6 = vld [vmem:[#allocation8 + $0x6b0] sm:$0xff]  ;;  %v3951_v61 = vld [vmem:[#allocation2 + $0x10] sm:$0xff] }
  0xa0   :  { %2533 = vmatprep.subr.bf16.mxu1 %v2532_v14  ;;  %v3876_v14 = vpack.c.bf16 %v700_v12, %v698_v11  ;;  %5053 = vst [vmem:[#allocation26_spill] sm:$0xff] %v3906_v47  ;;  %v3912_v59 = vpack.c.bf16 %v724_v54, %v722_v52  ;;  %v726_v62 = vld [vmem:[#allocation8 + $0x6b8] sm:$0xff]  ;;  %v727_v9 = vld [vmem:[#allocation8 + $0x6f0] sm:$0xff] }
  0xa1   :  { %v728_v3 = vld [vmem:[#allocation8 + $0x6f8] sm:$0xff]  ;;  %5056 = vst [vmem:[#allocation29_spill] sm:$0xff] %v3915_v4  ;;  %v3921_v12 = vpack.c.bf16 %v727_v9, %v725_v6  ;;  %v547_v35 = vld [vmem:[#allocation8 + $0x50] sm:$0xff] }
  0xa2   :  { %5055 = vst [vmem:[#allocation28_spill] sm:$0xff] %v3912_v59  ;;  %v3918_v5 = vpack.c.bf16 %v728_v3, %v726_v62  ;;  %v730_v10 = vld [vmem:[#allocation8 + $0x738] sm:$0xff]  ;;  %v3939_v41 = vld [vmem:[#allocation2] sm:$0xff] }
  0xa3   :  { %2535 = vmatpush1.bf16.msra.mxu1 %v2534_v19  ;;  %v3879_v19 = vpack.c.bf16 %v699_v16, %v697_v15  ;;  %v732_v11 = vld [vmem:[#allocation8 + $0x778] sm:$0xff]  ;;  %5058 = vst [vmem:[#allocation31_spill] sm:$0xff] %v3921_v12  ;;  %v729_v16 = vld [vmem:[#allocation8 + $0x730] sm:$0xff] }
  0xa4   :  { %2537 = vmatprep.subr.bf16.mxu1 %v2536_v20  ;;  %v3882_v20 = vpack.c.bf16 %v704_v18, %v702_v17  ;;  %5057 = vst [vmem:[#allocation30_spill] sm:$0xff] %v3918_v5  ;;  %v3924_v15 = vpack.c.bf16 %v732_v11, %v730_v10  ;;  %v731_v17 = vld [vmem:[#allocation8 + $0x770] sm:$0xff]  ;;  %v734_v18 = vld [vmem:[#allocation8 + $0x7b8] sm:$0xff] }
  0xa5   :  { %v550_v36 = vld [vmem:[#allocation8 + $0x98] sm:$0xff]  ;;  %v549_v51 = vld [vmem:[#allocation8 + $0x90] sm:$0xff] }
  0xa6   :  { %5059 = vst [vmem:[#allocation32_spill] sm:$0xff] %v3924_v15  ;;  %v552_v40 = vld [vmem:[#allocation8 + $0xd8] sm:$0xff]  ;;  %v551_v52 = vld [vmem:[#allocation8 + $0xd0] sm:$0xff] }
  0xa7   :  { %2539 = vmatpush1.bf16.msra.mxu1 %v2538_v25  ;;  %v3885_v25 = vpack.c.bf16 %v703_v22, %v701_v21  ;;  %v736_v21 = vld [vmem:[#allocation8 + $0x7f8] sm:$0xff]  ;;  %v3927_v22 = vpack.c.bf16 %v731_v17, %v729_v16  ;;  %v3946_v48 = vpack.c.bf16 %v552_v40, %v550_v36  ;;  %v3953_v62 = vpack.c.bf16 %v551_v52, %v549_v51  ;;  %v553_v6 = vld [vmem:[#allocation8 + $0x110] sm:$0xff] }
  0xa8   :  { %2541 = vmatprep.subr.bf16.mxu1 %v2540_v26  ;;  %v3888_v26 = vpack.c.bf16 %v708_v24, %v706_v23  ;;  %v3930_v23 = vpack.c.bf16 %v736_v21, %v734_v18  ;;  %v733_v24 = vld [vmem:[#allocation8 + $0x7b0] sm:$0xff]  ;;  %v554_v54 = vld [vmem:[#allocation8 + $0x118] sm:$0xff] }
  0xa9   :  { %5046 = vst [vmem:[#allocation19_spill] sm:$0xff] %v3885_v25  ;;  %5060 = vst [vmem:[#allocation33_spill] sm:$0xff] %v3927_v22  ;;  %v556_v60 = vld [vmem:[#allocation8 + $0x158] sm:$0xff]  ;;  %v555_v9 = vld [vmem:[#allocation8 + $0x150] sm:$0xff] }
  0xaa   :  { %5047 = vst [vmem:[#allocation20_spill] sm:$0xff] %v3888_v26  ;;  %5061 = vst [vmem:[#allocation34_spill] sm:$0xff] %v3930_v23  ;;  %v3956_v3 = vpack.c.bf16 %v556_v60, %v554_v54  ;;  %v558_v10 = vld [vmem:[#allocation8 + $0x198] sm:$0xff]  ;;  %v3960_v16 = vpack.c.bf16 %v555_v9, %v553_v6  ;;  %v557_v18 = vld [vmem:[#allocation8 + $0x190] sm:$0xff] }
  0xab   :  { %2543 = vmatpush1.bf16.msra.mxu1 %v2542_v31  ;;  %v3891_v31 = vpack.c.bf16 %v707_v28, %v705_v27  ;;  %v735_v27 = vld [vmem:[#allocation8 + $0x7f0] sm:$0xff]  ;;  %v546_v28 = vld [vmem:[#allocation8 + $0x18] sm:$0xff]  ;;  %5065 = vst [vmem:[#allocation38_spill] sm:$0xff] %v3946_v48  ;;  %5066 = vst [vmem:[#allocation39_spill] sm:$0xff] %v3953_v62 }
  0xac   :  { %2545 = vmatprep.subr.bf16.mxu1 %v2544_v32  ;;  %v3894_v32 = vpack.c.bf16 %v712_v30, %v710_v29  ;;  %v548_v29 = vld [vmem:[#allocation8 + $0x58] sm:$0xff]  ;;  %v3933_v30 = vpack.c.bf16 %v735_v27, %v733_v24  ;;  %5067 = vst [vmem:[#allocation40_spill] sm:$0xff] %v3956_v3  ;;  %5068 = vst [vmem:[#allocation41_spill] sm:$0xff] %v3960_v16  ;;  %v559_v21 = vld [vmem:[#allocation8 + $0x1d0] sm:$0xff] }
  0xad   :  { %5048 = vst [vmem:[#allocation21_spill] sm:$0xff] %v3891_v31  ;;  %v560_v11 = vld [vmem:[#allocation8 + $0x1d8] sm:$0xff]  ;;  %v565_v52 = vld [vmem:[#allocation8 + $0x290] sm:$0xff] }
  0xae   :  { %5049 = vst [vmem:[#allocation22_spill] sm:$0xff] %v3894_v32  ;;  %5062 = vst [vmem:[#allocation35_spill] sm:$0xff] %v3933_v30  ;;  %v3964_v17 = vpack.c.bf16 %v560_v11, %v558_v10  ;;  %v562_v24 = vld [vmem:[#allocation8 + $0x218] sm:$0xff]  ;;  %v567_v54 = vld [vmem:[#allocation8 + $0x2d0] sm:$0xff] }
  0xaf   :  { %2547 = vmatpush1.bf16.msra.mxu1 %v2546_v37  ;;  %v3897_v37 = vpack.c.bf16 %v711_v34, %v709_v33  ;;  %v3936_v33 = vpack.c.bf16 %v548_v29, %v546_v28  ;;  %v545_v34 = vld [vmem:[#allocation8 + $0x10] sm:$0xff]  ;;  %v564_v27 = vld [vmem:[#allocation8 + $0x258] sm:$0xff]  ;;  %v3967_v28 = vpack.c.bf16 %v559_v21, %v557_v18  ;;  %v3979_v9 = vpack.c.bf16 %v567_v54, %v565_v52  ;;  %v122_v52 = vld [vmem:[#allocation10 + $0x20] sm:$0xff] }
  0xb0   :  { %2581 = vmatprep.subr.bf16.mxu1 %v3835_v38  ;;  %v3941_v42 = vpack.c.bf16 %v547_v35, %v545_v34  ;;  %5069 = vst [vmem:[#allocation42_spill] sm:$0xff] %v3964_v17  ;;  %v3970_v29 = vpack.c.bf16 %v564_v27, %v562_v24  ;;  %v561_v34 = vld [vmem:[#allocation8 + $0x210] sm:$0xff]  ;;  %v566_v36 = vld [vmem:[#allocation8 + $0x298] sm:$0xff] }
  0xb1   :  { %5050 = vst [vmem:[#allocation23_spill] sm:$0xff] %v3897_v37  ;;  %5063 = vst [vmem:[#allocation36_spill] sm:$0xff] %v3936_v33  ;;  %v563_v35 = vld [vmem:[#allocation8 + $0x250] sm:$0xff]  ;;  %v570_v60 = vld [vmem:[#allocation8 + $0x318] sm:$0xff] }
  0xb2   :  { %388 = vmatmul.mubr.f32.vlgmr.msra.gmra.mrb[4].mxu1 %v3827_v56  ;;  %5064 = vst [vmem:[#allocation37_spill] sm:$0xff] %v3941_v42  ;;  %5070 = vst [vmem:[#allocation43_spill] sm:$0xff] %v3967_v28  ;;  %v3973_v40 = vpack.c.bf16 %v563_v35, %v561_v34  ;;  %v572_v6 = vld [vmem:[#allocation8 + $0x358] sm:$0xff]  ;;  %v569_v11 = vld [vmem:[#allocation8 + $0x310] sm:$0xff] }
  0xb3   :  { %2583 = vmatpush1.bf16.msra.mxu1 %v3837_v43  ;;  %393 = vmatprep.mubr.f32.mxu1 %v4826_v0  ;;  %5071 = vst [vmem:[#allocation44_spill] sm:$0xff] %v3970_v29  ;;  %5074 = vst [vmem:[#allocation47_spill] sm:$0xff] %v3979_v9  ;;  %v3982_v10 = vpack.c.bf16 %v572_v6, %v570_v60  ;;  %v571_v18 = vld [vmem:[#allocation8 + $0x350] sm:$0xff]  ;;  %v574_v21 = vld [vmem:[#allocation8 + $0x398] sm:$0xff] }
  0xb4   :  { %2585 = vmatprep.subr.bf16.mxu1 %v3840_v44  ;;  %5072 = vst [vmem:[#allocation45_spill] sm:$0xff] %v3973_v40  ;;  %v576_v24 = vld [vmem:[#allocation8 + $0x3d8] sm:$0xff]  ;;  %v573_v27 = vld [vmem:[#allocation8 + $0x390] sm:$0xff]  ;;  %v3985_v35 = vpack.c.bf16 %v571_v18, %v569_v11  ;;  %v123_v0 = vld [vmem:[#allocation10 + $0x28] sm:$0xff] }
  0xb5   :  { %5075 = vst [vmem:[#allocation48_spill] sm:$0xff] %v3982_v10  ;;  %v575_v34 = vld [vmem:[#allocation8 + $0x3d0] sm:$0xff]  ;;  %v3988_v54 = vpack.c.bf16 %v576_v24, %v574_v21  ;;  %v153_v11 = vld [vmem:[#allocation10 + $0x118] sm:$0xff] }
  0xb6   :  { %394 = vmatmul.mubr.f32.gmra.mrb[6].mxu1 %v3831_v1  ;;  %5076 = vst [vmem:[#allocation49_spill] sm:$0xff] %v3985_v35  ;;  %v128_v6 = vld [vmem:[#allocation10 + $0x50] sm:$0xff]  ;;  %v3991_v18 = vpack.c.bf16 %v575_v34, %v573_v27 }
  0xb7   :  { %2587 = vmatpush1.bf16.msra.mxu1 %v3844_v49  ;;  %807 = vmatprep.mubr.f32.mxu1 %v3850_v53  ;;  %5077 = vst [vmem:[#allocation50_spill] sm:$0xff] %v3988_v54  ;;  %v152_v24 = vld [vmem:[#allocation10 + $0x110] sm:$0xff] }
  0xb8   :  { %2589 = vmatprep.subr.bf16.mxu1 %v3848_v50  ;;  %5078 = vst [vmem:[#allocation51_spill] sm:$0xff] %v3991_v18  ;;  %v581_v34 = vld [vmem:[#allocation8 + $0x490] sm:$0xff] }
  0xbb   :  { %2591 = vmatpush1.bf16.msra.mxu1 %v3854_v57 }
  0xbc   :  { %2593 = vmatprep.subr.bf16.mxu1 %v3858_v58 }
  0xbf   :  { %2595 = vmatpush1.bf16.msra.mxu1 %v3861_v63 }
  0xc0   :  { %2597 = vmatprep.subr.bf16.mxu1 %v3864_v2 }
  0xc3   :  { %2599 = vmatpush1.bf16.msra.mxu1 %v3867_v7 }
  0xc4   :  { %2601 = vmatprep.subr.bf16.mxu1 %v3870_v8 }
  0xc7   :  { %2603 = vmatpush1.bf16.msra.mxu1 %v3873_v13 }
  0xc8   :  { %2605 = vmatprep.subr.bf16.mxu1 %v3876_v14 }
  0xcb   :  { %2607 = vmatpush1.bf16.msra.mxu1 %v3879_v19 }
  0xcc   :  { %2609 = vmatprep.subr.bf16.mxu1 %v3882_v20 }
  0xcf   :  { %2611 = vmatpush1.bf16.msra.mxu1 %v3885_v25 }
  0xd0   :  { %2613 = vmatprep.subr.bf16.mxu1 %v3888_v26 }
  0xd3   :  { %2615 = vmatpush1.bf16.msra.mxu1 %v3891_v31 }
  0xd4   :  { %2617 = vmatprep.subr.bf16.mxu1 %v3894_v32 }
  0xd7   :  { %2619 = vmatpush1.bf16.msra.mxu1 %v3897_v37 }
  0xd8   :  { %2621 = vmatprep.subr.bf16.mxu1 %v3900_v39 }
  0xdb   :  { %2623 = vmatpush1.bf16.msra.mxu1 %v3903_v46 }
  0xdc   :  { %2625 = vmatprep.subr.bf16.mxu1 %v3906_v47 }
  0xdf   :  { %2627 = vmatpush1.bf16.msra.mxu1 %v3909_v55 }
  0xe0   :  { %2629 = vmatprep.subr.bf16.mxu1 %v3912_v59 }
  0xe3   :  { %2631 = vmatpush1.bf16.msra.mxu1 %v3915_v4 }
  0xe4   :  { %2633 = vmatprep.subr.bf16.mxu1 %v3918_v5 }
  0xe7   :  { %2635 = vmatpush1.bf16.msra.mxu1 %v3921_v12 }
  0xe8   :  { %2637 = vmatprep.subr.bf16.mxu1 %v3924_v15 }
  0xeb   :  { %2639 = vmatpush1.bf16.msra.mxu1 %v3927_v22 }
  0xec   :  { %2641 = vmatprep.subr.bf16.mxu1 %v3930_v23 }
  0xef   :  { %2643 = vmatpush1.bf16.msra.mxu1 %v3933_v30 }
  0xf0   :  { %2713 = vmatprep.subr.bf16.mxu1 %v3936_v33 }
  0xf2   :  { %808 = vmatmul.mubr.f32.vlgmr.msra.gmra.mrb[8].mxu1 %v3939_v41 }
  0xf3   :  { %2715 = vmatpush1.bf16.msra.mxu1 %v3941_v42  ;;  %813 = vmatprep.mubr.f32.mxu1 %v3944_v45 }
  0xf4   :  { %2717 = vmatprep.subr.bf16.mxu1 %v3946_v48  ;;  %v579_v48 = vld [vmem:[#allocation8 + $0x450] sm:$0xff] }
  0xf6   :  { %814 = vmatmul.mubr.f32.gmra.mrb[10].mxu1 %v3951_v61 }
  0xf7   :  { %2719 = vmatpush1.bf16.msra.mxu1 %v3953_v62  ;;  %1081 = vmatprep.mubr.f32.mxu1 %v3850_v53  ;;  %v568_v53 = vld [vmem:[#allocation8 + $0x2d8] sm:$0xff]  ;;  %v577_v62 = vld [vmem:[#allocation8 + $0x410] sm:$0xff] }
  0xf8   :  { %2721 = vmatprep.subr.bf16.mxu1 %v3956_v3  ;;  %v3976_v51 = vpack.c.bf16 %v568_v53, %v566_v36  ;;  %v578_v36 = vld [vmem:[#allocation8 + $0x418] sm:$0xff]  ;;  %v140_v3 = vld [vmem:[#allocation10 + $0xb0] sm:$0xff]  ;;  %v3997_v27 = vpack.c.bf16 %v579_v48, %v577_v62 }
  0xf9   :  { %v580_v53 = vld [vmem:[#allocation8 + $0x458] sm:$0xff]  ;;  %v585_v62 = vld [vmem:[#allocation8 + $0x510] sm:$0xff] }
  0xfa   :  { %5073 = vst [vmem:[#allocation46_spill] sm:$0xff] %v3976_v51  ;;  %5080 = vst [vmem:[#allocation53_spill] sm:$0xff] %v3997_v27 }
  0xfb   :  { %2723 = vmatpush1.bf16.msra.mxu1 %v3960_v16  ;;  %v134_v16 = vld [vmem:[#allocation10 + $0x80] sm:$0xff] }
  0xfc   :  { %2725 = vmatprep.subr.bf16.mxu1 %v3964_v17  ;;  %v2554_v21 = vpack.c.bf16 %v140_v3, %v134_v16 }
  0xff   :  { %2727 = vmatpush1.bf16.msra.mxu1 %v3967_v28  ;;  %v2550_v28 = vpack.c.bf16 %v128_v6, %v122_v52  ;;  %v584_v52 = vld [vmem:[#allocation8 + $0x4d8] sm:$0xff] }
 0x100   :  { %2729 = vmatprep.subr.bf16.mxu1 %v3970_v29  ;;  %v141_v29 = vld [vmem:[#allocation10 + $0xb8] sm:$0xff] }
 0x101   :  { %v165_v6 = vld [vmem:[#allocation10 + $0x178] sm:$0xff] }
 0x103   :  { %2731 = vmatpush1.bf16.msra.mxu1 %v3973_v40  ;;  %v129_v40 = vld [vmem:[#allocation10 + $0x58] sm:$0xff] }
 0x104   :  { %2733 = vmatprep.subr.bf16.mxu1 %v3976_v51  ;;  %v2548_v60 = vpack.c.bf16 %v129_v40, %v123_v0  ;;  %v135_v51 = vld [vmem:[#allocation10 + $0x88] sm:$0xff]  ;;  %v3994_v0 = vpack.c.bf16 %v580_v53, %v578_v36  ;;  %v582_v40 = vld [vmem:[#allocation8 + $0x498] sm:$0xff]  ;;  %v164_v36 = vld [vmem:[#allocation10 + $0x170] sm:$0xff] }
 0x105   :  { %v2552_v17 = vpack.c.bf16 %v141_v29, %v135_v51  ;;  %v146_v51 = vld [vmem:[#allocation10 + $0xe0] sm:$0xff]  ;;  %v4000_v16 = vpack.c.bf16 %v584_v52, %v582_v40  ;;  %v588_v53 = vld [vmem:[#allocation8 + $0x558] sm:$0xff]  ;;  %v176_v52 = vld [vmem:[#allocation10 + $0x1d0] sm:$0xff] }
 0x106   :  { %2549 = vmatprep.subr.bf16.mxu0 %v2548_v60  ;;  %5079 = vst [vmem:[#allocation52_spill] sm:$0xff] %v3994_v0  ;;  %v159_v60 = vld [vmem:[#allocation10 + $0x148] sm:$0xff]  ;;  %v2558_v3 = vpack.c.bf16 %v152_v24, %v146_v51  ;;  %v590_v51 = vld [vmem:[#allocation8 + $0x598] sm:$0xff]  ;;  %v170_v24 = vld [vmem:[#allocation10 + $0x1a0] sm:$0xff] }
 0x107   :  { %2735 = vmatpush1.bf16.msra.mxu1 %v3979_v9  ;;  %v147_v9 = vld [vmem:[#allocation10 + $0xe8] sm:$0xff]  ;;  %2551 = vmatpush1.bf16.msra.mxu0 %v2550_v28  ;;  %5081 = vst [vmem:[#allocation54_spill] sm:$0xff] %v4000_v16  ;;  %v586_v28 = vld [vmem:[#allocation8 + $0x518] sm:$0xff] }
 0x108   :  { %2737 = vmatprep.subr.bf16.mxu1 %v3982_v10  ;;  %2553 = vmatprep.subr.bf16.mxu0 %v2552_v17  ;;  %v2556_v29 = vpack.c.bf16 %v153_v11, %v147_v9  ;;  %v2560_v17 = vpack.c.bf16 %v165_v6, %v159_v60  ;;  %v158_v9 = vld [vmem:[#allocation10 + $0x140] sm:$0xff]  ;;  %v171_v11 = vld [vmem:[#allocation10 + $0x1a8] sm:$0xff]  ;;  %v4006_v40 = vpack.c.bf16 %v588_v53, %v586_v28  ;;  %v592_v60 = vld [vmem:[#allocation8 + $0x5d8] sm:$0xff] }
 0x109   :  { %v183_v6 = vld [vmem:[#allocation10 + $0x208] sm:$0xff]  ;;  %v4012_v28 = vpack.c.bf16 %v592_v60, %v590_v51  ;;  %v596_v53 = vld [vmem:[#allocation8 + $0x658] sm:$0xff]  ;;  %v595_v51 = vld [vmem:[#allocation8 + $0x650] sm:$0xff] }
 0x10a   :  { %5083 = vst [vmem:[#allocation56_spill] sm:$0xff] %v4006_v40  ;;  %v598_v60 = vld [vmem:[#allocation8 + $0x698] sm:$0xff] }
 0x10b   :  { %2739 = vmatpush1.bf16.msra.mxu1 %v3985_v35  ;;  %v583_v35 = vld [vmem:[#allocation8 + $0x4d0] sm:$0xff]  ;;  %2555 = vmatpush1.bf16.msra.mxu0 %v2554_v21  ;;  %v2562_v21 = vpack.c.bf16 %v164_v36, %v158_v9  ;;  %5085 = vst [vmem:[#allocation58_spill] sm:$0xff] %v4012_v28  ;;  %v594_v9 = vld [vmem:[#allocation8 + $0x618] sm:$0xff] }
 0x10c   :  { %2741 = vmatprep.subr.bf16.mxu1 %v3988_v54  ;;  %2557 = vmatprep.subr.bf16.mxu0 %v2556_v29  ;;  %v177_v54 = vld [vmem:[#allocation10 + $0x1d8] sm:$0xff]  ;;  %v4003_v48 = vpack.c.bf16 %v583_v35, %v581_v34  ;;  %v589_v34 = vld [vmem:[#allocation8 + $0x590] sm:$0xff] }
 0x10d   :  { %v2564_v29 = vpack.c.bf16 %v177_v54, %v171_v11  ;;  %v188_v36 = vld [vmem:[#allocation10 + $0x230] sm:$0xff]  ;;  %v195_v11 = vld [vmem:[#allocation10 + $0x268] sm:$0xff] }
 0x10e   :  { %5082 = vst [vmem:[#allocation55_spill] sm:$0xff] %v4003_v48 }
 0x10f   :  { %2743 = vmatpush1.bf16.msra.mxu1 %v3991_v18  ;;  %v587_v18 = vld [vmem:[#allocation8 + $0x550] sm:$0xff]  ;;  %2559 = vmatpush1.bf16.msra.mxu0 %v2558_v3  ;;  %v2566_v3 = vpack.c.bf16 %v176_v52, %v170_v24  ;;  %v4018_v24 = vpack.c.bf16 %v596_v53, %v594_v9 }
 0x110   :  { %2745 = vmatprep.subr.bf16.mxu1 %v3994_v0  ;;  %2561 = vmatprep.subr.bf16.mxu0 %v2560_v17  ;;  %v189_v0 = vld [vmem:[#allocation10 + $0x238] sm:$0xff]  ;;  %v4009_v35 = vpack.c.bf16 %v587_v18, %v585_v62  ;;  %v182_v17 = vld [vmem:[#allocation10 + $0x200] sm:$0xff]  ;;  %v593_v62 = vld [vmem:[#allocation8 + $0x610] sm:$0xff] }
 0x111   :  { %v2568_v54 = vpack.c.bf16 %v189_v0, %v183_v6  ;;  %5087 = vst [vmem:[#allocation60_spill] sm:$0xff] %v4018_v24  ;;  %v194_v0 = vld [vmem:[#allocation10 + $0x260] sm:$0xff]  ;;  %v200_v52 = vld [vmem:[#allocation10 + $0x290] sm:$0xff]  ;;  %v600_v6 = vld [vmem:[#allocation8 + $0x6d8] sm:$0xff] }
 0x112   :  { %5084 = vst [vmem:[#allocation57_spill] sm:$0xff] %v4009_v35  ;;  %v599_v9 = vld [vmem:[#allocation8 + $0x6d0] sm:$0xff] }
 0x113   :  { %2747 = vmatpush1.bf16.msra.mxu1 %v3997_v27  ;;  %v591_v27 = vld [vmem:[#allocation8 + $0x5d0] sm:$0xff]  ;;  %2563 = vmatpush1.bf16.msra.mxu0 %v2562_v21  ;;  %v2570_v21 = vpack.c.bf16 %v188_v36, %v182_v17  ;;  %v602_v17 = vld [vmem:[#allocation8 + $0x718] sm:$0xff] }
 0x114   :  { %2749 = vmatprep.subr.bf16.mxu1 %v4000_v16  ;;  %2565 = vmatprep.subr.bf16.mxu0 %v2564_v29  ;;  %v201_v16 = vld [vmem:[#allocation10 + $0x298] sm:$0xff]  ;;  %v4015_v18 = vpack.c.bf16 %v591_v27, %v589_v34  ;;  %v2574_v27 = vpack.c.bf16 %v200_v52, %v194_v0  ;;  %v4024_v34 = vpack.c.bf16 %v600_v6, %v598_v60  ;;  %v601_v53 = vld [vmem:[#allocation8 + $0x710] sm:$0xff]  ;;  %v207_v6 = vld [vmem:[#allocation10 + $0x2c8] sm:$0xff] }
 0x115   :  { %v2572_v29 = vpack.c.bf16 %v201_v16, %v195_v11  ;;  %v603_v11 = vld [vmem:[#allocation8 + $0x750] sm:$0xff] }
 0x116   :  { %5086 = vst [vmem:[#allocation59_spill] sm:$0xff] %v4015_v18  ;;  %5089 = vst [vmem:[#allocation62_spill] sm:$0xff] %v4024_v34  ;;  %v605_v0 = vld [vmem:[#allocation8 + $0x790] sm:$0xff] }
 0x117   :  { %2751 = vmatpush1.bf16.msra.mxu1 %v4003_v48  ;;  %2567 = vmatpush1.bf16.msra.mxu0 %v2566_v3  ;;  %v597_v3 = vld [vmem:[#allocation8 + $0x690] sm:$0xff] }
 0x118   :  { %2753 = vmatprep.subr.bf16.mxu1 %v4006_v40  ;;  %2569 = vmatprep.subr.bf16.mxu0 %v2568_v54  ;;  %v4021_v40 = vpack.c.bf16 %v595_v51, %v593_v62  ;;  %v604_v54 = vld [vmem:[#allocation8 + $0x758] sm:$0xff]  ;;  %v4027_v16 = vpack.c.bf16 %v599_v9, %v597_v3  ;;  %v4033_v51 = vpack.c.bf16 %v603_v11, %v601_v53  ;;  %v607_v52 = vld [vmem:[#allocation8 + $0x7d0] sm:$0xff]  ;;  %v206_v9 = vld [vmem:[#allocation10 + $0x2c0] sm:$0xff]  ;;  %v5095_v53 = vmov 0.0  }
 0x119   :  { %v4030_v36 = vpack.c.bf16 %v604_v54, %v602_v17  ;;  %v606_v62 = vld [vmem:[#allocation8 + $0x798] sm:$0xff]  ;;  %v4039_v60 = vpack.c.bf16 %v607_v52, %v605_v0  ;;  %v212_v17 = vld [vmem:[#allocation10 + $0x2f0] sm:$0xff] }
 0x11a   :  { %5088 = vst [vmem:[#allocation61_spill] sm:$0xff] %v4021_v40  ;;  %5090 = vst [vmem:[#allocation63_spill] sm:$0xff] %v4027_v16  ;;  %v2578_v54 = vpack.c.bf16 %v212_v17, %v206_v9  ;;  %v737_v9 = vld [vmem:[#allocation11] sm:$0xff]  ;;  %v739_v17 = vld [vmem:[#allocation11 + $0x10] sm:$0xff] }
 0x11b   :  { %2755 = vmatpush1.bf16.msra.mxu1 %v4009_v35  ;;  %2571 = vmatpush1.bf16.msra.mxu0 %v2570_v21  ;;  %5091 = vst [vmem:[#allocation64_spill] sm:$0xff] %v4030_v36  ;;  %v608_v21 = vld [vmem:[#allocation8 + $0x7d8] sm:$0xff]  ;;  %5092 = vst [vmem:[#allocation65_spill] sm:$0xff] %v4033_v51 }
 0x11c   :  { %2757 = vmatprep.subr.bf16.mxu1 %v4012_v28  ;;  %2573 = vmatprep.subr.bf16.mxu0 %v2572_v29  ;;  %v4036_v29 = vpack.c.bf16 %v608_v21, %v606_v62  ;;  %5094 = vst [vmem:[#allocation67_spill] sm:$0xff] %v4039_v60 }
 0x11e   :  { %5093 = vst [vmem:[#allocation66_spill] sm:$0xff] %v4036_v29 }
 0x11f   :  { %2759 = vmatpush1.bf16.msra.mxu1 %v4015_v18  ;;  %2575 = vmatpush1.bf16.msra.mxu0 %v2574_v27  ;;  %v213_v27 = vld [vmem:[#allocation10 + $0x2f8] sm:$0xff] }
 0x120   :  { %2761 = vmatprep.subr.bf16.mxu1 %v4018_v24  ;;  %v2576_v3 = vpack.c.bf16 %v213_v27, %v207_v6 }
 0x122   :  { %2577 = vmatprep.subr.bf16.mxu0 %v2576_v3 }
 0x123   :  { %2763 = vmatpush1.bf16.msra.mxu1 %v4021_v40  ;;  %2579 = vmatpush1.bf16.msra.mxu0 %v2578_v54  ;;  %v738_v54 = vld [vmem:[#allocation11 + $0x8] sm:$0xff] }
 0x124   :  { %2765 = vmatprep.subr.bf16.mxu1 %v4024_v34 }
 0x126   :  { %465 = vmatmul.mubr.f32.vlgmr.msra.gmra.mrb[0].mxu0 %v3827_v56 }
 0x127   :  { %2767 = vmatpush1.bf16.msra.mxu1 %v4027_v16  ;;  %470 = vmatprep.mubr.f32.mxu0 %v5095_v53 }
 0x128   :  { %2769 = vmatprep.subr.bf16.mxu1 %v4030_v36 }
 0x12a   :  { %471 = vmatmul.mubr.f32.gmra.mrb[2].mxu0 %v3831_v1 }
 0x12b   :  { %2771 = vmatpush1.bf16.msra.mxu1 %v4033_v51  ;;  %895 = vmatprep.mubr.f32.mxu0 %v5095_v53 }
 0x12c   :  { %2773 = vmatprep.subr.bf16.mxu1 %v4036_v29 }
 0x12f   :  { %2775 = vmatpush1.bf16.msra.mxu1 %v4039_v60 }
 0x130   :  { %2845 = vmatprep.subr.bf16.mxu1 %v3835_v38 }
 0x132   :  { %1082 = vmatmul.mubr.f32.vlgmr.msra.gmra.mrb[12].mxu1 %v3939_v41 }
 0x133   :  { %1087 = vmatprep.mubr.f32.mxu1 %v3944_v45  ;;  %2847 = vmatpush1.bf16.msra.mxu1 %v3837_v43 }
 0x134   :  { %2849 = vmatprep.subr.bf16.mxu1 %v3840_v44 }
 0x136   :  { %1088 = vmatmul.mubr.f32.gmra.mrb[14].mxu1 %v3951_v61 }
 0x137   :  { %2851 = vmatpush1.bf16.msra.mxu1 %v3844_v49 }
 0x138   :  { %2853 = vmatprep.subr.bf16.mxu1 %v3848_v50 }
 0x13b   :  { %2855 = vmatpush1.bf16.msra.mxu1 %v3854_v57 }
 0x13c   :  { %2857 = vmatprep.subr.bf16.mxu1 %v3858_v58 }
 0x13f   :  { %2859 = vmatpush1.bf16.msra.mxu1 %v3861_v63 }
 0x140   :  { %2861 = vmatprep.subr.bf16.mxu1 %v3864_v2 }
 0x143   :  { %2863 = vmatpush1.bf16.msra.mxu1 %v3867_v7 }
 0x144   :  { %2865 = vmatprep.subr.bf16.mxu1 %v3870_v8 }
 0x147   :  { %2867 = vmatpush1.bf16.msra.mxu1 %v3873_v13 }
 0x148   :  { %2869 = vmatprep.subr.bf16.mxu1 %v3876_v14 }
 0x14b   :  { %2871 = vmatpush1.bf16.msra.mxu1 %v3879_v19 }
 0x14c   :  { %2873 = vmatprep.subr.bf16.mxu1 %v3882_v20 }
 0x14f   :  { %2875 = vmatpush1.bf16.msra.mxu1 %v3885_v25 }
 0x150   :  { %2877 = vmatprep.subr.bf16.mxu1 %v3888_v26  ;;  %v542_v26 = vld [vmem:[#allocation8 + $0x788] sm:$0xff] }
 0x153   :  { %2879 = vmatpush1.bf16.msra.mxu1 %v3891_v31  ;;  %v488_v31 = vld [vmem:[#allocation8 + $0xc8] sm:$0xff] }
 0x154   :  { %2881 = vmatprep.subr.bf16.mxu1 %v3894_v32  ;;  %v486_v32 = vld [vmem:[#allocation8 + $0x88] sm:$0xff] }
 0x157   :  { %2883 = vmatpush1.bf16.msra.mxu1 %v3897_v37  ;;  %v483_v37 = vld [vmem:[#allocation8 + $0x40] sm:$0xff] }
 0x158   :  { %2885 = vmatprep.subr.bf16.mxu1 %v3900_v39  ;;  %v481_v39 = vld [vmem:[#allocation8] sm:$0xff] }
 0x15b   :  { %2887 = vmatpush1.bf16.msra.mxu1 %v3903_v46 }
 0x15c   :  { %2889 = vmatprep.subr.bf16.mxu1 %v3906_v47 }
 0x15f   :  { %2891 = vmatpush1.bf16.msra.mxu1 %v3909_v55 }
 0x160   :  { %2893 = vmatprep.subr.bf16.mxu1 %v3912_v59 }
 0x163   :  { %2895 = vmatpush1.bf16.msra.mxu1 %v3915_v4 }
 0x164   :  { %2897 = vmatprep.subr.bf16.mxu1 %v3918_v5  ;;  %v482_v5 = vld [vmem:[#allocation8 + $0x8] sm:$0xff] }
 0x165   :  { %v4077_v56 = vpop.f32.mrb[0].mxu1 }
 0x166   :  { %v4079_v1 = vpop.f32.mrb[1].mxu1 }
 0x167   :  { %2899 = vmatpush1.bf16.msra.mxu1 %v3921_v12 }
 0x168   :  { %2901 = vmatprep.subr.bf16.mxu1 %v3924_v15 }
 0x169   :  { %v4083_v11 = vpop.f32.mrb[2].mxu1 }
 0x16a   :  { %v4085_v62 = vpop.f32.mrb[3].mxu1 }
 0x16b   :  { %2903 = vmatpush1.bf16.msra.mxu1 %v3927_v22  ;;  %v740_v22 = vld [vmem:[#allocation11 + $0x18] sm:$0xff] }
 0x16c   :  { %2905 = vmatprep.subr.bf16.mxu1 %v3930_v23 }
 0x16f   :  { %2907 = vmatpush1.bf16.msra.mxu1 %v3933_v30 }
 0x170   :  { %2977 = vmatprep.subr.bf16.mxu1 %v3936_v33  ;;  %v484_v33 = vld [vmem:[#allocation8 + $0x48] sm:$0xff] }
 0x171   :  { %v4099_v46 = vpack.c.bf16 %v484_v33, %v482_v5  ;;  %v490_v5 = vld [vmem:[#allocation8 + $0x108] sm:$0xff] }
 0x173   :  { %5096 = vst [vmem:[#allocation68_spill] sm:$0xff] %v4099_v46 }
 0x185   :  { %v4091_v21 = vpop.f32.mrb[4].mxu1 }
 0x186   :  { %v4093_v0 = vpop.f32.mrb[5].mxu1 }
 0x189   :  { %v4095_v52 = vpop.f32.mrb[6].mxu1 }
 0x18a   :  { %v4097_v6 = vpop.f32.mrb[7].mxu1 }
 0x1c5   :  { %v809_v27 = vpop.f32.mrb[8].mxu1 }
 0x1c6   :  { %v811_v3 = vpop.f32.mrb[9].mxu1  ;;  %v820_v23 = vmul.f32 %v809_v27, %v737_v9  ;;  %v4104_v27 = vld [vmem:[%s4824_s7] sm:$0xff]  ;;  %v495_v9 = vld [vmem:[#allocation8 + $0x1c0] sm:$0xff] }
 0x1c7   :  { %v821_v4 = vmul.f32 %v811_v3, %v738_v54  ;;  %v493_v3 = vld [vmem:[#allocation8 + $0x180] sm:$0xff]  ;;  %v500_v54 = vld [vmem:[#allocation8 + $0x248] sm:$0xff] }
 0x1c9   :  { %v815_v15 = vpop.f32.mrb[10].mxu1 }
 0x1ca   :  { %v822_v12 = vmul.f32 %v815_v15, %v739_v17  ;;  %v817_v30 = vpop.f32.mrb[11].mxu1  ;;  %v4106_v15 = vpack.c.bf16 %v483_v37, %v481_v39  ;;  %v491_v39 = vld [vmem:[#allocation8 + $0x140] sm:$0xff]  ;;  %v498_v17 = vld [vmem:[#allocation8 + $0x208] sm:$0xff] }
 0x1cb   :  { %v823_v59 = vmul.f32 %v817_v30, %v740_v22  ;;  %v492_v22 = vld [vmem:[#allocation8 + $0x148] sm:$0xff] }
 0x1cc   :  { %v2646_v55 = vpack.c.bf16 %v822_v12, %v820_v23  ;;  %5097 = vst [vmem:[#allocation69_spill] sm:$0xff] %v4106_v15  ;;  %v4109_v12 = vpack.c.bf16 %v488_v31, %v486_v32  ;;  %v4123_v31 = vpack.c.bf16 %v492_v22, %v490_v5  ;;  %v489_v32 = vld [vmem:[#allocation8 + $0x100] sm:$0xff]  ;;  %v496_v23 = vld [vmem:[#allocation8 + $0x1c8] sm:$0xff] }
 0x1cd   :  { %v2644_v47 = vpack.c.bf16 %v823_v59, %v821_v4  ;;  %v485_v59 = vld [vmem:[#allocation8 + $0x80] sm:$0xff]  ;;  %v4128_v30 = vpack.c.bf16 %v491_v39, %v489_v32  ;;  %v502_v32 = vld [vmem:[#allocation8 + $0x288] sm:$0xff] }
 0x1ce   :  { %5098 = vst [vmem:[#allocation70_spill] sm:$0xff] %v4109_v12  ;;  %v487_v4 = vld [vmem:[#allocation8 + $0xc0] sm:$0xff]  ;;  %5100 = vst [vmem:[#allocation72_spill] sm:$0xff] %v4123_v31  ;;  %v504_v39 = vld [vmem:[#allocation8 + $0x2c8] sm:$0xff] }
 0x1cf   :  { %2645 = vmatprep.subr.bf16.mxu0 %v2644_v47  ;;  %v4117_v47 = vld [vmem:[%s4824_s7 + $0x8] sm:$0xff]  ;;  %v4120_v37 = vpack.c.bf16 %v487_v4, %v485_v59  ;;  %5101 = vst [vmem:[#allocation73_spill] sm:$0xff] %v4128_v30  ;;  %v4134_v59 = vpack.c.bf16 %v495_v9, %v493_v3  ;;  %v4137_v4 = vpack.c.bf16 %v500_v54, %v498_v17  ;;  %v497_v5 = vld [vmem:[#allocation8 + $0x200] sm:$0xff]  ;;  %v506_v3 = vld [vmem:[#allocation8 + $0x308] sm:$0xff] }
 0x1d0   :  { %2647 = vmatpush1.bf16.msra.mxu0 %v2646_v55  ;;  %v494_v55 = vld [vmem:[#allocation8 + $0x188] sm:$0xff]  ;;  %v499_v22 = vld [vmem:[#allocation8 + $0x240] sm:$0xff] }
 0x1d1   :  { %2649 = vmatprep.subr.bf16.mxu0 %v4099_v46  ;;  %5099 = vst [vmem:[#allocation71_spill] sm:$0xff] %v4120_v37  ;;  %v4131_v33 = vpack.c.bf16 %v496_v23, %v494_v55  ;;  %5103 = vst [vmem:[#allocation75_spill] sm:$0xff] %v4134_v59  ;;  %v4140_v55 = vpack.c.bf16 %v499_v22, %v497_v5  ;;  %v4143_v23 = vpack.c.bf16 %v504_v39, %v502_v32  ;;  %v508_v9 = vld [vmem:[#allocation8 + $0x348] sm:$0xff] }
 0x1d2   :  { %5104 = vst [vmem:[#allocation76_spill] sm:$0xff] %v4137_v4  ;;  %v4149_v54 = vpack.c.bf16 %v508_v9, %v506_v3  ;;  %v510_v5 = vld [vmem:[#allocation8 + $0x388] sm:$0xff] }
 0x1d3   :  { %2448 = vmatmul.mubr.msk.f32.vlgmr.msra.gmra.mrb[4].mxu0 %vm824_vm0, %v4104_v27  ;;  %5102 = vst [vmem:[#allocation74_spill] sm:$0xff] %v4131_v33  ;;  %5105 = vst [vmem:[#allocation77_spill] sm:$0xff] %v4140_v55  ;;  %v512_v22 = vld [vmem:[#allocation8 + $0x3c8] sm:$0xff] }
 0x1d4   :  { %901 = vmatprep.mubr.f32.mxu0 %v5095_v53  ;;  %2651 = vmatpush1.bf16.msra.mxu0 %v4106_v15  ;;  %5106 = vst [vmem:[#allocation78_spill] sm:$0xff] %v4143_v23  ;;  %5108 = vst [vmem:[#allocation80_spill] sm:$0xff] %v4149_v54  ;;  %v4155_v39 = vpack.c.bf16 %v512_v22, %v510_v5  ;;  %v540_v15 = vld [vmem:[#allocation8 + $0x748] sm:$0xff] }
 0x1d5   :  { %2653 = vmatprep.subr.bf16.mxu0 %v4109_v12 }
 0x1d6   :  { %5110 = vst [vmem:[#allocation82_spill] sm:$0xff] %v4155_v39 }
 0x1d7   :  { %2449 = vmatmul.mubr.msk.f32.gmra.mrb[6].mxu0 %vm824_vm0, %v4117_v47 }
 0x1d8   :  { %2655 = vmatpush1.bf16.msra.mxu0 %v4120_v37  ;;  %v528_v37 = vld [vmem:[#allocation8 + $0x5c8] sm:$0xff] }
 0x1d9   :  { %2657 = vmatprep.subr.bf16.mxu0 %v4123_v31  ;;  %v501_v31 = vld [vmem:[#allocation8 + $0x280] sm:$0xff] }
 0x1dc   :  { %2659 = vmatpush1.bf16.msra.mxu0 %v4128_v30  ;;  %v503_v30 = vld [vmem:[#allocation8 + $0x2c0] sm:$0xff] }
 0x1dd   :  { %2661 = vmatprep.subr.bf16.mxu0 %v4131_v33  ;;  %v4146_v17 = vpack.c.bf16 %v503_v30, %v501_v31  ;;  %v505_v33 = vld [vmem:[#allocation8 + $0x300] sm:$0xff]  ;;  %v514_v31 = vld [vmem:[#allocation8 + $0x408] sm:$0xff] }
 0x1de   :  { %v516_v30 = vld [vmem:[#allocation8 + $0x448] sm:$0xff] }
 0x1df   :  { %5107 = vst [vmem:[#allocation79_spill] sm:$0xff] %v4146_v17  ;;  %v4161_v9 = vpack.c.bf16 %v516_v30, %v514_v31 }
 0x1e0   :  { %2663 = vmatpush1.bf16.msra.mxu0 %v4134_v59  ;;  %v507_v59 = vld [vmem:[#allocation8 + $0x340] sm:$0xff] }
 0x1e1   :  { %2665 = vmatprep.subr.bf16.mxu0 %v4137_v4  ;;  %v4152_v32 = vpack.c.bf16 %v507_v59, %v505_v33  ;;  %v509_v4 = vld [vmem:[#allocation8 + $0x380] sm:$0xff]  ;;  %5112 = vst [vmem:[#allocation84_spill] sm:$0xff] %v4161_v9  ;;  %v518_v33 = vld [vmem:[#allocation8 + $0x488] sm:$0xff] }
 0x1e2   :  { %v520_v59 = vld [vmem:[#allocation8 + $0x4c8] sm:$0xff] }
 0x1e3   :  { %5109 = vst [vmem:[#allocation81_spill] sm:$0xff] %v4152_v32  ;;  %v4167_v22 = vpack.c.bf16 %v520_v59, %v518_v33 }
 0x1e4   :  { %2667 = vmatpush1.bf16.msra.mxu0 %v4140_v55  ;;  %v511_v55 = vld [vmem:[#allocation8 + $0x3c0] sm:$0xff] }
 0x1e5   :  { %2669 = vmatprep.subr.bf16.mxu0 %v4143_v23  ;;  %v4158_v3 = vpack.c.bf16 %v511_v55, %v509_v4  ;;  %v513_v23 = vld [vmem:[#allocation8 + $0x400] sm:$0xff]  ;;  %5114 = vst [vmem:[#allocation86_spill] sm:$0xff] %v4167_v22  ;;  %v522_v4 = vld [vmem:[#allocation8 + $0x508] sm:$0xff] }
 0x1e6   :  { %v524_v55 = vld [vmem:[#allocation8 + $0x548] sm:$0xff] }
 0x1e7   :  { %5111 = vst [vmem:[#allocation83_spill] sm:$0xff] %v4158_v3  ;;  %v4173_v30 = vpack.c.bf16 %v524_v55, %v522_v4  ;;  %v532_v4 = vld [vmem:[#allocation8 + $0x648] sm:$0xff] }
 0x1e8   :  { %2671 = vmatpush1.bf16.msra.mxu0 %v4146_v17  ;;  %v515_v17 = vld [vmem:[#allocation8 + $0x440] sm:$0xff] }
 0x1e9   :  { %2673 = vmatprep.subr.bf16.mxu0 %v4149_v54  ;;  %v4164_v5 = vpack.c.bf16 %v515_v17, %v513_v23  ;;  %v517_v54 = vld [vmem:[#allocation8 + $0x480] sm:$0xff]  ;;  %5116 = vst [vmem:[#allocation88_spill] sm:$0xff] %v4173_v30  ;;  %v216_v23 = vlaneseq  ;;  %v526_v17 = vld [vmem:[#allocation8 + $0x588] sm:$0xff] }
 0x1ea   :  { %v4179_v59 = vpack.c.bf16 %v528_v37, %v526_v17  ;;  %v529_v37 = vld [vmem:[#allocation8 + $0x600] sm:$0xff]  ;;  %v534_v17 = vld [vmem:[#allocation8 + $0x688] sm:$0xff] }
 0x1eb   :  { %5113 = vst [vmem:[#allocation85_spill] sm:$0xff] %v4164_v5 }
 0x1ec   :  { %2675 = vmatpush1.bf16.msra.mxu0 %v4152_v32  ;;  %v519_v32 = vld [vmem:[#allocation8 + $0x4c0] sm:$0xff]  ;;  %5118 = vst [vmem:[#allocation90_spill] sm:$0xff] %v4179_v59 }
 0x1ed   :  { %2677 = vmatprep.subr.bf16.mxu0 %v4155_v39  ;;  %v4170_v31 = vpack.c.bf16 %v519_v32, %v517_v54  ;;  %v521_v39 = vld [vmem:[#allocation8 + $0x500] sm:$0xff]  ;;  %v4181_v32 = vshrl.u32 %v216_v23, 7  ;;  %v4194_v23 = vld [vmem:[%s4822_s5] sm:$0x3f] }
 0x1ee   :  { %v527_v54 = vld [vmem:[#allocation8 + $0x5c0] sm:$0xff] }
 0x1ef   :  { %5115 = vst [vmem:[#allocation87_spill] sm:$0xff] %v4170_v31  ;;  %v226_v55 = vsub.s32 2, %v4181_v32 }
 0x1f0   :  { %2679 = vmatpush1.bf16.msra.mxu0 %v4158_v3  ;;  %v523_v3 = vld [vmem:[#allocation8 + $0x540] sm:$0xff] }
 0x1f1   :  { %2681 = vmatprep.subr.bf16.mxu0 %v4161_v9  ;;  %v4176_v33 = vpack.c.bf16 %v523_v3, %v521_v39  ;;  %v531_v3 = vld [vmem:[#allocation8 + $0x640] sm:$0xff]  ;;  %v227_v12 = vrot.slane %v4194_v23, %v226_v55 }
 0x1f3   :  { %5117 = vst [vmem:[#allocation89_spill] sm:$0xff] %v4176_v33  ;;  %v4205_v46 = vadd.f32 %v4091_v21, %v227_v12  ;;  %v544_v21 = vld [vmem:[#allocation8 + $0x7c8] sm:$0xff] }
 0x1f4   :  { %2683 = vmatpush1.bf16.msra.mxu0 %v4164_v5  ;;  %v525_v5 = vld [vmem:[#allocation8 + $0x580] sm:$0xff] }
 0x1f5   :  { %2685 = vmatprep.subr.bf16.mxu0 %v4167_v22  ;;  %v530_v22 = vld [vmem:[#allocation8 + $0x608] sm:$0xff]  ;;  %v4185_v9 = vpack.c.bf16 %v527_v54, %v525_v5  ;;  %v4198_v5 = vpack.c.bf16 %v531_v3, %v529_v37  ;;  %5123 = vst [vmem:[#allocation95_spill] sm:$0xff] %v4205_v46 }
 0x1f6   :  { %v4189_v39 = vpack.c.bf16 %v532_v4, %v530_v22  ;;  %v533_v4 = vld [vmem:[#allocation8 + $0x680] sm:$0xff] }
 0x1f7   :  { %5119 = vst [vmem:[#allocation91_spill] sm:$0xff] %v4185_v9  ;;  %5121 = vst [vmem:[#allocation93_spill] sm:$0xff] %v4198_v5 }
 0x1f8   :  { %2687 = vmatpush1.bf16.msra.mxu0 %v4170_v31  ;;  %v230_v31 = vsub.s32 3, %v4181_v32  ;;  %5120 = vst [vmem:[#allocation92_spill] sm:$0xff] %v4189_v39 }
 0x1f9   :  { %2689 = vmatprep.subr.bf16.mxu0 %v4173_v30  ;;  %v536_v30 = vld [vmem:[#allocation8 + $0x6c8] sm:$0xff] }
 0x1fa   :  { %v231_v54 = vrot.slane %v4194_v23, %v230_v31  ;;  %v4202_v22 = vpack.c.bf16 %v536_v30, %v534_v17  ;;  %v537_v30 = vld [vmem:[#allocation8 + $0x700] sm:$0xff] }
 0x1fb   :  { %v539_v17 = vld [vmem:[#allocation8 + $0x740] sm:$0xff] }
 0x1fc   :  { %2691 = vmatpush1.bf16.msra.mxu0 %v4176_v33  ;;  %5122 = vst [vmem:[#allocation94_spill] sm:$0xff] %v4202_v22  ;;  %v538_v33 = vld [vmem:[#allocation8 + $0x708] sm:$0xff]  ;;  %v4211_v37 = vadd.f32 %v4093_v0, %v231_v54  ;;  %v4222_v0 = vpack.c.bf16 %v539_v17, %v537_v30 }
 0x1fd   :  { %2693 = vmatprep.subr.bf16.mxu0 %v4179_v59  ;;  %v535_v59 = vld [vmem:[#allocation8 + $0x6c0] sm:$0xff]  ;;  %v4214_v31 = vpack.c.bf16 %v540_v15, %v538_v33  ;;  %v4225_v15 = vadd.f32 %v4097_v6, %v231_v54 }
 0x1fe   :  { %v4208_v55 = vpack.c.bf16 %v535_v59, %v533_v4  ;;  %5125 = vst [vmem:[#allocation97_spill] sm:$0xff] %v4211_v37  ;;  %v4219_v59 = vadd.f32 %v4095_v52, %v227_v12  ;;  %5128 = vst [vmem:[#allocation100_spill] sm:$0xff] %v4222_v0 }
 0x1ff   :  { %5126 = vst [vmem:[#allocation98_spill] sm:$0xff] %v4214_v31  ;;  %5129 = vst [vmem:[#allocation101_spill] sm:$0xff] %v4225_v15 }
 0x200   :  { %2695 = vmatpush1.bf16.msra.mxu0 %v4185_v9  ;;  %5124 = vst [vmem:[#allocation96_spill] sm:$0xff] %v4208_v55  ;;  %5127 = vst [vmem:[#allocation99_spill] sm:$0xff] %v4219_v59 }
 0x201   :  { %2697 = vmatprep.subr.bf16.mxu0 %v4189_v39 }
 0x204   :  { %2699 = vmatpush1.bf16.msra.mxu0 %v4198_v5  ;;  %v543_v5 = vld [vmem:[#allocation8 + $0x7c0] sm:$0xff] }
 0x205   :  { %v1083_v3 = vpop.f32.mrb[12].mxu1  ;;  %2701 = vmatprep.subr.bf16.mxu0 %v4202_v22 }
 0x206   :  { %v1094_v39 = vadd.f32 %v1083_v3, %v4205_v46  ;;  %v1085_v9 = vpop.f32.mrb[13].mxu1  ;;  %v4228_v3 = vpack.c.bf16 %v544_v21, %v542_v26  ;;  %v541_v46 = vld [vmem:[#allocation8 + $0x780] sm:$0xff] }
 0x207   :  { %v1095_v25 = vadd.f32 %v1085_v9, %v4211_v37  ;;  %v4233_v6 = vpack.c.bf16 %v543_v5, %v541_v46  ;;  %v4237_v46 = vpop.f32.mrb[0].mxu0 }
 0x208   :  { %v2454_v4 = vmul.f32 -1.442695, %v1094_v39  ;;  %2703 = vmatpush1.bf16.msra.mxu0 %v4208_v55  ;;  %5130 = vst [vmem:[#allocation102_spill] sm:$0xff] %v4228_v3  ;;  %v4239_v5 = vpop.f32.mrb[1].mxu0 }
 0x209   :  { %v2455_v33 = vmul.f32 -1.442695, %v1095_v25  ;;  %v1089_v22 = vpop.f32.mrb[14].mxu1  ;;  %2705 = vmatprep.subr.bf16.mxu0 %v4214_v31  ;;  %5131 = vst [vmem:[#allocation103_spill] sm:$0xff] %v4233_v6 }
 0x20a   :  { %3388 = vpow2.f32 %v2454_v4  ;;  %v1096_v52 = vadd.f32 %v1089_v22, %v4219_v59  ;;  %v1091_v12 = vpop.f32.mrb[15].mxu1 }
 0x20b   :  { %3390 = vpow2.f32 %v2455_v33  ;;  %v1097_v9 = vadd.f32 %v1091_v12, %v4225_v15 }
 0x20c   :  { %v2456_v39 = vmul.f32 -1.442695, %v1096_v52  ;;  %2707 = vmatpush1.bf16.msra.mxu0 %v4222_v0  ;;  %v4241_v52 = vpop.f32.mrb[2].mxu0  ;;  %v612_v0 = vld [vmem:[#allocation8 + $0x68] sm:$0xff] }
 0x20d   :  { %v2457_v25 = vmul.f32 -1.442695, %v1097_v9  ;;  %2709 = vmatprep.subr.bf16.mxu0 %v4228_v3  ;;  %v4243_v12 = vpop.f32.mrb[3].mxu0  ;;  %v610_v3 = vld [vmem:[#allocation8 + $0x28] sm:$0xff] }
 0x20e   :  { %3392 = vpow2.f32 %v2456_v39  ;;  %v4253_v55 = vpack.c.bf16 %v612_v0, %v610_v3  ;;  %v614_v0 = vld [vmem:[#allocation8 + $0xa8] sm:$0xff] }
 0x20f   :  { %3394 = vpow2.f32 %v2457_v25  ;;  %v616_v3 = vld [vmem:[#allocation8 + $0xe8] sm:$0xff] }
 0x210   :  { %2711 = vmatpush1.bf16.msra.mxu0 %v4233_v6  ;;  %5132 = vst [vmem:[#allocation104_spill] sm:$0xff] %v4253_v55 }
 0x214   :  { %v3389_v26 = vpop.eup %3388 }
 0x215   :  { %v3391_v54 = vpop.eup %3390  ;;  %v1110_v30 = vadd.f32 1.0, %v3389_v26 }
 0x216   :  { %v1111_v22 = vadd.f32 1.0, %v3391_v54 }
 0x217   :  { %3396 = vrcp.f32 %v1110_v30 }
 0x218   :  { %v3393_v17 = vpop.eup %3392  ;;  %3398 = vrcp.f32 %v1111_v22  ;;  %v3508_v22 = vld [vmem:[#allocation2 + $0x8] sm:$0xff] }
 0x219   :  { %v3395_v21 = vpop.eup %3394  ;;  %v1112_v4 = vadd.f32 1.0, %v3393_v17 }
 0x21a   :  { %v1113_v33 = vadd.f32 1.0, %v3395_v21 }
 0x21b   :  { %3400 = vrcp.f32 %v1112_v4 }
 0x21c   :  { %3402 = vrcp.f32 %v1113_v33 }
 0x221   :  { %v3397_v9 = vpop.eup %3396 }
 0x222   :  { %v3399_v39 = vpop.eup %3398  ;;  %v1122_v54 = vmul.f32 %v3397_v9, %v3939_v41 }
 0x223   :  { %v1123_v17 = vmul.f32 %v3508_v22, %v3399_v39 }
 0x225   :  { %v3401_v25 = vpop.eup %3400 }
 0x226   :  { %v3403_v26 = vpop.eup %3402  ;;  %v1124_v30 = vmul.f32 %v3401_v25, %v3951_v61 }
 0x227   :  { %v1125_v21 = vmul.f32 %v3403_v26, %v3944_v45 }
 0x228   :  { %v2778_v4 = vpack.c.bf16 %v1124_v30, %v1122_v54  ;;  %v613_v54 = vld [vmem:[#allocation8 + $0xa0] sm:$0xff] }
 0x229   :  { %v2776_v33 = vpack.c.bf16 %v1125_v21, %v1123_v17  ;;  %v615_v30 = vld [vmem:[#allocation8 + $0xe0] sm:$0xff] }
 0x22a   :  { %v4275_v17 = vpack.c.bf16 %v615_v30, %v613_v54  ;;  %v626_v54 = vld [vmem:[#allocation8 + $0x228] sm:$0xff] }
 0x22b   :  { %2777 = vmatprep.subr.bf16.mxu0 %v2776_v33  ;;  %v619_v33 = vld [vmem:[#allocation8 + $0x160] sm:$0xff]  ;;  %v628_v30 = vld [vmem:[#allocation8 + $0x268] sm:$0xff] }
 0x22c   :  { %5135 = vst [vmem:[#allocation107_spill] sm:$0xff] %v4275_v17 }
 0x2a6   :  { %v897_v6 = vpop.f32.mrb[4].mxu0 }
 0x2a7   :  { %v899_v15 = vpop.f32.mrb[5].mxu0  ;;  %v4251_v31 = vsub.f32 %v897_v6, %v3939_v41  ;;  %v611_v41 = vld [vmem:[#allocation8 + $0x60] sm:$0xff] }
 0x2a8   :  { %v4248_v59 = vsub.f32 %v899_v15, %v3508_v22  ;;  %v609_v15 = vld [vmem:[#allocation8 + $0x20] sm:$0xff]  ;;  %v620_v22 = vld [vmem:[#allocation8 + $0x168] sm:$0xff] }
 0x2a9   :  { %v4267_v6 = vpack.c.bf16 %v611_v41, %v609_v15 }
 0x2aa   :  { %v903_v9 = vpop.f32.mrb[6].mxu0  ;;  %976 = vmatprep.mubr.f32.mxu0 %v4248_v59 }
 0x2ab   :  { %v905_v39 = vpop.f32.mrb[7].mxu0  ;;  %977 = vmatmul.mubr.f32.vlgmr.msra.gmra.mrb[8].mxu0 %v4251_v31  ;;  %v4261_v26 = vsub.f32 %v903_v9, %v3951_v61  ;;  %5133 = vst [vmem:[#allocation105_spill] sm:$0xff] %v4267_v6  ;;  %v618_v61 = vld [vmem:[#allocation8 + $0x128] sm:$0xff] }
 0x2ac   :  { %v4258_v25 = vsub.f32 %v905_v39, %v3944_v45  ;;  %2779 = vmatpush1.bf16.msra.mxu0 %v2778_v4  ;;  %v4269_v45 = vpack.c.bf16 %v616_v3, %v614_v0  ;;  %v4278_v21 = vpack.c.bf16 %v620_v22, %v618_v61  ;;  %v617_v4 = vld [vmem:[#allocation8 + $0x120] sm:$0xff]  ;;  %v622_v9 = vld [vmem:[#allocation8 + $0x1a8] sm:$0xff]  ;;  %v4292_v22 = vpack.c.bf16 %v628_v30, %v626_v54 }
 0x2ad   :  { %2781 = vmatprep.subr.bf16.mxu0 %v4253_v55  ;;  %v624_v39 = vld [vmem:[#allocation8 + $0x1e8] sm:$0xff]  ;;  %v4283_v15 = vpack.c.bf16 %v619_v33, %v617_v4  ;;  %v621_v0 = vld [vmem:[#allocation8 + $0x1a0] sm:$0xff] }
 0x2ae   :  { %982 = vmatprep.mubr.f32.mxu0 %v4258_v25  ;;  %5134 = vst [vmem:[#allocation106_spill] sm:$0xff] %v4269_v45  ;;  %5136 = vst [vmem:[#allocation108_spill] sm:$0xff] %v4278_v21  ;;  %v4286_v41 = vpack.c.bf16 %v624_v39, %v622_v9  ;;  %v623_v3 = vld [vmem:[#allocation8 + $0x1e0] sm:$0xff]  ;;  %v630_v4 = vld [vmem:[#allocation8 + $0x2a8] sm:$0xff] }
 0x2af   :  { %983 = vmatmul.mubr.f32.gmra.mrb[10].mxu0 %v4261_v26  ;;  %5137 = vst [vmem:[#allocation109_spill] sm:$0xff] %v4283_v15  ;;  %v4289_v61 = vpack.c.bf16 %v623_v3, %v621_v0  ;;  %5140 = vst [vmem:[#allocation112_spill] sm:$0xff] %v4292_v22  ;;  %v632_v33 = vld [vmem:[#allocation8 + $0x2e8] sm:$0xff] }
 0x2b0   :  { %1190 = vmatprep.mubr.f32.mxu0 %v5095_v53  ;;  %5138 = vst [vmem:[#allocation110_spill] sm:$0xff] %v4286_v41  ;;  %v4298_v39 = vpack.c.bf16 %v632_v33, %v630_v4  ;;  %v634_v0 = vld [vmem:[#allocation8 + $0x328] sm:$0xff] }
 0x2b1   :  { %5139 = vst [vmem:[#allocation111_spill] sm:$0xff] %v4289_v61  ;;  %v636_v3 = vld [vmem:[#allocation8 + $0x368] sm:$0xff] }
 0x2b2   :  { %5142 = vst [vmem:[#allocation114_spill] sm:$0xff] %v4298_v39  ;;  %v4304_v30 = vpack.c.bf16 %v636_v3, %v634_v0 }
 0x2b3   :  { %2458 = vmatmul.mubr.msk.f32.vlgmr.msra.gmra.mrb[12].mxu0 %vm824_vm0, %v4104_v27 }
 0x2b4   :  { %1196 = vmatprep.mubr.f32.mxu0 %v5095_v53  ;;  %2783 = vmatpush1.bf16.msra.mxu0 %v4267_v6  ;;  %5144 = vst [vmem:[#allocation116_spill] sm:$0xff] %v4304_v30 }
 0x2b5   :  { %2785 = vmatprep.subr.bf16.mxu0 %v4269_v45  ;;  %v625_v45 = vld [vmem:[#allocation8 + $0x220] sm:$0xff] }
 0x2b7   :  { %2459 = vmatmul.mubr.msk.f32.gmra.mrb[14].mxu0 %vm824_vm0, %v4117_v47 }
 0x2b8   :  { %2787 = vmatpush1.bf16.msra.mxu0 %v4275_v17  ;;  %v627_v17 = vld [vmem:[#allocation8 + $0x260] sm:$0xff] }
 0x2b9   :  { %2789 = vmatprep.subr.bf16.mxu0 %v4278_v21  ;;  %v4295_v9 = vpack.c.bf16 %v627_v17, %v625_v45  ;;  %v629_v21 = vld [vmem:[#allocation8 + $0x2a0] sm:$0xff]  ;;  %v638_v45 = vld [vmem:[#allocation8 + $0x3a8] sm:$0xff] }
 0x2ba   :  { %v640_v17 = vld [vmem:[#allocation8 + $0x3e8] sm:$0xff] }
 0x2bb   :  { %5141 = vst [vmem:[#allocation113_spill] sm:$0xff] %v4295_v9  ;;  %v4310_v33 = vpack.c.bf16 %v640_v17, %v638_v45 }
 0x2bc   :  { %2791 = vmatpush1.bf16.msra.mxu0 %v4283_v15  ;;  %v631_v15 = vld [vmem:[#allocation8 + $0x2e0] sm:$0xff] }
 0x2bd   :  { %2793 = vmatprep.subr.bf16.mxu0 %v4286_v41  ;;  %v4301_v54 = vpack.c.bf16 %v631_v15, %v629_v21  ;;  %v633_v41 = vld [vmem:[#allocation8 + $0x320] sm:$0xff]  ;;  %5146 = vst [vmem:[#allocation118_spill] sm:$0xff] %v4310_v33  ;;  %v642_v21 = vld [vmem:[#allocation8 + $0x428] sm:$0xff] }
 0x2be   :  { %v644_v15 = vld [vmem:[#allocation8 + $0x468] sm:$0xff] }
 0x2bf   :  { %5143 = vst [vmem:[#allocation115_spill] sm:$0xff] %v4301_v54  ;;  %v4316_v3 = vpack.c.bf16 %v644_v15, %v642_v21 }
 0x2c0   :  { %2795 = vmatpush1.bf16.msra.mxu0 %v4289_v61  ;;  %v635_v61 = vld [vmem:[#allocation8 + $0x360] sm:$0xff] }
 0x2c1   :  { %2797 = vmatprep.subr.bf16.mxu0 %v4292_v22  ;;  %v4307_v4 = vpack.c.bf16 %v635_v61, %v633_v41  ;;  %v637_v22 = vld [vmem:[#allocation8 + $0x3a0] sm:$0xff]  ;;  %5148 = vst [vmem:[#allocation120_spill] sm:$0xff] %v4316_v3  ;;  %v646_v41 = vld [vmem:[#allocation8 + $0x4a8] sm:$0xff] }
 0x2c2   :  { %v648_v61 = vld [vmem:[#allocation8 + $0x4e8] sm:$0xff] }
 0x2c3   :  { %5145 = vst [vmem:[#allocation117_spill] sm:$0xff] %v4307_v4  ;;  %v4322_v17 = vpack.c.bf16 %v648_v61, %v646_v41 }
 0x2c4   :  { %2799 = vmatpush1.bf16.msra.mxu0 %v4295_v9  ;;  %v639_v9 = vld [vmem:[#allocation8 + $0x3e0] sm:$0xff] }
 0x2c5   :  { %2801 = vmatprep.subr.bf16.mxu0 %v4298_v39  ;;  %v4313_v0 = vpack.c.bf16 %v639_v9, %v637_v22  ;;  %v641_v39 = vld [vmem:[#allocation8 + $0x420] sm:$0xff]  ;;  %5150 = vst [vmem:[#allocation122_spill] sm:$0xff] %v4322_v17  ;;  %v650_v22 = vld [vmem:[#allocation8 + $0x528] sm:$0xff] }
 0x2c6   :  { %v652_v9 = vld [vmem:[#allocation8 + $0x568] sm:$0xff] }
 0x2c7   :  { %5147 = vst [vmem:[#allocation119_spill] sm:$0xff] %v4313_v0  ;;  %v4328_v15 = vpack.c.bf16 %v652_v9, %v650_v22 }
 0x2c8   :  { %2803 = vmatpush1.bf16.msra.mxu0 %v4301_v54  ;;  %v643_v54 = vld [vmem:[#allocation8 + $0x460] sm:$0xff] }
 0x2c9   :  { %2805 = vmatprep.subr.bf16.mxu0 %v4304_v30  ;;  %v4319_v45 = vpack.c.bf16 %v643_v54, %v641_v39  ;;  %v645_v30 = vld [vmem:[#allocation8 + $0x4a0] sm:$0xff]  ;;  %5152 = vst [vmem:[#allocation124_spill] sm:$0xff] %v4328_v15  ;;  %v654_v39 = vld [vmem:[#allocation8 + $0x5a8] sm:$0xff] }
 0x2ca   :  { %v656_v54 = vld [vmem:[#allocation8 + $0x5e8] sm:$0xff] }
 0x2cb   :  { %5149 = vst [vmem:[#allocation121_spill] sm:$0xff] %v4319_v45  ;;  %v4334_v61 = vpack.c.bf16 %v656_v54, %v654_v39 }
 0x2cc   :  { %2807 = vmatpush1.bf16.msra.mxu0 %v4307_v4  ;;  %v647_v4 = vld [vmem:[#allocation8 + $0x4e0] sm:$0xff] }
 0x2cd   :  { %2809 = vmatprep.subr.bf16.mxu0 %v4310_v33  ;;  %v4325_v21 = vpack.c.bf16 %v647_v4, %v645_v30  ;;  %v649_v33 = vld [vmem:[#allocation8 + $0x520] sm:$0xff]  ;;  %5154 = vst [vmem:[#allocation126_spill] sm:$0xff] %v4334_v61  ;;  %v658_v30 = vld [vmem:[#allocation8 + $0x628] sm:$0xff] }
 0x2ce   :  { %v660_v4 = vld [vmem:[#allocation8 + $0x668] sm:$0xff] }
 0x2cf   :  { %5151 = vst [vmem:[#allocation123_spill] sm:$0xff] %v4325_v21  ;;  %v4340_v9 = vpack.c.bf16 %v660_v4, %v658_v30  ;;  %v666_v4 = vld [vmem:[#allocation8 + $0x728] sm:$0xff] }
 0x2d0   :  { %2811 = vmatpush1.bf16.msra.mxu0 %v4313_v0  ;;  %v651_v0 = vld [vmem:[#allocation8 + $0x560] sm:$0xff] }
 0x2d1   :  { %2813 = vmatprep.subr.bf16.mxu0 %v4316_v3  ;;  %v4331_v41 = vpack.c.bf16 %v651_v0, %v649_v33  ;;  %v653_v3 = vld [vmem:[#allocation8 + $0x5a0] sm:$0xff]  ;;  %5156 = vst [vmem:[#allocation128_spill] sm:$0xff] %v4340_v9  ;;  %v662_v33 = vld [vmem:[#allocation8 + $0x6a8] sm:$0xff] }
 0x2d2   :  { %v664_v0 = vld [vmem:[#allocation8 + $0x6e8] sm:$0xff] }
 0x2d3   :  { %5153 = vst [vmem:[#allocation125_spill] sm:$0xff] %v4331_v41  ;;  %v4346_v54 = vpack.c.bf16 %v664_v0, %v662_v33  ;;  %v670_v33 = vld [vmem:[#allocation8 + $0x7a8] sm:$0xff] }
 0x2d4   :  { %2815 = vmatpush1.bf16.msra.mxu0 %v4319_v45  ;;  %v655_v45 = vld [vmem:[#allocation8 + $0x5e0] sm:$0xff]  ;;  %v672_v0 = vld [vmem:[#allocation8 + $0x7e8] sm:$0xff] }
 0x2d5   :  { %2817 = vmatprep.subr.bf16.mxu0 %v4322_v17  ;;  %v4337_v22 = vpack.c.bf16 %v655_v45, %v653_v3  ;;  %v657_v17 = vld [vmem:[#allocation8 + $0x620] sm:$0xff]  ;;  %5158 = vst [vmem:[#allocation130_spill] sm:$0xff] %v4346_v54 }
 0x2d6   :  { %v661_v3 = vld [vmem:[#allocation8 + $0x6a0] sm:$0xff] }
 0x2d7   :  { %5155 = vst [vmem:[#allocation127_spill] sm:$0xff] %v4337_v22  ;;  %v663_v45 = vld [vmem:[#allocation8 + $0x6e0] sm:$0xff] }
 0x2d8   :  { %2819 = vmatpush1.bf16.msra.mxu0 %v4325_v21  ;;  %v659_v21 = vld [vmem:[#allocation8 + $0x660] sm:$0xff]  ;;  %v4350_v30 = vpack.c.bf16 %v663_v45, %v661_v3 }
 0x2d9   :  { %2821 = vmatprep.subr.bf16.mxu0 %v4328_v15  ;;  %v4343_v39 = vpack.c.bf16 %v659_v21, %v657_v17  ;;  %v665_v17 = vld [vmem:[#allocation8 + $0x720] sm:$0xff] }
 0x2da   :  { %5159 = vst [vmem:[#allocation131_spill] sm:$0xff] %v4350_v30  ;;  %v667_v21 = vld [vmem:[#allocation8 + $0x760] sm:$0xff] }
 0x2db   :  { %5157 = vst [vmem:[#allocation129_spill] sm:$0xff] %v4343_v39  ;;  %v669_v3 = vld [vmem:[#allocation8 + $0x7a0] sm:$0xff] }
 0x2dc   :  { %2823 = vmatpush1.bf16.msra.mxu0 %v4331_v41  ;;  %v671_v45 = vld [vmem:[#allocation8 + $0x7e0] sm:$0xff] }
 0x2dd   :  { %2825 = vmatprep.subr.bf16.mxu0 %v4334_v61  ;;  %v668_v61 = vld [vmem:[#allocation8 + $0x768] sm:$0xff] }
 0x2de   :  { %v4353_v41 = vpack.c.bf16 %v668_v61, %v666_v4 }
 0x2e0   :  { %2827 = vmatpush1.bf16.msra.mxu0 %v4337_v22  ;;  %5160 = vst [vmem:[#allocation132_spill] sm:$0xff] %v4353_v41  ;;  %v4355_v22 = vpack.c.bf16 %v667_v21, %v665_v17 }
 0x2e1   :  { %2829 = vmatprep.subr.bf16.mxu0 %v4340_v9 }
 0x2e2   :  { %5161 = vst [vmem:[#allocation133_spill] sm:$0xff] %v4355_v22 }
 0x2e4   :  { %2831 = vmatpush1.bf16.msra.mxu0 %v4343_v39  ;;  %v4361_v39 = vpack.c.bf16 %v671_v45, %v669_v3 }
 0x2e5   :  { %2833 = vmatprep.subr.bf16.mxu0 %v4346_v54  ;;  %v4359_v54 = vpack.c.bf16 %v672_v0, %v670_v33  ;;  %v218_v33 = vsub.s32 0, %v4181_v32  ;;  %v222_v0 = vsub.s32 1, %v4181_v32 }
 0x2e6   :  { %5163 = vst [vmem:[#allocation135_spill] sm:$0xff] %v4361_v39 }
 0x2e7   :  { %5162 = vst [vmem:[#allocation134_spill] sm:$0xff] %v4359_v54  ;;  %v219_v3 = vrot.slane %v4194_v23, %v218_v33  ;;  %v223_v45 = vrot.slane %v4194_v23, %v222_v0 }
 0x2e8   :  { %2835 = vmatpush1.bf16.msra.mxu0 %v4350_v30 }
 0x2e9   :  { %2837 = vmatprep.subr.bf16.mxu0 %v4353_v41 }
 0x2ec   :  { %2839 = vmatpush1.bf16.msra.mxu0 %v4355_v22 }
 0x2ed   :  { %2841 = vmatprep.subr.bf16.mxu0 %v4359_v54  ;;  %v4382_v54 = vadd.f32 %v4085_v62, %v223_v45 }
 0x2ef   :  { %5167 = vst [vmem:[#allocation139_spill] sm:$0xff] %v4382_v54 }
 0x2f0   :  { %2843 = vmatpush1.bf16.msra.mxu0 %v4361_v39  ;;  %v4371_v39 = vadd.f32 %v4077_v56, %v219_v3 }
 0x2f2   :  { %5164 = vst [vmem:[#allocation136_spill] sm:$0xff] %v4371_v39 }
 0x37e   :  { %v978_v61 = vpop.f32.mrb[8].mxu0 }
 0x37f   :  { %v980_v4 = vpop.f32.mrb[9].mxu0 }
 0x382   :  { %v984_v17 = vpop.f32.mrb[10].mxu0 }
 0x383   :  { %v986_v21 = vpop.f32.mrb[11].mxu0 }
 0x384   :  { %v992_v56 = vadd.f32 %v986_v21, %v4382_v54 }
 0x386   :  { %v1192_v30 = vpop.f32.mrb[12].mxu0 }
 0x387   :  { %v1194_v41 = vpop.f32.mrb[13].mxu0 }
 0x388   :  { %1267 = vmatprep.mubr.f32.mxu0 %v1194_v41  ;;  %v4374_v41 = vadd.f32 %v4079_v1, %v223_v45  ;;  %v2453_v1 = vmul.f32 -1.442695, %v992_v56 }
 0x389   :  { %1268 = vmatmul.mubr.f32.vlgmr.msra.gmra.mrb[16].mxu0 %v1192_v30  ;;  %v989_v30 = vadd.f32 %v978_v61, %v4371_v39 }
 0x38a   :  { %v1198_v22 = vpop.f32.mrb[14].mxu0  ;;  %5165 = vst [vmem:[#allocation137_spill] sm:$0xff] %v4374_v41 }
 0x38b   :  { %v1200_v9 = vpop.f32.mrb[15].mxu0  ;;  %v2450_v15 = vmul.f32 -1.442695, %v989_v30 }
 0x38c   :  { %1273 = vmatprep.mubr.f32.mxu0 %v1200_v9  ;;  %v4379_v9 = vadd.f32 %v4083_v11, %v219_v3  ;;  %v234_v11 = vsub.s32 4, %v4181_v32  ;;  %v238_v3 = vsub.s32 5, %v4181_v32 }
 0x38d   :  { %1274 = vmatmul.mubr.f32.gmra.mrb[18].mxu0 %v1198_v22  ;;  %v990_v22 = vadd.f32 %v980_v4, %v4374_v41  ;;  %3404 = vpow2.f32 %v2450_v15 }
 0x38e   :  { %1453 = vmatprep.mubr.f32.mxu0 %v5095_v53  ;;  %5166 = vst [vmem:[#allocation138_spill] sm:$0xff] %v4379_v9  ;;  %v991_v33 = vadd.f32 %v984_v17, %v4379_v9  ;;  %v235_v17 = vrot.slane %v4194_v23, %v234_v11  ;;  %v239_v21 = vrot.slane %v4194_v23, %v238_v3 }
 0x38f   :  { %v2451_v0 = vmul.f32 -1.442695, %v990_v22 }
 0x390   :  { %v2452_v6 = vmul.f32 -1.442695, %v991_v33  ;;  %v4394_v33 = vadd.f32 %v4239_v5, %v239_v21  ;;  %v4399_v23 = vadd.f32 %v4241_v52, %v235_v17 }
 0x391   :  { %3406 = vpow2.f32 %v2451_v0 }
 0x392   :  { %3408 = vpow2.f32 %v2452_v6  ;;  %v4391_v6 = vadd.f32 %v4237_v46, %v235_v17  ;;  %5169 = vst [vmem:[#allocation141_spill] sm:$0xff] %v4394_v33  ;;  %5170 = vst [vmem:[#allocation142_spill] sm:$0xff] %v4399_v23 }
 0x393   :  { %3410 = vpow2.f32 %v2453_v1 }
 0x394   :  { %5168 = vst [vmem:[#allocation140_spill] sm:$0xff] %v4391_v6 }
 0x397   :  { %v3405_v61 = vpop.eup %3404 }
 0x398   :  { %v1005_v62 = vadd.f32 1.0, %v3405_v61 }
 0x39a   :  { %3412 = vrcp.f32 %v1005_v62 }
 0x39b   :  { %v3407_v4 = vpop.eup %3406 }
 0x39c   :  { %v3409_v45 = vpop.eup %3408  ;;  %v1006_v30 = vadd.f32 1.0, %v3407_v4 }
 0x39d   :  { %v3411_v41 = vpop.eup %3410  ;;  %v1007_v15 = vadd.f32 1.0, %v3409_v45 }
 0x39e   :  { %3414 = vrcp.f32 %v1006_v30  ;;  %v1008_v22 = vadd.f32 1.0, %v3411_v41  ;;  %v4402_v41 = vadd.f32 %v4243_v12, %v239_v21 }
 0x39f   :  { %3416 = vrcp.f32 %v1007_v15 }
 0x3a0   :  { %3418 = vrcp.f32 %v1008_v22  ;;  %5171 = vst [vmem:[#allocation143_spill] sm:$0xff] %v4402_v41 }
 0x3a4   :  { %v3413_v11 = vpop.eup %3412 }
 0x3a5   :  { %v1288_v62 = vsub.f32 1.0, %v3413_v11 }
 0x3a7   :  { %v1292_v12 = vmul.f32 %v1288_v62, %v4251_v31 }
 0x3a8   :  { %v3415_v3 = vpop.eup %3414 }
 0x3a9   :  { %v3417_v45 = vpop.eup %3416  ;;  %v1289_v30 = vsub.f32 1.0, %v3415_v3 }
 0x3aa   :  { %v3419_v52 = vpop.eup %3418  ;;  %v1290_v21 = vsub.f32 1.0, %v3417_v45 }
 0x45c   :  { %v1269_v0 = vpop.f32.mrb[16].mxu0 }
 0x45d   :  { %v1280_v32 = vadd.f32 %v1269_v0, %v4391_v6  ;;  %v1271_v56 = vpop.f32.mrb[17].mxu0  ;;  %v1293_v0 = vmul.f32 %v1289_v30, %v4248_v59 }
 0x45e   :  { %v1281_v1 = vadd.f32 %v1271_v56, %v4394_v33  ;;  %v1291_v56 = vsub.f32 1.0, %v3419_v52 }
 0x45f   :  { %3420 = vtanh.f32 %v1280_v32 }
 0x460   :  { %3422 = vtanh.f32 %v1281_v1  ;;  %v1275_v46 = vpop.f32.mrb[18].mxu0  ;;  %v4408_v1 = vld [vmem:[#allocation7 + $0x8] sm:$0xff]  ;;  %v1295_v31 = vmul.f32 %v1291_v56, %v4258_v25  ;;  %v5172_v25 = vld [vmem:[#allocation38_spill] sm:$0xff]  ;;  %v5182_v56 = vld [vmem:[#allocation49_spill] sm:$0xff] }
 0x461   :  { %v1282_v5 = vadd.f32 %v1275_v46, %v4399_v23  ;;  %v1277_v61 = vpop.f32.mrb[19].mxu0  ;;  %v1294_v23 = vmul.f32 %v1290_v21, %v4261_v26  ;;  %v5179_v21 = vld [vmem:[#allocation45_spill] sm:$0xff] }
 0x462   :  { %v1283_v4 = vadd.f32 %v1277_v61, %v4402_v41 }
 0x463   :  { %3424 = vtanh.f32 %v1282_v5 }
 0x464   :  { %3426 = vtanh.f32 %v1283_v4  ;;  %v4410_v4 = vld [vmem:[#allocation7] sm:$0xff] }
 0x469   :  { %v3421_v17 = vpop.eup %3420 }
 0x46a   :  { %v3423_v15 = vpop.eup %3422  ;;  %v1296_v22 = vmul.f32 %v3421_v17, %v3413_v11 }
 0x46b   :  { %v1297_v32 = vmul.f32 %v3423_v15, %v3415_v3  ;;  %v4420_v3 = vld [vmem:[#allocation7 + $0x18] sm:$0xff]  ;;  %v4423_v15 = vld [vmem:[#allocation7 + $0x10] sm:$0xff] }
 0x46c   :  { %v1300_v46 = vadd.f32 %v1296_v22, %v1292_v12  ;;  %v5177_v22 = vld [vmem:[#allocation43_spill] sm:$0xff]  ;;  %v5178_v12 = vld [vmem:[#allocation44_spill] sm:$0xff] }
 0x46d   :  { %v3425_v5 = vpop.eup %3424  ;;  %v1301_v61 = vadd.f32 %v1297_v32, %v1293_v0  ;;  %v5180_v0 = vld [vmem:[#allocation46_spill] sm:$0xff]  ;;  %v5181_v32 = vld [vmem:[#allocation47_spill] sm:$0xff] }
 0x46e   :  { %v3427_v41 = vpop.eup %3426  ;;  %v1298_v33 = vmul.f32 %v3425_v5, %v3417_v45  ;;  %v4418_v59 = vmul.f32 %v1300_v46, %v4410_v4  ;;  %v5175_v45 = vld [vmem:[#allocation41_spill] sm:$0xff]  ;;  %v5183_v46 = vld [vmem:[#allocation50_spill] sm:$0xff]  ;;  %v5184_v5 = vld [vmem:[#allocation51_spill] sm:$0xff] }
 0x46f   :  { %v4414_v11 = vmul.f32 %v1301_v61, %v4408_v1  ;;  %v1299_v62 = vmul.f32 %v3427_v41, %v3419_v52  ;;  %v5176_v52 = vld [vmem:[#allocation42_spill] sm:$0xff]  ;;  %v5185_v61 = vld [vmem:[#allocation52_spill] sm:$0xff] }
 0x470   :  { %v1302_v30 = vadd.f32 %v1298_v33, %v1294_v23  ;;  %v5173_v33 = vld [vmem:[#allocation39_spill] sm:$0xff]  ;;  %v5174_v23 = vld [vmem:[#allocation40_spill] sm:$0xff] }
 0x471   :  { %1372 = vmatprep.mubr.f32.mxu1 %v4414_v11  ;;  %v1303_v17 = vadd.f32 %v1299_v62, %v1295_v31  ;;  %v5186_v31 = vld [vmem:[#allocation53_spill] sm:$0xff]  ;;  %v5187_v62 = vld [vmem:[#allocation54_spill] sm:$0xff] }
 0x472   :  { %1373 = vmatmul.mubr.f32.vlgmr.msra.gmra.mrb[16].mxu1 %v4418_v59  ;;  %v4432_v41 = vmul.f32 %v1302_v30, %v4423_v15  ;;  %v5188_v30 = vld [vmem:[#allocation56_spill] sm:$0xff] }
 0x473   :  { %2979 = vmatpush1.bf16.msra.mxu1 %v3941_v42  ;;  %v4428_v26 = vmul.f32 %v1303_v17, %v4420_v3  ;;  %v5204_v17 = vld [vmem:[#allocation34_spill] sm:$0xff] }
 0x474   :  { %2981 = vmatprep.subr.bf16.mxu1 %v5172_v25 }
 0x475   :  { %1378 = vmatprep.mubr.f32.mxu1 %v4428_v26 }
 0x476   :  { %1379 = vmatmul.mubr.f32.gmra.mrb[18].mxu1 %v4432_v41 }
 0x477   :  { %2983 = vmatpush1.bf16.msra.mxu1 %v5173_v33  ;;  %1639 = vmatprep.mubr.f32.mxu1 %v4414_v11  ;;  %v5239_v33 = vld [vmem:[#allocation100_spill] sm:$0xff] }
 0x478   :  { %2985 = vmatprep.subr.bf16.mxu1 %v5174_v23 }
 0x47b   :  { %2987 = vmatpush1.bf16.msra.mxu1 %v5175_v45 }
 0x47c   :  { %2989 = vmatprep.subr.bf16.mxu1 %v5176_v52  ;;  %v5238_v52 = vld [vmem:[#allocation101_spill] sm:$0xff] }
 0x47f   :  { %2991 = vmatpush1.bf16.msra.mxu1 %v5177_v22 }
 0x480   :  { %2993 = vmatprep.subr.bf16.mxu1 %v5178_v12 }
 0x483   :  { %2995 = vmatpush1.bf16.msra.mxu1 %v5179_v21  ;;  %v5237_v21 = vld [vmem:[#allocation99_spill] sm:$0xff] }
 0x484   :  { %2997 = vmatprep.subr.bf16.mxu1 %v5180_v0  ;;  %v5236_v0 = vld [vmem:[#allocation98_spill] sm:$0xff] }
 0x487   :  { %2999 = vmatpush1.bf16.msra.mxu1 %v5181_v32 }
 0x488   :  { %3001 = vmatprep.subr.bf16.mxu1 %v3982_v10 }
 0x48b   :  { %3003 = vmatpush1.bf16.msra.mxu1 %v5182_v56  ;;  %v5235_v56 = vld [vmem:[#allocation96_spill] sm:$0xff] }
 0x48c   :  { %3005 = vmatprep.subr.bf16.mxu1 %v5183_v46 }
 0x48f   :  { %3007 = vmatpush1.bf16.msra.mxu1 %v5184_v5 }
 0x490   :  { %3009 = vmatprep.subr.bf16.mxu1 %v5185_v61 }
 0x493   :  { %3011 = vmatpush1.bf16.msra.mxu1 %v5186_v31 }
 0x494   :  { %3013 = vmatprep.subr.bf16.mxu1 %v5187_v62  ;;  %v5234_v62 = vld [vmem:[#allocation95_spill] sm:$0xff] }
 0x497   :  { %3015 = vmatpush1.bf16.msra.mxu1 %v4003_v48  ;;  %v5233_v48 = vld [vmem:[#allocation94_spill] sm:$0xff] }
 0x498   :  { %3017 = vmatprep.subr.bf16.mxu1 %v5188_v30 }
 0x49b   :  { %3019 = vmatpush1.bf16.msra.mxu1 %v4009_v35  ;;  %v5232_v35 = vld [vmem:[#allocation93_spill] sm:$0xff] }
 0x49c   :  { %3021 = vmatprep.subr.bf16.mxu1 %v4012_v28  ;;  %v5231_v28 = vld [vmem:[#allocation92_spill] sm:$0xff] }
 0x49f   :  { %3023 = vmatpush1.bf16.msra.mxu1 %v4015_v18  ;;  %v5230_v18 = vld [vmem:[#allocation91_spill] sm:$0xff] }
 0x4a0   :  { %3025 = vmatprep.subr.bf16.mxu1 %v4018_v24  ;;  %v5229_v24 = vld [vmem:[#allocation90_spill] sm:$0xff] }
 0x4a3   :  { %3027 = vmatpush1.bf16.msra.mxu1 %v4021_v40  ;;  %v5228_v40 = vld [vmem:[#allocation89_spill] sm:$0xff] }
 0x4a4   :  { %3029 = vmatprep.subr.bf16.mxu1 %v4024_v34  ;;  %v5227_v34 = vld [vmem:[#allocation88_spill] sm:$0xff] }
 0x4a7   :  { %3031 = vmatpush1.bf16.msra.mxu1 %v4027_v16  ;;  %v5226_v16 = vld [vmem:[#allocation87_spill] sm:$0xff] }
 0x4a8   :  { %3033 = vmatprep.subr.bf16.mxu1 %v4030_v36  ;;  %v5225_v36 = vld [vmem:[#allocation86_spill] sm:$0xff] }
 0x4ab   :  { %3035 = vmatpush1.bf16.msra.mxu1 %v4033_v51  ;;  %v5224_v51 = vld [vmem:[#allocation85_spill] sm:$0xff] }
 0x4ac   :  { %3037 = vmatprep.subr.bf16.mxu1 %v4036_v29  ;;  %v5223_v29 = vld [vmem:[#allocation84_spill] sm:$0xff] }
 0x4af   :  { %3039 = vmatpush1.bf16.msra.mxu1 %v4039_v60  ;;  %v5222_v60 = vld [vmem:[#allocation83_spill] sm:$0xff] }
 0x4b0   :  { %3109 = vmatprep.subr.bf16.mxu1 %v3835_v38  ;;  %v5189_v38 = vld [vmem:[#allocation19_spill] sm:$0xff] }
 0x4b2   :  { %1640 = vmatmul.mubr.f32.vlgmr.msra.gmra.mrb[20].mxu1 %v4418_v59 }
 0x4b3   :  { %1645 = vmatprep.mubr.f32.mxu1 %v4428_v26  ;;  %3111 = vmatpush1.bf16.msra.mxu1 %v3837_v43  ;;  %v5190_v43 = vld [vmem:[#allocation20_spill] sm:$0xff] }
 0x4b4   :  { %3113 = vmatprep.subr.bf16.mxu1 %v3840_v44  ;;  %v5191_v44 = vld [vmem:[#allocation21_spill] sm:$0xff] }
 0x4b6   :  { %1646 = vmatmul.mubr.f32.gmra.mrb[22].mxu1 %v4432_v41 }
 0x4b7   :  { %3115 = vmatpush1.bf16.msra.mxu1 %v3844_v49  ;;  %v5192_v49 = vld [vmem:[#allocation22_spill] sm:$0xff] }
 0x4b8   :  { %3117 = vmatprep.subr.bf16.mxu1 %v3848_v50  ;;  %v5193_v50 = vld [vmem:[#allocation23_spill] sm:$0xff] }
 0x4bb   :  { %3119 = vmatpush1.bf16.msra.mxu1 %v3854_v57  ;;  %v5194_v57 = vld [vmem:[#allocation24_spill] sm:$0xff] }
 0x4bc   :  { %3121 = vmatprep.subr.bf16.mxu1 %v3858_v58  ;;  %v5195_v58 = vld [vmem:[#allocation25_spill] sm:$0xff] }
 0x4bf   :  { %3123 = vmatpush1.bf16.msra.mxu1 %v3861_v63  ;;  %v5196_v63 = vld [vmem:[#allocation26_spill] sm:$0xff] }
 0x4c0   :  { %3125 = vmatprep.subr.bf16.mxu1 %v3864_v2  ;;  %v5197_v2 = vld [vmem:[#allocation27_spill] sm:$0xff] }
 0x4c3   :  { %3127 = vmatpush1.bf16.msra.mxu1 %v3867_v7  ;;  %v5198_v7 = vld [vmem:[#allocation28_spill] sm:$0xff] }
 0x4c4   :  { %3129 = vmatprep.subr.bf16.mxu1 %v3870_v8  ;;  %v5199_v8 = vld [vmem:[#allocation29_spill] sm:$0xff] }
 0x4c7   :  { %3131 = vmatpush1.bf16.msra.mxu1 %v3873_v13  ;;  %v5200_v13 = vld [vmem:[#allocation30_spill] sm:$0xff] }
 0x4c8   :  { %3133 = vmatprep.subr.bf16.mxu1 %v3876_v14  ;;  %v5201_v14 = vld [vmem:[#allocation31_spill] sm:$0xff] }
 0x4cb   :  { %3135 = vmatpush1.bf16.msra.mxu1 %v3879_v19  ;;  %v5202_v19 = vld [vmem:[#allocation32_spill] sm:$0xff] }
 0x4cc   :  { %3137 = vmatprep.subr.bf16.mxu1 %v3882_v20  ;;  %v5203_v20 = vld [vmem:[#allocation33_spill] sm:$0xff] }
 0x4cf   :  { %3139 = vmatpush1.bf16.msra.mxu1 %v5189_v38  ;;  %v5205_v38 = vld [vmem:[#allocation35_spill] sm:$0xff] }
 0x4d0   :  { %3141 = vmatprep.subr.bf16.mxu1 %v5190_v43  ;;  %v5206_v43 = vld [vmem:[#allocation68_spill] sm:$0xff] }
 0x4d3   :  { %3143 = vmatpush1.bf16.msra.mxu1 %v5191_v44 }
 0x4d4   :  { %3145 = vmatprep.subr.bf16.mxu1 %v5192_v49 }
 0x4d7   :  { %3147 = vmatpush1.bf16.msra.mxu1 %v5193_v50 }
 0x4d8   :  { %3149 = vmatprep.subr.bf16.mxu1 %v5194_v57  ;;  %v4502_v57 = vld [vmem:[#allocation11] sm:$0xff] }
 0x4db   :  { %3151 = vmatpush1.bf16.msra.mxu1 %v5195_v58 }
 0x4dc   :  { %3153 = vmatprep.subr.bf16.mxu1 %v5196_v63  ;;  %v4505_v63 = vld [vmem:[#allocation11 + $0x10] sm:$0xff] }
 0x4df   :  { %3155 = vmatpush1.bf16.msra.mxu1 %v5197_v2 }
 0x4e0   :  { %3157 = vmatprep.subr.bf16.mxu1 %v5198_v7 }
 0x4e3   :  { %3159 = vmatpush1.bf16.msra.mxu1 %v5199_v8  ;;  %v4508_v8 = vld [vmem:[#allocation11 + $0x8] sm:$0xff] }
 0x4e4   :  { %3161 = vmatprep.subr.bf16.mxu1 %v5200_v13 }
 0x4e7   :  { %3163 = vmatpush1.bf16.msra.mxu1 %v5201_v14  ;;  %v4511_v14 = vld [vmem:[#allocation11 + $0x18] sm:$0xff] }
 0x4e8   :  { %3165 = vmatprep.subr.bf16.mxu1 %v5202_v19  ;;  %5207 = vst [vmem:[#allocation19_spill] sm:$0xff] %v4511_v14 }
 0x4eb   :  { %3167 = vmatpush1.bf16.msra.mxu1 %v5203_v20 }
 0x4ec   :  { %3169 = vmatprep.subr.bf16.mxu1 %v5204_v17 }
 0x4ef   :  { %3171 = vmatpush1.bf16.msra.mxu1 %v5205_v38  ;;  %v5208_v38 = vld [vmem:[#allocation69_spill] sm:$0xff] }
 0x4f0   :  { %3177 = vmatprep.subr.bf16.mxu1 %v5206_v43 }
 0x545   :  { %v1374_v44 = vpop.f32.mrb[16].mxu1 }
 0x546   :  { %v1376_v49 = vpop.f32.mrb[17].mxu1  ;;  %v1385_v58 = vmul.f32 %v4502_v57, %v1374_v44  ;;  %v5209_v44 = vld [vmem:[#allocation70_spill] sm:$0xff] }
 0x547   :  { %v1386_v13 = vmul.f32 %v4508_v8, %v1376_v49  ;;  %v5210_v49 = vld [vmem:[#allocation71_spill] sm:$0xff] }
 0x549   :  { %v1380_v50 = vpop.f32.mrb[18].mxu1 }
 0x54a   :  { %v1387_v2 = vmul.f32 %v4505_v63, %v1380_v50  ;;  %v1382_v7 = vpop.f32.mrb[19].mxu1  ;;  %v5211_v50 = vld [vmem:[#allocation72_spill] sm:$0xff] }
 0x54b   :  { %v1388_v19 = vmul.f32 %v4511_v14, %v1382_v7  ;;  %v5216_v7 = vld [vmem:[#allocation77_spill] sm:$0xff] }
 0x54c   :  { %v2910_v20 = vpack.c.bf16 %v1387_v2, %v1385_v58  ;;  %v5212_v58 = vld [vmem:[#allocation73_spill] sm:$0xff]  ;;  %v5213_v2 = vld [vmem:[#allocation74_spill] sm:$0xff] }
 0x54d   :  { %v2908_v17 = vpack.c.bf16 %v1388_v19, %v1386_v13  ;;  %v5217_v13 = vld [vmem:[#allocation78_spill] sm:$0xff]  ;;  %v5218_v19 = vld [vmem:[#allocation79_spill] sm:$0xff] }
 0x54f   :  { %2909 = vmatprep.subr.bf16.mxu0 %v2908_v17  ;;  %v5221_v17 = vld [vmem:[#allocation82_spill] sm:$0xff] }
 0x550   :  { %2911 = vmatpush1.bf16.msra.mxu0 %v2910_v20  ;;  %v5219_v20 = vld [vmem:[#allocation80_spill] sm:$0xff] }
 0x551   :  { %2913 = vmatprep.subr.bf16.mxu0 %v5206_v43  ;;  %v5214_v43 = vld [vmem:[#allocation75_spill] sm:$0xff] }
 0x553   :  { %2460 = vmatmul.mubr.msk.f32.vlgmr.msra.gmra.mrb[20].mxu0 %vm824_vm0, %v4104_v27  ;;  %v5215_v27 = vld [vmem:[#allocation76_spill] sm:$0xff] }
 0x554   :  { %1459 = vmatprep.mubr.f32.mxu0 %v5095_v53  ;;  %2915 = vmatpush1.bf16.msra.mxu0 %v5208_v38 }
 0x555   :  { %2917 = vmatprep.subr.bf16.mxu0 %v5209_v44 }
 0x557   :  { %2461 = vmatmul.mubr.msk.f32.gmra.mrb[22].mxu0 %vm824_vm0, %v4117_v47  ;;  %v5220_v47 = vld [vmem:[#allocation81_spill] sm:$0xff] }
 0x558   :  { %2919 = vmatpush1.bf16.msra.mxu0 %v5210_v49 }
 0x559   :  { %2921 = vmatprep.subr.bf16.mxu0 %v5211_v50 }
 0x55c   :  { %2923 = vmatpush1.bf16.msra.mxu0 %v5212_v58 }
 0x55d   :  { %2925 = vmatprep.subr.bf16.mxu0 %v5213_v2 }
 0x560   :  { %2927 = vmatpush1.bf16.msra.mxu0 %v5214_v43 }
 0x561   :  { %2929 = vmatprep.subr.bf16.mxu0 %v5215_v27 }
 0x564   :  { %2931 = vmatpush1.bf16.msra.mxu0 %v5216_v7 }
 0x565   :  { %2933 = vmatprep.subr.bf16.mxu0 %v5217_v13 }
 0x568   :  { %2935 = vmatpush1.bf16.msra.mxu0 %v5218_v19 }
 0x569   :  { %2937 = vmatprep.subr.bf16.mxu0 %v5219_v20 }
 0x56c   :  { %2939 = vmatpush1.bf16.msra.mxu0 %v5220_v47 }
 0x56d   :  { %2941 = vmatprep.subr.bf16.mxu0 %v5221_v17 }
 0x570   :  { %2943 = vmatpush1.bf16.msra.mxu0 %v5222_v60 }
 0x571   :  { %2945 = vmatprep.subr.bf16.mxu0 %v5223_v29 }
 0x574   :  { %2947 = vmatpush1.bf16.msra.mxu0 %v5224_v51 }
 0x575   :  { %2949 = vmatprep.subr.bf16.mxu0 %v5225_v36 }
 0x578   :  { %2951 = vmatpush1.bf16.msra.mxu0 %v5226_v16 }
 0x579   :  { %2953 = vmatprep.subr.bf16.mxu0 %v5227_v34 }
 0x57c   :  { %2955 = vmatpush1.bf16.msra.mxu0 %v5228_v40 }
 0x57d   :  { %2957 = vmatprep.subr.bf16.mxu0 %v5229_v24 }
 0x580   :  { %2959 = vmatpush1.bf16.msra.mxu0 %v5230_v18 }
 0x581   :  { %2961 = vmatprep.subr.bf16.mxu0 %v5231_v28 }
 0x584   :  { %2963 = vmatpush1.bf16.msra.mxu0 %v5232_v35 }
 0x585   :  { %v1641_v30 = vpop.f32.mrb[20].mxu1  ;;  %2965 = vmatprep.subr.bf16.mxu0 %v5233_v48 }
 0x586   :  { %v1652_v31 = vadd.f32 %v1641_v30, %v5234_v62  ;;  %v1643_v61 = vpop.f32.mrb[21].mxu1  ;;  %v5240_v62 = vld [vmem:[#allocation102_spill] sm:$0xff] }
 0x587   :  { %v1653_v5 = vadd.f32 %v1643_v61, %v4211_v37  ;;  %v5241_v61 = vld [vmem:[#allocation103_spill] sm:$0xff] }
 0x588   :  { %v2466_v46 = vmul.f32 -1.442695, %v1652_v31  ;;  %2967 = vmatpush1.bf16.msra.mxu0 %v5235_v56 }
 0x589   :  { %v2467_v10 = vmul.f32 -1.442695, %v1653_v5  ;;  %v1647_v32 = vpop.f32.mrb[22].mxu1  ;;  %2969 = vmatprep.subr.bf16.mxu0 %v5236_v0 }
 0x58a   :  { %3428 = vpow2.f32 %v2466_v46  ;;  %v1654_v12 = vadd.f32 %v1647_v32, %v5237_v21  ;;  %v1649_v22 = vpop.f32.mrb[23].mxu1 }
 0x58b   :  { %3430 = vpow2.f32 %v2467_v10  ;;  %v1655_v45 = vadd.f32 %v1649_v22, %v5238_v52 }
 0x58c   :  { %v2468_v23 = vmul.f32 -1.442695, %v1654_v12  ;;  %2971 = vmatpush1.bf16.msra.mxu0 %v5239_v33 }
 0x58d   :  { %v2469_v30 = vmul.f32 -1.442695, %v1655_v45  ;;  %2973 = vmatprep.subr.bf16.mxu0 %v5240_v62 }
 0x58e   :  { %3432 = vpow2.f32 %v2468_v23 }
 0x58f   :  { %3434 = vpow2.f32 %v2469_v30 }
 0x590   :  { %2975 = vmatpush1.bf16.msra.mxu0 %v5241_v61 }
 0x594   :  { %v3429_v5 = vpop.eup %3428 }
 0x595   :  { %v3431_v31 = vpop.eup %3430  ;;  %v1668_v37 = vadd.f32 1.0, %v3429_v5 }
 0x596   :  { %v1669_v46 = vadd.f32 1.0, %v3431_v31 }
 0x597   :  { %3436 = vrcp.f32 %v1668_v37 }
 0x598   :  { %v3433_v25 = vpop.eup %3432  ;;  %3438 = vrcp.f32 %v1669_v46 }
 0x599   :  { %v3435_v32 = vpop.eup %3434  ;;  %v1670_v10 = vadd.f32 1.0, %v3433_v25 }
 0x59a   :  { %v1671_v22 = vadd.f32 1.0, %v3435_v32 }
 0x59b   :  { %3440 = vrcp.f32 %v1670_v10 }
 0x59c   :  { %3442 = vrcp.f32 %v1671_v22 }
 0x5a1   :  { %v3437_v12 = vpop.eup %3436 }
 0x5a2   :  { %v3439_v45 = vpop.eup %3438  ;;  %v1680_v23 = vmul.f32 %v3437_v12, %v4418_v59  ;;  %v5248_v12 = vld [vmem:[#allocation109_spill] sm:$0xff] }
 0x5a3   :  { %v1681_v42 = vmul.f32 %v3439_v45, %v4414_v11  ;;  %v5249_v45 = vld [vmem:[#allocation110_spill] sm:$0xff] }
 0x5a5   :  { %v3441_v52 = vpop.eup %3440 }
 0x5a6   :  { %v3443_v21 = vpop.eup %3442  ;;  %v1682_v30 = vmul.f32 %v3441_v52, %v4432_v41 }
 0x5a7   :  { %v1683_v5 = vmul.f32 %v3443_v21, %v4428_v26  ;;  %v5246_v21 = vld [vmem:[#allocation107_spill] sm:$0xff] }
 0x5a8   :  { %v3042_v31 = vpack.c.bf16 %v1682_v30, %v1680_v23  ;;  %v5250_v23 = vld [vmem:[#allocation111_spill] sm:$0xff]  ;;  %v5251_v30 = vld [vmem:[#allocation112_spill] sm:$0xff] }
 0x5a9   :  { %v3040_v14 = vpack.c.bf16 %v1683_v5, %v1681_v42  ;;  %v5252_v5 = vld [vmem:[#allocation113_spill] sm:$0xff] }
 0x5ab   :  { %3041 = vmatprep.subr.bf16.mxu0 %v3040_v14  ;;  %v5247_v14 = vld [vmem:[#allocation108_spill] sm:$0xff] }
 0x626   :  { %v1455_v37 = vpop.f32.mrb[20].mxu0 }
 0x627   :  { %v1457_v25 = vpop.f32.mrb[21].mxu0  ;;  %v4563_v32 = vsub.f32 %v1455_v37, %v4418_v59  ;;  %v5243_v59 = vld [vmem:[#allocation105_spill] sm:$0xff]  ;;  %v5254_v37 = vld [vmem:[#allocation115_spill] sm:$0xff] }
 0x628   :  { %v4560_v46 = vsub.f32 %v1457_v25, %v4414_v11  ;;  %v4580_v11 = vld [vmem:[%s4824_s7] sm:$0xff]  ;;  %v5255_v25 = vld [vmem:[#allocation116_spill] sm:$0xff] }
 0x629   :  { %5242 = vst [vmem:[#allocation20_spill] sm:$0xff] %v4580_v11 }
 0x62a   :  { %v1461_v10 = vpop.f32.mrb[22].mxu0  ;;  %1534 = vmatprep.mubr.f32.mxu0 %v4560_v46 }
 0x62b   :  { %v1463_v22 = vpop.f32.mrb[23].mxu0  ;;  %1535 = vmatmul.mubr.f32.vlgmr.msra.gmra.mrb[24].mxu0 %v4563_v32  ;;  %v4571_v42 = vsub.f32 %v1461_v10, %v4432_v41  ;;  %v4590_v41 = vld [vmem:[%s4824_s7 + $0x8] sm:$0xff]  ;;  %v5256_v10 = vld [vmem:[#allocation117_spill] sm:$0xff]  ;;  %s3698_s7 = smov [#allocation13]  }
 0x62c   :  { %v4568_v52 = vsub.f32 %v1463_v22, %v4428_v26  ;;  %3043 = vmatpush1.bf16.msra.mxu0 %v3042_v31  ;;  %v5244_v26 = vld [vmem:[#allocation106_spill] sm:$0xff]  ;;  %5245 = vst [vmem:[#allocation21_spill] sm:$0xff] %v4590_v41  ;;  %s2433_s21 = sshll.u32 %s3698_s7, 4  ;;  %s2434_s21 = int_to_ptr.vmem [resolvable:$true] %s2433_s21 }
 0x62d   :  { %3045 = vmatprep.subr.bf16.mxu0 %v4253_v55  ;;  %v5253_v31 = vld [vmem:[#allocation114_spill] sm:$0xff]  ;;  %s3651_s2 = scalar_lea.vmem %s2434_s21, 512  ;;  %p3656_p7 = scmp.lt.s32.totalorder %s2434_s21, %s2434_s21 }
 0x62e   :  { %1540 = vmatprep.mubr.f32.mxu0 %v4568_v52  ;;  %v5257_v22 = vld [vmem:[#allocation118_spill] sm:$0xff]  ;;  %p3652_p6 = scmp.ne.s32.totalorder %s2434_s21, %s3651_s2  ;;  %p3657_p8 = scmp.lt.s32.totalorder %s3651_s2, %s3651_s2 }
 0x62f   :  { %1541 = vmatmul.mubr.f32.gmra.mrb[26].mxu0 %v4571_v42 }
 0x630   :  { %1748 = vmatprep.mubr.f32.mxu0 %v5095_v53  ;;  %p3658_p9 = por %p3657_p8, %p3656_p7 }
 0x632   :  { %p3659_p10 = pnand %p3658_p9, %p3652_p6 }
 0x633   :  { %2470 = vmatmul.mubr.msk.f32.vlgmr.msra.gmra.mrb[28].mxu0 %vm824_vm0, %v4580_v11 }
 0x634   :  { %1754 = vmatprep.mubr.f32.mxu0 %v5095_v53  ;;  %3047 = vmatpush1.bf16.msra.mxu0 %v5243_v59 }
 0x635   :  { %3049 = vmatprep.subr.bf16.mxu0 %v5244_v26 }
 0x637   :  { %2471 = vmatmul.mubr.msk.f32.gmra.mrb[30].mxu0 %vm824_vm0, %v4590_v41 }
 0x638   :  { %3051 = vmatpush1.bf16.msra.mxu0 %v5246_v21 }
 0x639   :  { %3053 = vmatprep.subr.bf16.mxu0 %v5247_v14  ;;  %v5258_v14 = vld [vmem:[#allocation119_spill] sm:$0xff] }
 0x63c   :  { %3055 = vmatpush1.bf16.msra.mxu0 %v5248_v12  ;;  %v5259_v12 = vld [vmem:[#allocation120_spill] sm:$0xff] }
 0x63d   :  { %3057 = vmatprep.subr.bf16.mxu0 %v5249_v45  ;;  %v5260_v45 = vld [vmem:[#allocation121_spill] sm:$0xff] }
 0x640   :  { %3059 = vmatpush1.bf16.msra.mxu0 %v5250_v23  ;;  %v5261_v23 = vld [vmem:[#allocation122_spill] sm:$0xff] }
 0x641   :  { %3061 = vmatprep.subr.bf16.mxu0 %v5251_v30  ;;  %v5262_v30 = vld [vmem:[#allocation123_spill] sm:$0xff] }
 0x644   :  { %3063 = vmatpush1.bf16.msra.mxu0 %v5252_v5  ;;  %v5263_v5 = vld [vmem:[#allocation124_spill] sm:$0xff] }
 0x645   :  { %3065 = vmatprep.subr.bf16.mxu0 %v5253_v31  ;;  %v5264_v31 = vld [vmem:[#allocation125_spill] sm:$0xff] }
 0x648   :  { %3067 = vmatpush1.bf16.msra.mxu0 %v5254_v37  ;;  %v5265_v37 = vld [vmem:[#allocation126_spill] sm:$0xff] }
 0x649   :  { %3069 = vmatprep.subr.bf16.mxu0 %v5255_v25  ;;  %v5266_v25 = vld [vmem:[#allocation127_spill] sm:$0xff] }
 0x64c   :  { %3071 = vmatpush1.bf16.msra.mxu0 %v5256_v10  ;;  %v5267_v10 = vld [vmem:[#allocation128_spill] sm:$0xff] }
 0x64d   :  { %3073 = vmatprep.subr.bf16.mxu0 %v5257_v22  ;;  %v5268_v22 = vld [vmem:[#allocation129_spill] sm:$0xff] }
 0x650   :  { %3075 = vmatpush1.bf16.msra.mxu0 %v5258_v14  ;;  %v5269_v14 = vld [vmem:[#allocation130_spill] sm:$0xff] }
 0x651   :  { %3077 = vmatprep.subr.bf16.mxu0 %v5259_v12  ;;  %v5270_v12 = vld [vmem:[#allocation131_spill] sm:$0xff] }
 0x654   :  { %3079 = vmatpush1.bf16.msra.mxu0 %v5260_v45  ;;  %v5271_v45 = vld [vmem:[#allocation132_spill] sm:$0xff] }
 0x655   :  { %3081 = vmatprep.subr.bf16.mxu0 %v5261_v23  ;;  %v5272_v23 = vld [vmem:[#allocation133_spill] sm:$0xff] }
 0x658   :  { %3083 = vmatpush1.bf16.msra.mxu0 %v5262_v30  ;;  %v5273_v30 = vld [vmem:[#allocation134_spill] sm:$0xff] }
 0x659   :  { %3085 = vmatprep.subr.bf16.mxu0 %v5263_v5  ;;  %v5274_v5 = vld [vmem:[#allocation135_spill] sm:$0xff] }
 0x65c   :  { %3087 = vmatpush1.bf16.msra.mxu0 %v5264_v31 }
 0x65d   :  { %3089 = vmatprep.subr.bf16.mxu0 %v5265_v37 }
 0x660   :  { %3091 = vmatpush1.bf16.msra.mxu0 %v5266_v25 }
 0x661   :  { %3093 = vmatprep.subr.bf16.mxu0 %v5267_v10 }
 0x664   :  { %3095 = vmatpush1.bf16.msra.mxu0 %v5268_v22 }
 0x665   :  { %3097 = vmatprep.subr.bf16.mxu0 %v5269_v14 }
 0x668   :  { %3099 = vmatpush1.bf16.msra.mxu0 %v5270_v12 }
 0x669   :  { %3101 = vmatprep.subr.bf16.mxu0 %v5271_v45  ;;  %v5275_v45 = vld [vmem:[#allocation137_spill] sm:$0xff] }
 0x66c   :  { %3103 = vmatpush1.bf16.msra.mxu0 %v5272_v23 }
 0x66d   :  { %3105 = vmatprep.subr.bf16.mxu0 %v5273_v30 }
 0x670   :  { %3107 = vmatpush1.bf16.msra.mxu0 %v5274_v5 }
 0x6fe   :  { %v1536_v31 = vpop.f32.mrb[24].mxu0 }
 0x6ff   :  { %v1538_v37 = vpop.f32.mrb[25].mxu0  ;;  %v1547_v23 = vadd.f32 %v1536_v31, %v4371_v39 }
 0x700   :  { %v1548_v30 = vadd.f32 %v1538_v37, %v5275_v45 }
 0x701   :  { %v2462_v12 = vmul.f32 -1.442695, %v1547_v23 }
 0x702   :  { %v1542_v21 = vpop.f32.mrb[26].mxu0  ;;  %v2463_v59 = vmul.f32 -1.442695, %v1548_v30 }
 0x703   :  { %v1544_v25 = vpop.f32.mrb[27].mxu0  ;;  %v1549_v5 = vadd.f32 %v1542_v21, %v4379_v9  ;;  %3444 = vpow2.f32 %v2462_v12 }
 0x704   :  { %v1550_v55 = vadd.f32 %v1544_v25, %v4382_v54  ;;  %3446 = vpow2.f32 %v2463_v59  ;;  %v5276_v59 = vld [vmem:[#allocation141_spill] sm:$0xff] }
 0x705   :  { %v2464_v41 = vmul.f32 -1.442695, %v1549_v5  ;;  %v5277_v5 = vld [vmem:[#allocation142_spill] sm:$0xff] }
 0x706   :  { %v1750_v26 = vpop.f32.mrb[28].mxu0 }
 0x707   :  { %v1752_v10 = vpop.f32.mrb[29].mxu0  ;;  %3448 = vpow2.f32 %v2464_v41 }
 0x708   :  { %1825 = vmatprep.mubr.f32.mxu0 %v1752_v10 }
 0x709   :  { %1826 = vmatmul.mubr.f32.vlgmr.msra.gmra.mrb[32].mxu0 %v1750_v26  ;;  %v2465_v26 = vmul.f32 -1.442695, %v1550_v55 }
 0x70a   :  { %v1756_v22 = vpop.f32.mrb[30].mxu0 }
 0x70b   :  { %v1758_v14 = vpop.f32.mrb[31].mxu0  ;;  %3450 = vpow2.f32 %v2465_v26 }
 0x70c   :  { %1831 = vmatprep.mubr.f32.mxu0 %v1758_v14 }
 0x70d   :  { %1832 = vmatmul.mubr.f32.gmra.mrb[34].mxu0 %v1756_v22  ;;  %v3445_v14 = vpop.eup %3444 }
 0x70e   :  { %2011 = vmatprep.mubr.f32.mxu0 %v5095_v53  ;;  %v3447_v10 = vpop.eup %3446  ;;  %v1563_v22 = vadd.f32 1.0, %v3445_v14  ;;  %v5278_v14 = vld [vmem:[#allocation143_spill] sm:$0xff] }
 0x70f   :  { %v1564_v11 = vadd.f32 1.0, %v3447_v10 }
 0x710   :  { %3452 = vrcp.f32 %v1563_v22 }
 0x711   :  { %v3449_v53 = vpop.eup %3448  ;;  %3454 = vrcp.f32 %v1564_v11 }
 0x712   :  { %v1565_v37 = vadd.f32 1.0, %v3449_v53 }
 0x714   :  { %3456 = vrcp.f32 %v1565_v37 }
 0x715   :  { %v3451_v31 = vpop.eup %3450 }
 0x716   :  { %v1566_v23 = vadd.f32 1.0, %v3451_v31 }
 0x718   :  { %3458 = vrcp.f32 %v1566_v23 }
 0x71a   :  { %v3453_v22 = vpop.eup %3452 }
 0x71b   :  { %v3455_v53 = vpop.eup %3454  ;;  %v1846_v11 = vsub.f32 1.0, %v3453_v22 }
 0x71c   :  { %v1847_v37 = vsub.f32 1.0, %v3455_v53 }
 0x71e   :  { %v3457_v31 = vpop.eup %3456 }
 0x7dc   :  { %v1827_v21 = vpop.f32.mrb[32].mxu0 }
 0x7dd   :  { %v1838_v30 = vadd.f32 %v1827_v21, %v4391_v6  ;;  %v1829_v12 = vpop.f32.mrb[33].mxu0  ;;  %v3459_v21 = vpop.eup %3458 }
 0x7de   :  { %v1839_v55 = vadd.f32 %v1829_v12, %v5276_v59  ;;  %v1848_v12 = vsub.f32 1.0, %v3457_v31 }
 0x7df   :  { %3460 = vtanh.f32 %v1838_v30  ;;  %v1850_v30 = vmul.f32 %v1846_v11, %v4563_v32  ;;  %v5314_v11 = vld [vmem:[#allocation67_spill] sm:$0xff] }
 0x7e0   :  { %3462 = vtanh.f32 %v1839_v55  ;;  %v1833_v41 = vpop.f32.mrb[34].mxu0  ;;  %v1851_v55 = vmul.f32 %v1847_v37, %v4560_v46  ;;  %v5316_v37 = vld [vmem:[#allocation105_spill] sm:$0xff] }
 0x7e1   :  { %v1840_v25 = vadd.f32 %v1833_v41, %v5277_v5  ;;  %v1835_v26 = vpop.f32.mrb[35].mxu0  ;;  %v1849_v5 = vsub.f32 1.0, %v3459_v21 }
 0x7e2   :  { %v1841_v10 = vadd.f32 %v1835_v26, %v5278_v14 }
 0x7e3   :  { %3464 = vtanh.f32 %v1840_v25  ;;  %v1853_v39 = vmul.f32 %v1849_v5, %v4568_v52  ;;  %v5308_v52 = vld [vmem:[#allocation61_spill] sm:$0xff]  ;;  %v5311_v5 = vld [vmem:[#allocation64_spill] sm:$0xff] }
 0x7e4   :  { %3466 = vtanh.f32 %v1841_v10  ;;  %v1852_v10 = vmul.f32 %v1848_v12, %v4571_v42  ;;  %v5309_v42 = vld [vmem:[#allocation62_spill] sm:$0xff]  ;;  %v5320_v12 = vld [vmem:[#allocation109_spill] sm:$0xff] }
 0x7e9   :  { %v3461_v6 = vpop.eup %3460 }
 0x7ea   :  { %v3463_v23 = vpop.eup %3462  ;;  %v1854_v54 = vmul.f32 %v3461_v6, %v3453_v22 }
 0x7eb   :  { %v1855_v41 = vmul.f32 %v3463_v23, %v3455_v53  ;;  %v5313_v53 = vld [vmem:[#allocation66_spill] sm:$0xff]  ;;  %v5318_v23 = vld [vmem:[#allocation107_spill] sm:$0xff] }
 0x7ec   :  { %v1858_v59 = vadd.f32 %v1854_v54, %v1850_v30  ;;  %v5319_v30 = vld [vmem:[#allocation108_spill] sm:$0xff] }
 0x7ed   :  { %v3465_v26 = vpop.eup %3464  ;;  %v1859_v14 = vadd.f32 %v1855_v41, %v1851_v55  ;;  %v5321_v55 = vld [vmem:[#allocation110_spill] sm:$0xff]  ;;  %v5322_v41 = vld [vmem:[#allocation111_spill] sm:$0xff] }
 0x7ee   :  { %v3467_v25 = vpop.eup %3466  ;;  %v1856_v9 = vmul.f32 %v3465_v26, %v3457_v31  ;;  %v4640_v32 = vmul.f32 %v1858_v59, %v4410_v4  ;;  %v5283_v4 = vmov 0.0   ;;  %v5310_v59 = vld [vmem:[#allocation63_spill] sm:$0xff]  ;;  %v5315_v31 = vld [vmem:[#allocation104_spill] sm:$0xff] }
 0x7ef   :  { %v4636_v45 = vmul.f32 %v1859_v14, %v4408_v1  ;;  %v1857_v6 = vmul.f32 %v3467_v25, %v3459_v21  ;;  %v5312_v14 = vld [vmem:[#allocation65_spill] sm:$0xff]  ;;  %v5317_v21 = vld [vmem:[#allocation106_spill] sm:$0xff]  ;;  %v5323_v26 = vld [vmem:[#allocation112_spill] sm:$0xff] }
 0x7f0   :  { %v1860_v22 = vadd.f32 %v1856_v9, %v1852_v10  ;;  %v5282_v9 = vld [vmem:[#allocation37_spill] sm:$0xff]  ;;  %v5325_v10 = vld [vmem:[#allocation114_spill] sm:$0xff] }
 0x7f1   :  { %1930 = vmatprep.mubr.f32.mxu1 %v4636_v45  ;;  %v1861_v46 = vadd.f32 %v1857_v6, %v1853_v39  ;;  %v5281_v39 = vld [vmem:[#allocation20_spill] sm:$0xff]  ;;  %v5324_v25 = vld [vmem:[#allocation113_spill] sm:$0xff]  ;;  %v5326_v6 = vld [vmem:[#allocation115_spill] sm:$0xff] }
 0x7f2   :  { %1931 = vmatmul.mubr.f32.vlgmr.msra.gmra.mrb[24].mxu1 %v4640_v32  ;;  %v4649_v1 = vmul.f32 %v1860_v22, %v4423_v15  ;;  %v5285_v15 = vld [vmem:[#allocation21_spill] sm:$0xff]  ;;  %v5327_v22 = vld [vmem:[#allocation116_spill] sm:$0xff] }
 0x7f3   :  { %v4645_v54 = vmul.f32 %v1861_v46, %v4420_v3  ;;  %3179 = vmatpush1.bf16.msra.mxu1 %v5208_v38  ;;  %v5284_v3 = vld [vmem:[#allocation38_spill] sm:$0xff]  ;;  %v5328_v46 = vld [vmem:[#allocation117_spill] sm:$0xff] }
 0x7f4   :  { %3181 = vmatprep.subr.bf16.mxu1 %v5209_v44  ;;  %v5293_v38 = vld [vmem:[#allocation46_spill] sm:$0xff]  ;;  %v5294_v44 = vld [vmem:[#allocation47_spill] sm:$0xff] }
 0x7f5   :  { %1936 = vmatprep.mubr.f32.mxu1 %v4645_v54 }
 0x7f6   :  { %1937 = vmatmul.mubr.f32.gmra.mrb[26].mxu1 %v4649_v1 }
 0x7f7   :  { %3183 = vmatpush1.bf16.msra.mxu1 %v5210_v49  ;;  %v5295_v49 = vld [vmem:[#allocation48_spill] sm:$0xff] }
 0x7f8   :  { %3185 = vmatprep.subr.bf16.mxu1 %v5211_v50  ;;  %v5296_v50 = vld [vmem:[#allocation49_spill] sm:$0xff] }
 0x7fb   :  { %3187 = vmatpush1.bf16.msra.mxu1 %v5212_v58  ;;  %v5297_v58 = vld [vmem:[#allocation50_spill] sm:$0xff] }
 0x7fc   :  { %3189 = vmatprep.subr.bf16.mxu1 %v5213_v2  ;;  %v5298_v2 = vld [vmem:[#allocation51_spill] sm:$0xff] }
 0x7ff   :  { %3191 = vmatpush1.bf16.msra.mxu1 %v5214_v43  ;;  %v5299_v43 = vld [vmem:[#allocation52_spill] sm:$0xff] }
 0x800   :  { %3193 = vmatprep.subr.bf16.mxu1 %v5215_v27  ;;  %v5300_v27 = vld [vmem:[#allocation53_spill] sm:$0xff] }
 0x803   :  { %3195 = vmatpush1.bf16.msra.mxu1 %v5216_v7  ;;  %v5301_v7 = vld [vmem:[#allocation54_spill] sm:$0xff] }
 0x804   :  { %3197 = vmatprep.subr.bf16.mxu1 %v5217_v13  ;;  %v5302_v13 = vld [vmem:[#allocation55_spill] sm:$0xff] }
 0x807   :  { %3199 = vmatpush1.bf16.msra.mxu1 %v5218_v19  ;;  %v5303_v19 = vld [vmem:[#allocation56_spill] sm:$0xff] }
 0x808   :  { %3201 = vmatprep.subr.bf16.mxu1 %v5219_v20  ;;  %v5304_v20 = vld [vmem:[#allocation57_spill] sm:$0xff] }
 0x80b   :  { %3203 = vmatpush1.bf16.msra.mxu1 %v5220_v47  ;;  %v5305_v47 = vld [vmem:[#allocation58_spill] sm:$0xff] }
 0x80c   :  { %3205 = vmatprep.subr.bf16.mxu1 %v5221_v17  ;;  %v5306_v17 = vld [vmem:[#allocation59_spill] sm:$0xff] }
 0x80f   :  { %3207 = vmatpush1.bf16.msra.mxu1 %v5222_v60  ;;  %v5280_v60 = vld [vmem:[#allocation36_spill] sm:$0xff] }
 0x810   :  { %3209 = vmatprep.subr.bf16.mxu1 %v5223_v29 }
 0x813   :  { %3211 = vmatpush1.bf16.msra.mxu1 %v5224_v51 }
 0x814   :  { %3213 = vmatprep.subr.bf16.mxu1 %v5225_v36 }
 0x817   :  { %3215 = vmatpush1.bf16.msra.mxu1 %v5226_v16  ;;  %v5279_v16 = vld [vmem:[#allocation19_spill] sm:$0xff] }
 0x818   :  { %3217 = vmatprep.subr.bf16.mxu1 %v5227_v34 }
 0x81b   :  { %3219 = vmatpush1.bf16.msra.mxu1 %v5228_v40 }
 0x81c   :  { %3221 = vmatprep.subr.bf16.mxu1 %v5229_v24 }
 0x81f   :  { %3223 = vmatpush1.bf16.msra.mxu1 %v5230_v18 }
 0x820   :  { %3225 = vmatprep.subr.bf16.mxu1 %v5231_v28 }
 0x823   :  { %3227 = vmatpush1.bf16.msra.mxu1 %v5232_v35 }
 0x824   :  { %3229 = vmatprep.subr.bf16.mxu1 %v5233_v48 }
 0x827   :  { %3231 = vmatpush1.bf16.msra.mxu1 %v5235_v56  ;;  %v5288_v56 = vld [vmem:[#allocation41_spill] sm:$0xff] }
 0x828   :  { %3233 = vmatprep.subr.bf16.mxu1 %v5236_v0  ;;  %v5287_v0 = vld [vmem:[#allocation40_spill] sm:$0xff] }
 0x82b   :  { %3235 = vmatpush1.bf16.msra.mxu1 %v5239_v33  ;;  %v5286_v33 = vld [vmem:[#allocation39_spill] sm:$0xff] }
 0x82c   :  { %3237 = vmatprep.subr.bf16.mxu1 %v5240_v62  ;;  %v5289_v62 = vld [vmem:[#allocation42_spill] sm:$0xff] }
 0x82f   :  { %3239 = vmatpush1.bf16.msra.mxu1 %v5241_v61  ;;  %v5307_v61 = vld [vmem:[#allocation60_spill] sm:$0xff] }
 0x8c5   :  { %v1932_v40 = vpop.f32.mrb[24].mxu1 }
 0x8c6   :  { %v1934_v24 = vpop.f32.mrb[25].mxu1  ;;  %v1943_v18 = vmul.f32 %v4502_v57, %v1932_v40  ;;  %v5290_v57 = vld [vmem:[#allocation43_spill] sm:$0xff]  ;;  %v5329_v40 = vld [vmem:[#allocation118_spill] sm:$0xff] }
 0x8c7   :  { %v1944_v48 = vmul.f32 %v4508_v8, %v1934_v24  ;;  %v5292_v8 = vld [vmem:[#allocation45_spill] sm:$0xff]  ;;  %v5330_v24 = vld [vmem:[#allocation119_spill] sm:$0xff] }
 0x8c9   :  { %v1938_v34 = vpop.f32.mrb[26].mxu1 }
 0x8ca   :  { %v1945_v28 = vmul.f32 %v4505_v63, %v1938_v34  ;;  %v1940_v35 = vpop.f32.mrb[27].mxu1  ;;  %v5291_v63 = vld [vmem:[#allocation44_spill] sm:$0xff] }
 0x8cb   :  { %v1946_v36 = vmul.f32 %v5279_v16, %v1940_v35  ;;  %v5331_v34 = vld [vmem:[#allocation120_spill] sm:$0xff]  ;;  %v5334_v35 = vld [vmem:[#allocation123_spill] sm:$0xff]  ;;  %v5336_v16 = vld [vmem:[#allocation125_spill] sm:$0xff] }
 0x8cc   :  { %v3174_v51 = vpack.c.bf16 %v1945_v28, %v1943_v18  ;;  %v5332_v18 = vld [vmem:[#allocation121_spill] sm:$0xff]  ;;  %v5333_v28 = vld [vmem:[#allocation122_spill] sm:$0xff] }
 0x8cd   :  { %v3172_v29 = vpack.c.bf16 %v1946_v36, %v1944_v48  ;;  %v5335_v48 = vld [vmem:[#allocation124_spill] sm:$0xff]  ;;  %v5337_v36 = vld [vmem:[#allocation126_spill] sm:$0xff] }
 0x8cf   :  { %3173 = vmatprep.subr.bf16.mxu0 %v3172_v29  ;;  %v5339_v29 = vld [vmem:[#allocation128_spill] sm:$0xff] }
 0x8d0   :  { %3175 = vmatpush1.bf16.msra.mxu0 %v3174_v51  ;;  %v5338_v51 = vld [vmem:[#allocation127_spill] sm:$0xff] }
 0x8d1   :  { %3241 = vmatprep.subr.bf16.mxu0 %v5280_v60  ;;  %v5340_v60 = vld [vmem:[#allocation129_spill] sm:$0xff] }
 0x8d3   :  { %2472 = vmatmul.mubr.msk.f32.vlgmr.msra.gmra.mrb[36].mxu0 %vm824_vm0, %v5281_v39 }
 0x8d4   :  { %3243 = vmatpush1.bf16.msra.mxu0 %v5282_v9  ;;  %2017 = vmatprep.mubr.f32.mxu0 %v5283_v4  ;;  %v5341_v9 = vld [vmem:[#allocation130_spill] sm:$0xff] }
 0x8d5   :  { %3245 = vmatprep.subr.bf16.mxu0 %v5284_v3  ;;  %v5342_v3 = vld [vmem:[#allocation131_spill] sm:$0xff] }
 0x8d7   :  { %2473 = vmatmul.mubr.msk.f32.gmra.mrb[38].mxu0 %vm824_vm0, %v5285_v15 }
 0x8d8   :  { %3247 = vmatpush1.bf16.msra.mxu0 %v5286_v33  ;;  %2197 = vmatprep.mubr.f32.mxu0 %v4636_v45  ;;  %v5343_v33 = vld [vmem:[#allocation132_spill] sm:$0xff] }
 0x8d9   :  { %3249 = vmatprep.subr.bf16.mxu0 %v5287_v0  ;;  %v5344_v0 = vld [vmem:[#allocation133_spill] sm:$0xff] }
 0x8dc   :  { %3251 = vmatpush1.bf16.msra.mxu0 %v5288_v56  ;;  %v5345_v56 = vld [vmem:[#allocation134_spill] sm:$0xff] }
 0x8dd   :  { %3253 = vmatprep.subr.bf16.mxu0 %v5289_v62  ;;  %v5346_v62 = vld [vmem:[#allocation135_spill] sm:$0xff] }
 0x8e0   :  { %3255 = vmatpush1.bf16.msra.mxu0 %v5290_v57 }
 0x8e1   :  { %3257 = vmatprep.subr.bf16.mxu0 %v5291_v63 }
 0x8e4   :  { %3259 = vmatpush1.bf16.msra.mxu0 %v5292_v8 }
 0x8e5   :  { %3261 = vmatprep.subr.bf16.mxu0 %v5293_v38 }
 0x8e8   :  { %3263 = vmatpush1.bf16.msra.mxu0 %v5294_v44 }
 0x8e9   :  { %3265 = vmatprep.subr.bf16.mxu0 %v5295_v49 }
 0x8ec   :  { %3267 = vmatpush1.bf16.msra.mxu0 %v5296_v50 }
 0x8ed   :  { %3269 = vmatprep.subr.bf16.mxu0 %v5297_v58 }
 0x8f0   :  { %3271 = vmatpush1.bf16.msra.mxu0 %v5298_v2 }
 0x8f1   :  { %3273 = vmatprep.subr.bf16.mxu0 %v5299_v43  ;;  %v5347_v43 = vld [vmem:[#allocation95_spill] sm:$0xff] }
 0x8f4   :  { %3275 = vmatpush1.bf16.msra.mxu0 %v5300_v27 }
 0x8f5   :  { %3277 = vmatprep.subr.bf16.mxu0 %v5301_v7 }
 0x8f8   :  { %3279 = vmatpush1.bf16.msra.mxu0 %v5302_v13  ;;  %v5348_v13 = vld [vmem:[#allocation97_spill] sm:$0xff] }
 0x8f9   :  { %3281 = vmatprep.subr.bf16.mxu0 %v5303_v19 }
 0x8fc   :  { %3283 = vmatpush1.bf16.msra.mxu0 %v5304_v20 }
 0x8fd   :  { %3285 = vmatprep.subr.bf16.mxu0 %v5305_v47 }
 0x900   :  { %3287 = vmatpush1.bf16.msra.mxu0 %v5306_v17 }
 0x901   :  { %3289 = vmatprep.subr.bf16.mxu0 %v5307_v61  ;;  %v5349_v61 = vld [vmem:[#allocation99_spill] sm:$0xff] }
 0x904   :  { %3291 = vmatpush1.bf16.msra.mxu0 %v5308_v52 }
 0x905   :  { %3293 = vmatprep.subr.bf16.mxu0 %v5309_v42 }
 0x908   :  { %3295 = vmatpush1.bf16.msra.mxu0 %v5310_v59  ;;  %v5350_v59 = vld [vmem:[#allocation101_spill] sm:$0xff] }
 0x909   :  { %3297 = vmatprep.subr.bf16.mxu0 %v5311_v5 }
 0x90c   :  { %3299 = vmatpush1.bf16.msra.mxu0 %v5312_v14 }
 0x90d   :  { %3301 = vmatprep.subr.bf16.mxu0 %v5313_v53 }
 0x910   :  { %3303 = vmatpush1.bf16.msra.mxu0 %v5314_v11 }
 0x911   :  { %3309 = vmatprep.subr.bf16.mxu0 %v5315_v31 }
 0x913   :  { %2198 = vmatmul.mubr.f32.vlgmr.msra.gmra.mrb[40].mxu0 %v4640_v32 }
 0x914   :  { %2203 = vmatprep.mubr.f32.mxu0 %v4645_v54  ;;  %3311 = vmatpush1.bf16.msra.mxu0 %v5316_v37 }
 0x915   :  { %3313 = vmatprep.subr.bf16.mxu0 %v5317_v21 }
 0x917   :  { %2204 = vmatmul.mubr.f32.gmra.mrb[42].mxu0 %v4649_v1 }
 0x918   :  { %3315 = vmatpush1.bf16.msra.mxu0 %v5318_v23 }
 0x919   :  { %3317 = vmatprep.subr.bf16.mxu0 %v5319_v30 }
 0x91c   :  { %3319 = vmatpush1.bf16.msra.mxu0 %v5320_v12 }
 0x91d   :  { %3321 = vmatprep.subr.bf16.mxu0 %v5321_v55 }
 0x920   :  { %3323 = vmatpush1.bf16.msra.mxu0 %v5322_v41 }
 0x921   :  { %3325 = vmatprep.subr.bf16.mxu0 %v5323_v26 }
 0x924   :  { %3327 = vmatpush1.bf16.msra.mxu0 %v5324_v25 }
 0x925   :  { %3329 = vmatprep.subr.bf16.mxu0 %v5325_v10 }
 0x928   :  { %3331 = vmatpush1.bf16.msra.mxu0 %v5326_v6 }
 0x929   :  { %3333 = vmatprep.subr.bf16.mxu0 %v5327_v22 }
 0x92c   :  { %3335 = vmatpush1.bf16.msra.mxu0 %v5328_v46 }
 0x92d   :  { %3337 = vmatprep.subr.bf16.mxu0 %v5329_v40 }
 0x930   :  { %3339 = vmatpush1.bf16.msra.mxu0 %v5330_v24 }
 0x931   :  { %3341 = vmatprep.subr.bf16.mxu0 %v5331_v34 }
 0x934   :  { %3343 = vmatpush1.bf16.msra.mxu0 %v5332_v18 }
 0x935   :  { %3345 = vmatprep.subr.bf16.mxu0 %v5333_v28 }
 0x938   :  { %3347 = vmatpush1.bf16.msra.mxu0 %v5334_v35 }
 0x939   :  { %3349 = vmatprep.subr.bf16.mxu0 %v5335_v48 }
 0x93c   :  { %3351 = vmatpush1.bf16.msra.mxu0 %v5336_v16  ;;  %v5351_v16 = vld [vmem:[#allocation136_spill] sm:$0xff] }
 0x93d   :  { %3353 = vmatprep.subr.bf16.mxu0 %v5337_v36 }
 0x940   :  { %3355 = vmatpush1.bf16.msra.mxu0 %v5338_v51 }
 0x941   :  { %3357 = vmatprep.subr.bf16.mxu0 %v5339_v29  ;;  %v5353_v29 = vld [vmem:[#allocation138_spill] sm:$0xff] }
 0x944   :  { %3359 = vmatpush1.bf16.msra.mxu0 %v5340_v60 }
 0x945   :  { %3361 = vmatprep.subr.bf16.mxu0 %v5341_v9  ;;  %v5354_v9 = vld [vmem:[#allocation139_spill] sm:$0xff] }
 0x948   :  { %3363 = vmatpush1.bf16.msra.mxu0 %v5342_v3 }
 0x949   :  { %3365 = vmatprep.subr.bf16.mxu0 %v5343_v33 }
 0x94c   :  { %3367 = vmatpush1.bf16.msra.mxu0 %v5344_v0 }
 0x94d   :  { %3369 = vmatprep.subr.bf16.mxu0 %v5345_v56 }
 0x950   :  { %3371 = vmatpush1.bf16.msra.mxu0 %v5346_v62 }
 0x9a6   :  { %v2013_v57 = vpop.f32.mrb[36].mxu0 }
 0x9a7   :  { %v2015_v63 = vpop.f32.mrb[37].mxu0  ;;  %v4764_v38 = vsub.f32 %v2013_v57, %v4640_v32 }
 0x9a8   :  { %v4761_v8 = vsub.f32 %v2015_v63, %v4636_v45 }
 0x9aa   :  { %v2019_v44 = vpop.f32.mrb[38].mxu0  ;;  %2092 = vmatprep.mubr.f32.mxu1 %v4761_v8 }
 0x9ab   :  { %v2021_v49 = vpop.f32.mrb[39].mxu0  ;;  %2093 = vmatmul.mubr.f32.vlgmr.msra.gmra.mrb[28].mxu1 %v4764_v38  ;;  %v4772_v58 = vsub.f32 %v2019_v44, %v4649_v1 }
 0x9ac   :  { %v4769_v50 = vsub.f32 %v2021_v49, %v4645_v54 }
 0x9ae   :  { %2098 = vmatprep.mubr.f32.mxu1 %v4769_v50 }
 0x9af   :  { %2099 = vmatmul.mubr.f32.gmra.mrb[30].mxu1 %v4772_v58 }
 0x9b0   :  { %2306 = vmatprep.mubr.f32.mxu1 %v5283_v4 }
 0x9e6   :  { %v2199_v2 = vpop.f32.mrb[40].mxu0 }
 0x9e7   :  { %v2210_v27 = vadd.f32 %v2199_v2, %v5347_v43  ;;  %v2201_v7 = vpop.f32.mrb[41].mxu0 }
 0x9e8   :  { %v2211_v19 = vadd.f32 %v2201_v7, %v5348_v13  ;;  %v5355_v7 = vld [vmem:[#allocation140_spill] sm:$0xff] }
 0x9e9   :  { %v2478_v20 = vmul.f32 -1.442695, %v2210_v27 }
 0x9ea   :  { %v2479_v47 = vmul.f32 -1.442695, %v2211_v19  ;;  %v2205_v17 = vpop.f32.mrb[42].mxu0 }
 0x9eb   :  { %3468 = vpow2.f32 %v2478_v20  ;;  %v2212_v52 = vadd.f32 %v2205_v17, %v5349_v61  ;;  %v2207_v42 = vpop.f32.mrb[43].mxu0  ;;  %v5356_v20 = vld [vmem:[#allocation141_spill] sm:$0xff]  ;;  %v5357_v61 = vld [vmem:[#allocation142_spill] sm:$0xff] }
 0x9ec   :  { %3470 = vpow2.f32 %v2479_v47  ;;  %v2213_v5 = vadd.f32 %v2207_v42, %v5350_v59  ;;  %v5358_v59 = vld [vmem:[#allocation143_spill] sm:$0xff] }
 0x9ed   :  { %v2480_v14 = vmul.f32 -1.442695, %v2212_v52 }
 0x9ee   :  { %v2481_v53 = vmul.f32 -1.442695, %v2213_v5 }
 0x9ef   :  { %3472 = vpow2.f32 %v2480_v14 }
 0x9f0   :  { %3474 = vpow2.f32 %v2481_v53 }
 0x9f5   :  { %v3469_v11 = vpop.eup %3468 }
 0x9f6   :  { %v3471_v31 = vpop.eup %3470  ;;  %v2226_v37 = vadd.f32 1.0, %v3469_v11 }
 0x9f7   :  { %v2227_v21 = vadd.f32 1.0, %v3471_v31 }
 0x9f8   :  { %3476 = vrcp.f32 %v2226_v37 }
 0x9f9   :  { %v3473_v23 = vpop.eup %3472  ;;  %3478 = vrcp.f32 %v2227_v21 }
 0x9fa   :  { %v3475_v30 = vpop.eup %3474  ;;  %v2228_v12 = vadd.f32 1.0, %v3473_v23 }
 0x9fb   :  { %v2229_v55 = vadd.f32 1.0, %v3475_v30 }
 0x9fc   :  { %3480 = vrcp.f32 %v2228_v12 }
 0x9fd   :  { %3482 = vrcp.f32 %v2229_v55 }
 0xa02   :  { %v3477_v41 = vpop.eup %3476 }
 0xa03   :  { %v3479_v26 = vpop.eup %3478  ;;  %v2238_v6 = vmul.f32 %v3477_v41, %v4640_v32 }
 0xa04   :  { %v2239_v46 = vmul.f32 %v3479_v26, %v4636_v45 }
 0xa06   :  { %v3481_v25 = vpop.eup %3480 }
 0xa07   :  { %v3483_v10 = vpop.eup %3482  ;;  %v2240_v22 = vmul.f32 %v3481_v25, %v4649_v1 }
 0xa08   :  { %v2241_v40 = vmul.f32 %v3483_v10, %v4645_v54 }
 0xa09   :  { %v3306_v24 = vpack.c.bf16 %v2240_v22, %v2238_v6 }
 0xa0a   :  { %v3304_v34 = vpack.c.bf16 %v2241_v40, %v2239_v46 }
 0xa0c   :  { %3305 = vmatprep.subr.bf16.mxu1 %v3304_v34 }
 0xa0d   :  { %3307 = vmatpush1.bf16.msra.mxu1 %v3306_v24 }
 0xa10   :  { %2482 = vmatmul.mubr.msk.f32.vlgmr.msra.gmra.mrb[32].mxu1 %vm824_vm0, %v5281_v39  ;;  %v5352_v39 = vld [vmem:[#allocation137_spill] sm:$0xff] }
 0xa11   :  { %2312 = vmatprep.mubr.f32.mxu1 %v5283_v4 }
 0xa14   :  { %2483 = vmatmul.mubr.msk.f32.gmra.mrb[34].mxu1 %vm824_vm0, %v5285_v15 }
 0xa7e   :  { %v2094_v18 = vpop.f32.mrb[28].mxu1 }
 0xa7f   :  { %v2096_v32 = vpop.f32.mrb[29].mxu1  ;;  %v2105_v36 = vadd.f32 %v2094_v18, %v5351_v16  ;;  %v3515_v18 = vld [vmem:[#allocation7] sm:$0xff]  ;;  %v3518_v16 = vld [vmem:[#allocation7 + $0x18] sm:$0xff] }
 0xa80   :  { %v2106_v51 = vadd.f32 %v2096_v32, %v5352_v39 }
 0xa81   :  { %v2474_v4 = vmul.f32 -1.442695, %v2105_v36 }
 0xa82   :  { %v2100_v28 = vpop.f32.mrb[30].mxu1  ;;  %v2475_v15 = vmul.f32 -1.442695, %v2106_v51 }
 0xa83   :  { %v2102_v1 = vpop.f32.mrb[31].mxu1  ;;  %v2107_v60 = vadd.f32 %v2100_v28, %v5353_v29  ;;  %3484 = vpow2.f32 %v2474_v4 }
 0xa84   :  { %v2108_v3 = vadd.f32 %v2102_v1, %v5354_v9  ;;  %3486 = vpow2.f32 %v2475_v15 }
 0xa85   :  { %v2476_v33 = vmul.f32 -1.442695, %v2107_v60 }
 0xa86   :  { %v2477_v0 = vmul.f32 -1.442695, %v2108_v3 }
 0xa87   :  { %3488 = vpow2.f32 %v2476_v33 }
 0xa88   :  { %3490 = vpow2.f32 %v2477_v0 }
 0xa8d   :  { %v3485_v56 = vpop.eup %3484 }
 0xa8e   :  { %v3487_v62 = vpop.eup %3486  ;;  %v2121_v57 = vadd.f32 1.0, %v3485_v56 }
 0xa8f   :  { %v2122_v44 = vadd.f32 1.0, %v3487_v62 }
 0xa90   :  { %3492 = vrcp.f32 %v2121_v57 }
 0xa91   :  { %v3489_v63 = vpop.eup %3488  ;;  %3494 = vrcp.f32 %v2122_v44 }
 0xa92   :  { %v3491_v49 = vpop.eup %3490  ;;  %v2123_v2 = vadd.f32 1.0, %v3489_v63 }
 0xa93   :  { %v2124_v43 = vadd.f32 1.0, %v3491_v49 }
 0xa94   :  { %3496 = vrcp.f32 %v2123_v2 }
 0xa95   :  { %3498 = vrcp.f32 %v2124_v43 }
 0xa9a   :  { %v3493_v14 = vpop.eup %3492 }
 0xa9b   :  { %v3495_v53 = vpop.eup %3494  ;;  %v2404_v11 = vsub.f32 1.0, %v3493_v14 }
 0xa9c   :  { %v2405_v37 = vsub.f32 1.0, %v3495_v53 }
 0xa9d   :  { %v2408_v41 = vmul.f32 %v2404_v11, %v4764_v38 }
 0xa9e   :  { %v3497_v31 = vpop.eup %3496  ;;  %v2409_v10 = vmul.f32 %v2405_v37, %v4761_v8  ;;  %v3517_v8 = vld [vmem:[#allocation7 + $0x10] sm:$0xff] }
 0xa9f   :  { %v3499_v21 = vpop.eup %3498  ;;  %v2406_v12 = vsub.f32 1.0, %v3497_v31 }
 0xaa0   :  { %v2407_v26 = vsub.f32 1.0, %v3499_v21 }
 0xaa1   :  { %v2410_v34 = vmul.f32 %v2406_v12, %v4772_v58 }
 0xaa2   :  { %v2411_v1 = vmul.f32 %v2407_v26, %v4769_v50 }
 0xae3   :  { %v2308_v35 = vpop.f32.mrb[32].mxu1 }
 0xae4   :  { %v2310_v45 = vpop.f32.mrb[33].mxu1 }
 0xae5   :  { %2383 = vmatprep.mubr.f32.mxu0 %v2310_v45 }
 0xae6   :  { %2384 = vmatmul.mubr.f32.vlgmr.msra.gmra.mrb[44].mxu0 %v2308_v35  ;;  %v3516_v35 = vld [vmem:[#allocation7 + $0x8] sm:$0xff] }
 0xae7   :  { %v2314_v54 = vpop.f32.mrb[34].mxu1 }
 0xae8   :  { %v2316_v48 = vpop.f32.mrb[35].mxu1 }
 0xae9   :  { %2389 = vmatprep.mubr.f32.mxu0 %v2316_v48 }
 0xaea   :  { %2390 = vmatmul.mubr.f32.gmra.mrb[46].mxu0 %v2314_v54 }
 0xbb9   :  { %v2385_v27 = vpop.f32.mrb[44].mxu0 }
 0xbba   :  { %v2396_v13 = vadd.f32 %v2385_v27, %v5355_v7  ;;  %v2387_v19 = vpop.f32.mrb[45].mxu0 }
 0xbbb   :  { %v2397_v47 = vadd.f32 %v2387_v19, %v5356_v20 }
 0xbbc   :  { %3500 = vtanh.f32 %v2396_v13 }
 0xbbd   :  { %3502 = vtanh.f32 %v2397_v47  ;;  %v2391_v17 = vpop.f32.mrb[46].mxu0 }
 0xbbe   :  { %v2398_v52 = vadd.f32 %v2391_v17, %v5357_v61  ;;  %v2393_v42 = vpop.f32.mrb[47].mxu0 }
 0xbbf   :  { %v2399_v5 = vadd.f32 %v2393_v42, %v5358_v59 }
 0xbc0   :  { %3504 = vtanh.f32 %v2398_v52 }
 0xbc1   :  { %3506 = vtanh.f32 %v2399_v5 }
 0xbc6   :  { %v3501_v23 = vpop.eup %3500 }
 0xbc7   :  { %v3503_v30 = vpop.eup %3502  ;;  %v2412_v55 = vmul.f32 %v3501_v23, %v3493_v14 }
 0xbc8   :  { %v2413_v25 = vmul.f32 %v3503_v30, %v3495_v53 }
 0xbc9   :  { %v2416_v6 = vadd.f32 %v2412_v55, %v2408_v41 }
 0xbca   :  { %v3505_v22 = vpop.eup %3504  ;;  %v2417_v46 = vadd.f32 %v2413_v25, %v2409_v10 }
 0xbcb   :  { %v3507_v40 = vpop.eup %3506  ;;  %v2414_v24 = vmul.f32 %v3505_v22, %v3497_v31  ;;  %v2420_v32 = vmul.f32 %v3515_v18, %v2416_v6 }
 0xbcc   :  { %v2415_v28 = vmul.f32 %v3507_v40, %v3499_v21  ;;  %v2421_v45 = vmul.f32 %v3516_v35, %v2417_v46 }
 0xbcd   :  { %v2418_v54 = vadd.f32 %v2414_v24, %v2410_v34  ;;  %2424 = vst [vmem:[#allocation13] sm:$0xff] %v2420_v32 }
 0xbce   :  { %v2419_v38 = vadd.f32 %v2415_v28, %v2411_v1  ;;  %2425 = vst [vmem:[#allocation13 + $0x8] sm:$0xff] %v2421_v45 }
 0xbcf   :  { %v2422_v48 = vmul.f32 %v3517_v8, %v2418_v54 }
 0xbd0   :  { %v2423_v36 = vmul.f32 %v3518_v16, %v2419_v38 }
 0xbd1   :  { %2426 = vst [vmem:[#allocation13 + $0x10] sm:$0xff] %v2422_v48 }
 0xbd2   :  { %2427 = vst [vmem:[#allocation13 + $0x18] sm:$0xff] %v2423_v36 }
 0xbd3   :  { %3662 = shalt.err (!%p3659_p10)
}
 0xbd4   :  { %s3663_s24 = scalar_lea.hbm %s4825_s8, 512 }
 0xbd5   :  { %p3664_p11 = scmp.ne.s32.totalorder %s4825_s8, %s3663_s24  ;;  %p3667_p12 = scmp.lt.u32.totalorder %s3663_s24, %s4825_s8 }
 0xbd7   :  { %p3669_p13 = pnand %p3667_p12, %p3664_p11 }
 0xbd9   :  { %3672 = shalt.err (!%p3669_p13)
}
 0xbda   :  { %2439 = dma.vmem_to_hbm [thread:$0]  %s2434_s21, 512, %s4825_s8, [#allocation4], %s3690_s3, %s3690_s3, %s3691_s20  }
 0xbdb   :  { %3681 = dma.done.wait [#allocation4], 512  }
 0xbdc   :  { %3682 = vsyncadd [#allocation4], 4294966784 }
 0xbdd   :  { %2443 = vsyncpa [#allocation3], 1 }
 0xbde   :  { %2444 = vsyncpa [#allocation6], 1 }
 0xbdf   :  { %2445 = vsyncpa [#allocation9], 1 }
 0xbe0   :  { %2446 = vsyncpa [#allocation12], 1 }
 0xbe1   :  { %2447 = vsyncpa [#allocation4], 1 }

</bundles_post_ra>
